<compile_context>
chip_gen: v5e
topology: v5e:2x2
jax: 0.10.0
libtpu: 0.0.40
codegen_flags: <defaults>
</compile_context>

<pallas_src>
import numpy as np
import jax
import jax.numpy as jnp
from jax import lax
from jax.experimental import pallas as pl
from jax.experimental.pallas import tpu as pltpu

_B_TILE = 128       # images per grid step (lane axis)
_PADE = 400         # padded rows per input parity plane (>= 28*14 + 2)
_C1_PLANE = 336     # 24 rows * width 14 per conv1 (channel, parity) plane
_C1_CH = 16         # conv1 row chunk (336 = 21 * 16)
_P1_PLANE = 144     # 12 rows * width 12 per pool1 channel plane
_P1_ROWS = 880      # p1 scratch rows (6*144 valid + zeroed padding)
_C2_PLANE = 96      # 8 rows * width 12 per conv2 channel plane
_C2_CH = 16         # conv2 row chunk (96 = 6 * 16)


# ---------------------------------------------------------------------------
# Kernel: full forward pass for one tile of 128 images.
# ---------------------------------------------------------------------------
def _lenet_kernel(x_ref, w1_ref, b1_ref, dA_ref, dB_ref,
                  w2_ref, b2_ref, off2_ref,
                  w1f_ref, b1f_ref, w2f_ref, b2f_ref, w3f_ref, b3f_ref,
                  out_ref, c1_ref, p1_ref, c2_ref, p2_ref):
    f32 = jnp.float32
    B = x_ref.shape[1]                       # 128 images on the lane axis

    # ----- conv1 + ReLU: 1x28x28 -> 6x24x24, stored as even-x / odd-x planes.
    # Input ref: rows [0,400) = even-x pixel plane (width 14, flat y*14+u),
    #            rows [400,800) = odd-x plane.  dA/dB are per-tap flat offsets
    # (already including the 400 offset for the odd plane).
    # c1_ref row (c*2 + parity)*336 + y*14 + k holds conv1(c, y, 2k+parity).
    def conv1_chunk(chunk, carry):
        r0 = chunk * _C1_CH

        def tap(t, accs):
            sA = x_ref[pl.ds(r0 + dA_ref[t], _C1_CH), :]     # feeds even-x out
            sB = x_ref[pl.ds(r0 + dB_ref[t], _C1_CH), :]     # feeds odd-x out
            tb = t * 6
            accE = tuple(accs[c] + w1_ref[tb + c] * sA for c in range(6))
            accO = tuple(accs[6 + c] + w1_ref[tb + c] * sB for c in range(6))
            return accE + accO

        zeros = tuple(jnp.zeros((_C1_CH, B), f32) for _ in range(12))
        accs = lax.fori_loop(0, 25, tap, zeros)
        for c in range(6):
            be = (c * 2) * _C1_PLANE
            bo = (c * 2 + 1) * _C1_PLANE
            c1_ref[pl.ds(be + r0, _C1_CH), :] = jnp.maximum(
                accs[c] + b1_ref[c], 0.0)
            c1_ref[pl.ds(bo + r0, _C1_CH), :] = jnp.maximum(
                accs[6 + c] + b1_ref[c], 0.0)
        return carry

    lax.fori_loop(0, _C1_PLANE // _C1_CH, conv1_chunk, 0)

    # ----- pool1 (2x2/2): 6x24x24 -> 6x12x12 (pure elementwise max). --------
    # Zero the p1 padding rows (only ever read by garbage conv2 columns).
    p1_ref[6 * _P1_PLANE:_P1_ROWS, :] = jnp.zeros(
        (_P1_ROWS - 6 * _P1_PLANE, B), f32)

    for c in range(6):
        be = (c * 2) * _C1_PLANE          # even-x conv1 plane of channel c
        bo = (c * 2 + 1) * _C1_PLANE      # odd-x plane
        pb = c * _P1_PLANE                # pool1 plane base (width 12)

        def pool1_row(yp, carry, be=be, bo=bo, pb=pb):
            t0 = (2 * yp) * 14
            t1 = t0 + 14
            m = jnp.maximum(
                jnp.maximum(c1_ref[pl.ds(be + t0, 12), :],
                            c1_ref[pl.ds(bo + t0, 12), :]),
                jnp.maximum(c1_ref[pl.ds(be + t1, 12), :],
                            c1_ref[pl.ds(bo + t1, 12), :]))
            p1_ref[pl.ds(pb + yp * 12, 12), :] = m
            return carry

        lax.fori_loop(0, 12, pool1_row, 0)

    # ----- conv2 + ReLU: 6x12x12 -> 12x8x8 (width-12 flat rows). ------------
    # c2_ref row co*96 + y2*12 + xo; columns xo >= 8 are garbage (never read).
    def conv2_chunk(chunk, carry):
        r0 = chunk * _C2_CH

        def tap(t, accs):
            d = off2_ref[t]               # ki*12 + kj
            t12 = t * 12
            new = list(accs)
            for cin in range(6):
                sl = p1_ref[pl.ds(cin * _P1_PLANE + r0 + d, _C2_CH), :]
                wb = cin * 300 + t12
                for co in range(12):
                    new[co] = new[co] + w2_ref[wb + co] * sl
            return tuple(new)

        zeros = tuple(jnp.zeros((_C2_CH, B), f32) for _ in range(12))
        accs = lax.fori_loop(0, 25, tap, zeros)
        for co in range(12):
            c2_ref[pl.ds(co * _C2_PLANE + r0, _C2_CH), :] = jnp.maximum(
                accs[co] + b2_ref[co], 0.0)
        return carry

    lax.fori_loop(0, _C2_PLANE // _C2_CH, conv2_chunk, 0)

    # ----- pool2 + flatten: 12x8x8 -> (192, B), torch feature order. --------
    for c in range(12):
        cb = c * _C2_PLANE
        ob = c * 16

        def pool2_row(yq, carry, cb=cb, ob=ob):
            top = c2_ref[pl.ds(cb + (2 * yq) * 12, 8), :]
            bot = c2_ref[pl.ds(cb + (2 * yq + 1) * 12, 8), :]
            v = jnp.maximum(top, bot)                       # (8, B)
            for q in range(4):
                h = jnp.maximum(v[2 * q:2 * q + 1, :], v[2 * q + 1:2 * q + 2, :])
                p2_ref[pl.ds(ob + yq * 4 + q, 1), :] = h
            return carry

        lax.fori_loop(0, 4, pool2_row, 0)

    # ----- FC stack on the MXU (feature-major, batch on lanes). -------------
    p2 = p2_ref[...]                                              # (192, B)
    h1 = jnp.maximum(jnp.dot(w1f_ref[...], p2,
                             preferred_element_type=f32) + b1f_ref[...], 0.0)
    h2 = jnp.maximum(jnp.dot(w2f_ref[...], h1,
                             preferred_element_type=f32) + b2f_ref[...], 0.0)
    out_ref[0, :, :] = jnp.dot(w3f_ref[...], h2,
                               preferred_element_type=f32) + b3f_ref[...]


# ---------------------------------------------------------------------------
# Wrapper: parameter rearrangement (glue) + pallas_call.
# ---------------------------------------------------------------------------
def lenet_pallas(x, params):
    f32 = jnp.float32
    n = x.shape[0]
    nt = -(-n // _B_TILE)
    npad = nt * _B_TILE

    # Image layout: columns = images (lanes); rows = de-interleaved pixels.
    # Even-x plane occupies rows [0, 392) (padded to 400), odd-x plane
    # rows [400, 792) (padded to 800).  Flat index within a plane = y*14 + u.
    xf = jnp.pad(x.astype(f32).reshape(n, 784), ((0, npad - n), (0, 0)))
    xde = xf.reshape(npad, 392, 2)
    even = jnp.pad(xde[:, :, 0].T, ((0, _PADE - 392), (0, 0)))    # (400, npad)
    odd = jnp.pad(xde[:, :, 1].T, ((0, _PADE - 392), (0, 0)))     # (400, npad)
    xt = jnp.concatenate([even, odd], axis=0)                     # (800, npad)

    # Conv1 weight / offset tables (SMEM).  Tap t = ki*5 + kj.
    w1s = jnp.transpose(params["conv1_w"].astype(f32).reshape(6, 25),
                        (1, 0)).reshape(-1)                       # [t*6 + c]
    b1s = params["conv1_b"].astype(f32)
    dA, dB = [], []
    for ki in range(5):
        for kj in range(5):
            if kj % 2 == 0:               # even kj
                dA.append(ki * 14 + kj // 2)              # even-out reads E
                dB.append(_PADE + ki * 14 + kj // 2)      # odd-out reads O
            else:                         # odd kj
                dA.append(_PADE + ki * 14 + kj // 2)      # even-out reads O
                dB.append(ki * 14 + (kj + 1) // 2)        # odd-out reads E
    dA = jnp.array(dA, jnp.int32)
    dB = jnp.array(dB, jnp.int32)

    # Conv2 tables.
    w2s = jnp.transpose(params["conv2_w"].astype(f32).reshape(12, 6, 25),
                        (1, 2, 0)).reshape(-1)            # [cin*300 + t*12 + co]
    b2s = params["conv2_b"].astype(f32)
    off2 = jnp.array([ki * 12 + kj for ki in range(5) for kj in range(5)],
                     jnp.int32)

    # FC weights stay in native (out, in) layout: matmul is W @ activations.
    w1f = params["fc1_w"].astype(f32)                             # (120, 192)
    b1f = params["fc1_b"].astype(f32).reshape(120, 1)
    w2f = params["fc2_w"].astype(f32)                             # (60, 120)
    b2f = params["fc2_b"].astype(f32).reshape(60, 1)
    w3f = params["out_w"].astype(f32)                             # (10, 60)
    b3f = params["out_b"].astype(f32).reshape(10, 1)

    smem = pl.BlockSpec(memory_space=pltpu.MemorySpace.SMEM)

    def vfull(a):
        nd = a.ndim
        return pl.BlockSpec(a.shape, lambda i, nd=nd: (0,) * nd)

    out = pl.pallas_call(
        _lenet_kernel,
        out_shape=jax.ShapeDtypeStruct((nt, 10, _B_TILE), f32),
        grid_spec=pltpu.PrefetchScalarGridSpec(
            num_scalar_prefetch=0,
            grid=(nt,),
            in_specs=[
                pl.BlockSpec((2 * _PADE, _B_TILE), lambda i: (0, i)),  # images
                smem, smem, smem, smem,            # conv1 w / b / dA / dB
                smem, smem, smem,                  # conv2 w / b / off2
                vfull(w1f), vfull(b1f), vfull(w2f),
                vfull(b2f), vfull(w3f), vfull(b3f),
            ],
            out_specs=pl.BlockSpec((1, 10, _B_TILE), lambda i: (i, 0, 0)),
            scratch_shapes=[
                pltpu.VMEM((12 * _C1_PLANE, _B_TILE), f32),   # conv1 planes
                pltpu.VMEM((_P1_ROWS, _B_TILE), f32),         # pool1 planes
                pltpu.VMEM((12 * _C2_PLANE, _B_TILE), f32),   # conv2 planes
                pltpu.VMEM((192, _B_TILE), f32),              # pool2 / flatten
            ],
        ),
        compiler_params=pltpu.CompilerParams(
            dimension_semantics=("parallel",),
            vmem_limit_bytes=32 * 1024 * 1024,
        ),
    )(xt, w1s, b1s, dA, dB, w2s, b2s, off2, w1f, b1f, w2f, b2f, w3f, b3f)

    # (nt, 10, B) -> (n, 10)
    return jnp.transpose(out, (0, 2, 1)).reshape(npad, 10)[:n]


# ---------------------------------------------------------------------------
# Plain-JAX reference (matches the PyTorch module semantics) for validation.
# ---------------------------------------------------------------------------
def reference_forward(x, p):
    dn = ("NCHW", "OIHW", "NCHW")
    c1 = lax.conv_general_dilated(x, p["conv1_w"], (1, 1), "VALID",
                                  dimension_numbers=dn)
    c1 = jnp.maximum(c1 + p["conv1_b"][None, :, None, None], 0.0)
    p1 = lax.reduce_window(c1, -jnp.inf, lax.max, (1, 1, 2, 2), (1, 1, 2, 2),
                           "VALID")
    c2 = lax.conv_general_dilated(p1, p["conv2_w"], (1, 1), "VALID",
                                  dimension_numbers=dn)
    c2 = jnp.maximum(c2 + p["conv2_b"][None, :, None, None], 0.0)
    p2 = lax.reduce_window(c2, -jnp.inf, lax.max, (1, 1, 2, 2), (1, 1, 2, 2),
                           "VALID")
    f = p2.reshape(-1, 12 * 4 * 4)
    h = jnp.maximum(f @ p["fc1_w"].T + p["fc1_b"], 0.0)
    h = jnp.maximum(h @ p["fc2_w"].T + p["fc2_b"], 0.0)
    return h @ p["out_w"].T + p["out_b"]


if __name__ == "__main__":
    key = jax.random.PRNGKey(0)
    ks = jax.random.split(key, 11)

    def u(k, shape, fan_in):
        b = 1.0 / float(np.sqrt(fan_in))
        return jax.random.uniform(k, shape, jnp.float32, -b, b)

    params = {
        "conv1_w": u(ks[0], (6, 1, 5, 5), 25),   "conv1_b": u(ks[1], (6,), 25),
        "conv2_w": u(ks[2], (12, 6, 5, 5), 150), "conv2_b": u(ks[3], (12,), 150),
        "fc1_w":   u(ks[4], (120, 192), 192),    "fc1_b":   u(ks[5], (120,), 192),
        "fc2_w":   u(ks[6], (60, 120), 120),     "fc2_b":   u(ks[7], (60,), 120),
        "out_w":   u(ks[8], (10, 60), 60),       "out_b":   u(ks[9], (10,), 60),
    }
    # MNIST/F-MNIST-shaped input: batch=2, 1 channel, 28x28 (fc1 = 12*4*4).
    x = jax.random.normal(ks[10], (2, 1, 28, 28), jnp.float32)

    y = jax.block_until_ready(lenet_pallas(x, params))
    y_ref = jax.block_until_ready(reference_forward(x, params))

    assert y.shape == (2, 10), y.shape
    err = float(jnp.max(jnp.abs(y - y_ref)))
    assert err < 5e-2, f"max abs err vs reference: {err}"
    print("KERNEL_OK")
</pallas_src>

<mosaic_0001>
module attributes {stable_mosaic.version = 11 : i64} {
  func.func @_lenet_kernel(%arg0: i32, %arg1: memref<800x128xf32, #tpu.memory_space<vmem>>, %arg2: memref<150xf32, #tpu.memory_space<smem>>, %arg3: memref<6xf32, #tpu.memory_space<smem>>, %arg4: memref<25xi32, #tpu.memory_space<smem>>, %arg5: memref<25xi32, #tpu.memory_space<smem>>, %arg6: memref<1800xf32, #tpu.memory_space<smem>>, %arg7: memref<12xf32, #tpu.memory_space<smem>>, %arg8: memref<25xi32, #tpu.memory_space<smem>>, %arg9: memref<120x192xf32, #tpu.memory_space<vmem>>, %arg10: memref<120x1xf32, #tpu.memory_space<vmem>>, %arg11: memref<60x120xf32, #tpu.memory_space<vmem>>, %arg12: memref<60x1xf32, #tpu.memory_space<vmem>>, %arg13: memref<10x60xf32, #tpu.memory_space<vmem>>, %arg14: memref<10x1xf32, #tpu.memory_space<vmem>>, %arg15: memref<1x10x128xf32, #tpu.memory_space<vmem>>, %arg16: memref<4032x128xf32, #tpu.memory_space<vmem>>, %arg17: memref<880x128xf32, #tpu.memory_space<vmem>>, %arg18: memref<1152x128xf32, #tpu.memory_space<vmem>>, %arg19: memref<192x128xf32, #tpu.memory_space<vmem>>) attributes {dimension_semantics = [#tpu.dimension_semantics<parallel>], iteration_bounds = array<i64: 1>, scalar_prefetch = 0 : i64, scratch_operands = 4 : i64, tpu.core_type = #tpu.core_type<tc>, window_params = [{transform_indices = @transform_0, window_bounds = array<i64: 800, 128>}, {transform_indices = @transform_1, window_bounds = array<i64: 150>}, {transform_indices = @transform_2, window_bounds = array<i64: 6>}, {transform_indices = @transform_3, window_bounds = array<i64: 25>}, {transform_indices = @transform_4, window_bounds = array<i64: 25>}, {transform_indices = @transform_5, window_bounds = array<i64: 1800>}, {transform_indices = @transform_6, window_bounds = array<i64: 12>}, {transform_indices = @transform_7, window_bounds = array<i64: 25>}, {pipeline_mode = #tpu.pipeline_mode<synchronous>, transform_indices = @transform_8, window_bounds = array<i64: 120, 192>}, {pipeline_mode = #tpu.pipeline_mode<synchronous>, transform_indices = @transform_9, window_bounds = array<i64: 120, 1>}, {pipeline_mode = #tpu.pipeline_mode<synchronous>, transform_indices = @transform_10, window_bounds = array<i64: 60, 120>}, {pipeline_mode = #tpu.pipeline_mode<synchronous>, transform_indices = @transform_11, window_bounds = array<i64: 60, 1>}, {pipeline_mode = #tpu.pipeline_mode<synchronous>, transform_indices = @transform_12, window_bounds = array<i64: 10, 60>}, {pipeline_mode = #tpu.pipeline_mode<synchronous>, transform_indices = @transform_13, window_bounds = array<i64: 10, 1>}, {transform_indices = @transform_14, window_bounds = array<i64: 1, 10, 128>}]} {
    %c0_i32 = arith.constant 0 : i32
    %c21_i32 = arith.constant 21 : i32
    %0 = arith.addi %c0_i32, %c21_i32 : i32
    %c1_i32 = arith.constant 1 : i32
    scf.for %arg20 = %c0_i32 to %0 step %c1_i32  : i32 {
      %c16_i32 = arith.constant 16 : i32
      %45 = arith.muli %arg20, %c16_i32 : i32
      %cst_96 = arith.constant 0.000000e+00 : f32
      %46 = vector.broadcast %cst_96 : f32 to vector<16x128xf32>
      %cst_97 = arith.constant 0.000000e+00 : f32
      %47 = vector.broadcast %cst_97 : f32 to vector<16x128xf32>
      %cst_98 = arith.constant 0.000000e+00 : f32
      %48 = vector.broadcast %cst_98 : f32 to vector<16x128xf32>
      %cst_99 = arith.constant 0.000000e+00 : f32
      %49 = vector.broadcast %cst_99 : f32 to vector<16x128xf32>
      %cst_100 = arith.constant 0.000000e+00 : f32
      %50 = vector.broadcast %cst_100 : f32 to vector<16x128xf32>
      %cst_101 = arith.constant 0.000000e+00 : f32
      %51 = vector.broadcast %cst_101 : f32 to vector<16x128xf32>
      %cst_102 = arith.constant 0.000000e+00 : f32
      %52 = vector.broadcast %cst_102 : f32 to vector<16x128xf32>
      %cst_103 = arith.constant 0.000000e+00 : f32
      %53 = vector.broadcast %cst_103 : f32 to vector<16x128xf32>
      %cst_104 = arith.constant 0.000000e+00 : f32
      %54 = vector.broadcast %cst_104 : f32 to vector<16x128xf32>
      %cst_105 = arith.constant 0.000000e+00 : f32
      %55 = vector.broadcast %cst_105 : f32 to vector<16x128xf32>
      %cst_106 = arith.constant 0.000000e+00 : f32
      %56 = vector.broadcast %cst_106 : f32 to vector<16x128xf32>
      %cst_107 = arith.constant 0.000000e+00 : f32
      %57 = vector.broadcast %cst_107 : f32 to vector<16x128xf32>
      %c0_i32_108 = arith.constant 0 : i32
      %c25_i32 = arith.constant 25 : i32
      %58 = arith.addi %c0_i32_108, %c25_i32 : i32
      %c1_i32_109 = arith.constant 1 : i32
      %59:12 = scf.for %arg21 = %c0_i32_108 to %58 step %c1_i32_109 iter_args(%arg22 = %46, %arg23 = %47, %arg24 = %48, %arg25 = %49, %arg26 = %50, %arg27 = %51, %arg28 = %52, %arg29 = %53, %arg30 = %54, %arg31 = %55, %arg32 = %56, %arg33 = %57) -> (vector<16x128xf32>, vector<16x128xf32>, vector<16x128xf32>, vector<16x128xf32>, vector<16x128xf32>, vector<16x128xf32>, vector<16x128xf32>, vector<16x128xf32>, vector<16x128xf32>, vector<16x128xf32>, vector<16x128xf32>, vector<16x128xf32>)  : i32 {
        %156 = arith.index_cast %arg21 : i32 to index
        %157 = memref.load %arg4[%156] : memref<25xi32, #tpu.memory_space<smem>>
        %158 = arith.addi %45, %157 : i32
        %159 = arith.index_cast %158 : i32 to index
        %c0_143 = arith.constant 0 : index
        %160 = vector.load %arg1[%159, %c0_143] : memref<800x128xf32, #tpu.memory_space<vmem>>, vector<16x128xf32>
        %161 = arith.index_cast %arg21 : i32 to index
        %162 = memref.load %arg5[%161] : memref<25xi32, #tpu.memory_space<smem>>
        %163 = arith.addi %45, %162 : i32
        %164 = arith.index_cast %163 : i32 to index
        %c0_144 = arith.constant 0 : index
        %165 = vector.load %arg1[%164, %c0_144] : memref<800x128xf32, #tpu.memory_space<vmem>>, vector<16x128xf32>
        %c6_i32_145 = arith.constant 6 : i32
        %166 = arith.muli %arg21, %c6_i32_145 : i32
        %c0_i32_146 = arith.constant 0 : i32
        %167 = arith.addi %166, %c0_i32_146 : i32
        %168 = arith.index_cast %167 : i32 to index
        %169 = memref.load %arg2[%168] : memref<150xf32, #tpu.memory_space<smem>>
        %170 = vector.broadcast %169 : f32 to vector<16x128xf32>
        %171 = arith.mulf %170, %160 : vector<16x128xf32>
        %172 = arith.addf %arg22, %171 : vector<16x128xf32>
        %c1_i32_147 = arith.constant 1 : i32
        %173 = arith.addi %166, %c1_i32_147 : i32
        %174 = arith.index_cast %173 : i32 to index
        %175 = memref.load %arg2[%174] : memref<150xf32, #tpu.memory_space<smem>>
        %176 = vector.broadcast %175 : f32 to vector<16x128xf32>
        %177 = arith.mulf %176, %160 : vector<16x128xf32>
        %178 = arith.addf %arg23, %177 : vector<16x128xf32>
        %c2_i32 = arith.constant 2 : i32
        %179 = arith.addi %166, %c2_i32 : i32
        %180 = arith.index_cast %179 : i32 to index
        %181 = memref.load %arg2[%180] : memref<150xf32, #tpu.memory_space<smem>>
        %182 = vector.broadcast %181 : f32 to vector<16x128xf32>
        %183 = arith.mulf %182, %160 : vector<16x128xf32>
        %184 = arith.addf %arg24, %183 : vector<16x128xf32>
        %c3_i32 = arith.constant 3 : i32
        %185 = arith.addi %166, %c3_i32 : i32
        %186 = arith.index_cast %185 : i32 to index
        %187 = memref.load %arg2[%186] : memref<150xf32, #tpu.memory_space<smem>>
        %188 = vector.broadcast %187 : f32 to vector<16x128xf32>
        %189 = arith.mulf %188, %160 : vector<16x128xf32>
        %190 = arith.addf %arg25, %189 : vector<16x128xf32>
        %c4_i32_148 = arith.constant 4 : i32
        %191 = arith.addi %166, %c4_i32_148 : i32
        %192 = arith.index_cast %191 : i32 to index
        %193 = memref.load %arg2[%192] : memref<150xf32, #tpu.memory_space<smem>>
        %194 = vector.broadcast %193 : f32 to vector<16x128xf32>
        %195 = arith.mulf %194, %160 : vector<16x128xf32>
        %196 = arith.addf %arg26, %195 : vector<16x128xf32>
        %c5_i32 = arith.constant 5 : i32
        %197 = arith.addi %166, %c5_i32 : i32
        %198 = arith.index_cast %197 : i32 to index
        %199 = memref.load %arg2[%198] : memref<150xf32, #tpu.memory_space<smem>>
        %200 = vector.broadcast %199 : f32 to vector<16x128xf32>
        %201 = arith.mulf %200, %160 : vector<16x128xf32>
        %202 = arith.addf %arg27, %201 : vector<16x128xf32>
        %c0_i32_149 = arith.constant 0 : i32
        %203 = arith.addi %166, %c0_i32_149 : i32
        %204 = arith.index_cast %203 : i32 to index
        %205 = memref.load %arg2[%204] : memref<150xf32, #tpu.memory_space<smem>>
        %206 = vector.broadcast %205 : f32 to vector<16x128xf32>
        %207 = arith.mulf %206, %165 : vector<16x128xf32>
        %208 = arith.addf %arg28, %207 : vector<16x128xf32>
        %c1_i32_150 = arith.constant 1 : i32
        %209 = arith.addi %166, %c1_i32_150 : i32
        %210 = arith.index_cast %209 : i32 to index
        %211 = memref.load %arg2[%210] : memref<150xf32, #tpu.memory_space<smem>>
        %212 = vector.broadcast %211 : f32 to vector<16x128xf32>
        %213 = arith.mulf %212, %165 : vector<16x128xf32>
        %214 = arith.addf %arg29, %213 : vector<16x128xf32>
        %c2_i32_151 = arith.constant 2 : i32
        %215 = arith.addi %166, %c2_i32_151 : i32
        %216 = arith.index_cast %215 : i32 to index
        %217 = memref.load %arg2[%216] : memref<150xf32, #tpu.memory_space<smem>>
        %218 = vector.broadcast %217 : f32 to vector<16x128xf32>
        %219 = arith.mulf %218, %165 : vector<16x128xf32>
        %220 = arith.addf %arg30, %219 : vector<16x128xf32>
        %c3_i32_152 = arith.constant 3 : i32
        %221 = arith.addi %166, %c3_i32_152 : i32
        %222 = arith.index_cast %221 : i32 to index
        %223 = memref.load %arg2[%222] : memref<150xf32, #tpu.memory_space<smem>>
        %224 = vector.broadcast %223 : f32 to vector<16x128xf32>
        %225 = arith.mulf %224, %165 : vector<16x128xf32>
        %226 = arith.addf %arg31, %225 : vector<16x128xf32>
        %c4_i32_153 = arith.constant 4 : i32
        %227 = arith.addi %166, %c4_i32_153 : i32
        %228 = arith.index_cast %227 : i32 to index
        %229 = memref.load %arg2[%228] : memref<150xf32, #tpu.memory_space<smem>>
        %230 = vector.broadcast %229 : f32 to vector<16x128xf32>
        %231 = arith.mulf %230, %165 : vector<16x128xf32>
        %232 = arith.addf %arg32, %231 : vector<16x128xf32>
        %c5_i32_154 = arith.constant 5 : i32
        %233 = arith.addi %166, %c5_i32_154 : i32
        %234 = arith.index_cast %233 : i32 to index
        %235 = memref.load %arg2[%234] : memref<150xf32, #tpu.memory_space<smem>>
        %236 = vector.broadcast %235 : f32 to vector<16x128xf32>
        %237 = arith.mulf %236, %165 : vector<16x128xf32>
        %238 = arith.addf %arg33, %237 : vector<16x128xf32>
        scf.yield %172, %178, %184, %190, %196, %202, %208, %214, %220, %226, %232, %238 : vector<16x128xf32>, vector<16x128xf32>, vector<16x128xf32>, vector<16x128xf32>, vector<16x128xf32>, vector<16x128xf32>, vector<16x128xf32>, vector<16x128xf32>, vector<16x128xf32>, vector<16x128xf32>, vector<16x128xf32>, vector<16x128xf32>
      }
      %c25_i32_110 = arith.constant 25 : i32
      %c0_111 = arith.constant 0 : index
      %60 = memref.load %arg3[%c0_111] : memref<6xf32, #tpu.memory_space<smem>>
      %61 = vector.broadcast %60 : f32 to vector<16x128xf32>
      %62 = arith.addf %59#0, %61 : vector<16x128xf32>
      %cst_112 = arith.constant 0.000000e+00 : f32
      %63 = vector.broadcast %cst_112 : f32 to vector<16x128xf32>
      %64 = arith.maximumf %62, %63 : vector<16x128xf32>
      %c0_i32_113 = arith.constant 0 : i32
      %65 = arith.addi %c0_i32_113, %45 : i32
      %66 = arith.index_cast %65 : i32 to index
      %c0_114 = arith.constant 0 : index
      %67 = vector.load %arg16[%66, %c0_114] : memref<4032x128xf32, #tpu.memory_space<vmem>>, vector<16x128xf32>
      tpu.vector_store %arg16[%66, %c0_114], %64 {strides = array<i32>} : memref<4032x128xf32, #tpu.memory_space<vmem>>, vector<16x128xf32>,
      %c0_115 = arith.constant 0 : index
      %68 = memref.load %arg3[%c0_115] : memref<6xf32, #tpu.memory_space<smem>>
      %69 = vector.broadcast %68 : f32 to vector<16x128xf32>
      %70 = arith.addf %59#6, %69 : vector<16x128xf32>
      %cst_116 = arith.constant 0.000000e+00 : f32
      %71 = vector.broadcast %cst_116 : f32 to vector<16x128xf32>
      %72 = arith.maximumf %70, %71 : vector<16x128xf32>
      %c336_i32 = arith.constant 336 : i32
      %73 = arith.addi %c336_i32, %45 : i32
      %74 = arith.index_cast %73 : i32 to index
      %c0_117 = arith.constant 0 : index
      %75 = vector.load %arg16[%74, %c0_117] : memref<4032x128xf32, #tpu.memory_space<vmem>>, vector<16x128xf32>
      tpu.vector_store %arg16[%74, %c0_117], %72 {strides = array<i32>} : memref<4032x128xf32, #tpu.memory_space<vmem>>, vector<16x128xf32>,
      %c1 = arith.constant 1 : index
      %76 = memref.load %arg3[%c1] : memref<6xf32, #tpu.memory_space<smem>>
      %77 = vector.broadcast %76 : f32 to vector<16x128xf32>
      %78 = arith.addf %59#1, %77 : vector<16x128xf32>
      %cst_118 = arith.constant 0.000000e+00 : f32
      %79 = vector.broadcast %cst_118 : f32 to vector<16x128xf32>
      %80 = arith.maximumf %78, %79 : vector<16x128xf32>
      %c672_i32 = arith.constant 672 : i32
      %81 = arith.addi %c672_i32, %45 : i32
      %82 = arith.index_cast %81 : i32 to index
      %c0_119 = arith.constant 0 : index
      %83 = vector.load %arg16[%82, %c0_119] : memref<4032x128xf32, #tpu.memory_space<vmem>>, vector<16x128xf32>
      tpu.vector_store %arg16[%82, %c0_119], %80 {strides = array<i32>} : memref<4032x128xf32, #tpu.memory_space<vmem>>, vector<16x128xf32>,
      %c1_120 = arith.constant 1 : index
      %84 = memref.load %arg3[%c1_120] : memref<6xf32, #tpu.memory_space<smem>>
      %85 = vector.broadcast %84 : f32 to vector<16x128xf32>
      %86 = arith.addf %59#7, %85 : vector<16x128xf32>
      %cst_121 = arith.constant 0.000000e+00 : f32
      %87 = vector.broadcast %cst_121 : f32 to vector<16x128xf32>
      %88 = arith.maximumf %86, %87 : vector<16x128xf32>
      %c1008_i32 = arith.constant 1008 : i32
      %89 = arith.addi %c1008_i32, %45 : i32
      %90 = arith.index_cast %89 : i32 to index
      %c0_122 = arith.constant 0 : index
      %91 = vector.load %arg16[%90, %c0_122] : memref<4032x128xf32, #tpu.memory_space<vmem>>, vector<16x128xf32>
      tpu.vector_store %arg16[%90, %c0_122], %88 {strides = array<i32>} : memref<4032x128xf32, #tpu.memory_space<vmem>>, vector<16x128xf32>,
      %c2 = arith.constant 2 : index
      %92 = memref.load %arg3[%c2] : memref<6xf32, #tpu.memory_space<smem>>
      %93 = vector.broadcast %92 : f32 to vector<16x128xf32>
      %94 = arith.addf %59#2, %93 : vector<16x128xf32>
      %cst_123 = arith.constant 0.000000e+00 : f32
      %95 = vector.broadcast %cst_123 : f32 to vector<16x128xf32>
      %96 = arith.maximumf %94, %95 : vector<16x128xf32>
      %c1344_i32 = arith.constant 1344 : i32
      %97 = arith.addi %c1344_i32, %45 : i32
      %98 = arith.index_cast %97 : i32 to index
      %c0_124 = arith.constant 0 : index
      %99 = vector.load %arg16[%98, %c0_124] : memref<4032x128xf32, #tpu.memory_space<vmem>>, vector<16x128xf32>
      tpu.vector_store %arg16[%98, %c0_124], %96 {strides = array<i32>} : memref<4032x128xf32, #tpu.memory_space<vmem>>, vector<16x128xf32>,
      %c2_125 = arith.constant 2 : index
      %100 = memref.load %arg3[%c2_125] : memref<6xf32, #tpu.memory_space<smem>>
      %101 = vector.broadcast %100 : f32 to vector<16x128xf32>
      %102 = arith.addf %59#8, %101 : vector<16x128xf32>
      %cst_126 = arith.constant 0.000000e+00 : f32
      %103 = vector.broadcast %cst_126 : f32 to vector<16x128xf32>
      %104 = arith.maximumf %102, %103 : vector<16x128xf32>
      %c1680_i32 = arith.constant 1680 : i32
      %105 = arith.addi %c1680_i32, %45 : i32
      %106 = arith.index_cast %105 : i32 to index
      %c0_127 = arith.constant 0 : index
      %107 = vector.load %arg16[%106, %c0_127] : memref<4032x128xf32, #tpu.memory_space<vmem>>, vector<16x128xf32>
      tpu.vector_store %arg16[%106, %c0_127], %104 {strides = array<i32>} : memref<4032x128xf32, #tpu.memory_space<vmem>>, vector<16x128xf32>,
      %c3 = arith.constant 3 : index
      %108 = memref.load %arg3[%c3] : memref<6xf32, #tpu.memory_space<smem>>
      %109 = vector.broadcast %108 : f32 to vector<16x128xf32>
      %110 = arith.addf %59#3, %109 : vector<16x128xf32>
      %cst_128 = arith.constant 0.000000e+00 : f32
      %111 = vector.broadcast %cst_128 : f32 to vector<16x128xf32>
      %112 = arith.maximumf %110, %111 : vector<16x128xf32>
      %c2016_i32 = arith.constant 2016 : i32
      %113 = arith.addi %c2016_i32, %45 : i32
      %114 = arith.index_cast %113 : i32 to index
      %c0_129 = arith.constant 0 : index
      %115 = vector.load %arg16[%114, %c0_129] : memref<4032x128xf32, #tpu.memory_space<vmem>>, vector<16x128xf32>
      tpu.vector_store %arg16[%114, %c0_129], %112 {strides = array<i32>} : memref<4032x128xf32, #tpu.memory_space<vmem>>, vector<16x128xf32>,
      %c3_130 = arith.constant 3 : index
      %116 = memref.load %arg3[%c3_130] : memref<6xf32, #tpu.memory_space<smem>>
      %117 = vector.broadcast %116 : f32 to vector<16x128xf32>
      %118 = arith.addf %59#9, %117 : vector<16x128xf32>
      %cst_131 = arith.constant 0.000000e+00 : f32
      %119 = vector.broadcast %cst_131 : f32 to vector<16x128xf32>
      %120 = arith.maximumf %118, %119 : vector<16x128xf32>
      %c2352_i32 = arith.constant 2352 : i32
      %121 = arith.addi %c2352_i32, %45 : i32
      %122 = arith.index_cast %121 : i32 to index
      %c0_132 = arith.constant 0 : index
      %123 = vector.load %arg16[%122, %c0_132] : memref<4032x128xf32, #tpu.memory_space<vmem>>, vector<16x128xf32>
      tpu.vector_store %arg16[%122, %c0_132], %120 {strides = array<i32>} : memref<4032x128xf32, #tpu.memory_space<vmem>>, vector<16x128xf32>,
      %c4 = arith.constant 4 : index
      %124 = memref.load %arg3[%c4] : memref<6xf32, #tpu.memory_space<smem>>
      %125 = vector.broadcast %124 : f32 to vector<16x128xf32>
      %126 = arith.addf %59#4, %125 : vector<16x128xf32>
      %cst_133 = arith.constant 0.000000e+00 : f32
      %127 = vector.broadcast %cst_133 : f32 to vector<16x128xf32>
      %128 = arith.maximumf %126, %127 : vector<16x128xf32>
      %c2688_i32 = arith.constant 2688 : i32
      %129 = arith.addi %c2688_i32, %45 : i32
      %130 = arith.index_cast %129 : i32 to index
      %c0_134 = arith.constant 0 : index
      %131 = vector.load %arg16[%130, %c0_134] : memref<4032x128xf32, #tpu.memory_space<vmem>>, vector<16x128xf32>
      tpu.vector_store %arg16[%130, %c0_134], %128 {strides = array<i32>} : memref<4032x128xf32, #tpu.memory_space<vmem>>, vector<16x128xf32>,
      %c4_135 = arith.constant 4 : index
      %132 = memref.load %arg3[%c4_135] : memref<6xf32, #tpu.memory_space<smem>>
      %133 = vector.broadcast %132 : f32 to vector<16x128xf32>
      %134 = arith.addf %59#10, %133 : vector<16x128xf32>
      %cst_136 = arith.constant 0.000000e+00 : f32
      %135 = vector.broadcast %cst_136 : f32 to vector<16x128xf32>
      %136 = arith.maximumf %134, %135 : vector<16x128xf32>
      %c3024_i32 = arith.constant 3024 : i32
      %137 = arith.addi %c3024_i32, %45 : i32
      %138 = arith.index_cast %137 : i32 to index
      %c0_137 = arith.constant 0 : index
      %139 = vector.load %arg16[%138, %c0_137] : memref<4032x128xf32, #tpu.memory_space<vmem>>, vector<16x128xf32>
      tpu.vector_store %arg16[%138, %c0_137], %136 {strides = array<i32>} : memref<4032x128xf32, #tpu.memory_space<vmem>>, vector<16x128xf32>,
      %c5 = arith.constant 5 : index
      %140 = memref.load %arg3[%c5] : memref<6xf32, #tpu.memory_space<smem>>
      %141 = vector.broadcast %140 : f32 to vector<16x128xf32>
      %142 = arith.addf %59#5, %141 : vector<16x128xf32>
      %cst_138 = arith.constant 0.000000e+00 : f32
      %143 = vector.broadcast %cst_138 : f32 to vector<16x128xf32>
      %144 = arith.maximumf %142, %143 : vector<16x128xf32>
      %c3360_i32 = arith.constant 3360 : i32
      %145 = arith.addi %c3360_i32, %45 : i32
      %146 = arith.index_cast %145 : i32 to index
      %c0_139 = arith.constant 0 : index
      %147 = vector.load %arg16[%146, %c0_139] : memref<4032x128xf32, #tpu.memory_space<vmem>>, vector<16x128xf32>
      tpu.vector_store %arg16[%146, %c0_139], %144 {strides = array<i32>} : memref<4032x128xf32, #tpu.memory_space<vmem>>, vector<16x128xf32>,
      %c5_140 = arith.constant 5 : index
      %148 = memref.load %arg3[%c5_140] : memref<6xf32, #tpu.memory_space<smem>>
      %149 = vector.broadcast %148 : f32 to vector<16x128xf32>
      %150 = arith.addf %59#11, %149 : vector<16x128xf32>
      %cst_141 = arith.constant 0.000000e+00 : f32
      %151 = vector.broadcast %cst_141 : f32 to vector<16x128xf32>
      %152 = arith.maximumf %150, %151 : vector<16x128xf32>
      %c3696_i32 = arith.constant 3696 : i32
      %153 = arith.addi %c3696_i32, %45 : i32
      %154 = arith.index_cast %153 : i32 to index
      %c0_142 = arith.constant 0 : index
      %155 = vector.load %arg16[%154, %c0_142] : memref<4032x128xf32, #tpu.memory_space<vmem>>, vector<16x128xf32>
      tpu.vector_store %arg16[%154, %c0_142], %152 {strides = array<i32>} : memref<4032x128xf32, #tpu.memory_space<vmem>>, vector<16x128xf32>,
    }
    %c21_i32_0 = arith.constant 21 : i32
    %cst = arith.constant 0.000000e+00 : f32
    %1 = vector.broadcast %cst : f32 to vector<16x128xf32>
    %c864 = arith.constant 864 : index
    %c0 = arith.constant 0 : index
    %2 = vector.load %arg17[%c864, %c0] : memref<880x128xf32, #tpu.memory_space<vmem>>, vector<16x128xf32>
    tpu.vector_store %arg17[%c864, %c0], %1 {strides = array<i32>} : memref<880x128xf32, #tpu.memory_space<vmem>>, vector<16x128xf32>,
    %c0_i32_1 = arith.constant 0 : i32
    %c12_i32 = arith.constant 12 : i32
    %3 = arith.addi %c0_i32_1, %c12_i32 : i32
    %c1_i32_2 = arith.constant 1 : i32
    scf.for %arg20 = %c0_i32_1 to %3 step %c1_i32_2  : i32 {
      %c2_i32 = arith.constant 2 : i32
      %45 = arith.muli %c2_i32, %arg20 : i32
      %c14_i32 = arith.constant 14 : i32
      %46 = arith.muli %45, %c14_i32 : i32
      %c14_i32_96 = arith.constant 14 : i32
      %47 = arith.addi %46, %c14_i32_96 : i32
      %c0_i32_97 = arith.constant 0 : i32
      %48 = arith.addi %c0_i32_97, %46 : i32
      %49 = arith.index_cast %48 : i32 to index
      %c0_98 = arith.constant 0 : index
      %50 = vector.load %arg16[%49, %c0_98] : memref<4032x128xf32, #tpu.memory_space<vmem>>, vector<12x128xf32>
      %c336_i32 = arith.constant 336 : i32
      %51 = arith.addi %c336_i32, %46 : i32
      %52 = arith.index_cast %51 : i32 to index
      %c0_99 = arith.constant 0 : index
      %53 = vector.load %arg16[%52, %c0_99] : memref<4032x128xf32, #tpu.memory_space<vmem>>, vector<12x128xf32>
      %54 = arith.maximumf %50, %53 : vector<12x128xf32>
      %c0_i32_100 = arith.constant 0 : i32
      %55 = arith.addi %c0_i32_100, %47 : i32
      %56 = arith.index_cast %55 : i32 to index
      %c0_101 = arith.constant 0 : index
      %57 = vector.load %arg16[%56, %c0_101] : memref<4032x128xf32, #tpu.memory_space<vmem>>, vector<12x128xf32>
      %c336_i32_102 = arith.constant 336 : i32
      %58 = arith.addi %c336_i32_102, %47 : i32
      %59 = arith.index_cast %58 : i32 to index
      %c0_103 = arith.constant 0 : index
      %60 = vector.load %arg16[%59, %c0_103] : memref<4032x128xf32, #tpu.memory_space<vmem>>, vector<12x128xf32>
      %61 = arith.maximumf %57, %60 : vector<12x128xf32>
      %62 = arith.maximumf %54, %61 : vector<12x128xf32>
      %c12_i32_104 = arith.constant 12 : i32
      %63 = arith.muli %arg20, %c12_i32_104 : i32
      %c0_i32_105 = arith.constant 0 : i32
      %64 = arith.addi %c0_i32_105, %63 : i32
      %65 = arith.index_cast %64 : i32 to index
      %c0_106 = arith.constant 0 : index
      %66 = vector.load %arg17[%65, %c0_106] : memref<880x128xf32, #tpu.memory_space<vmem>>, vector<12x128xf32>
      tpu.vector_store %arg17[%65, %c0_106], %62 {strides = array<i32>} : memref<880x128xf32, #tpu.memory_space<vmem>>, vector<12x128xf32>,
    }
    %c12_i32_3 = arith.constant 12 : i32
    %c0_i32_4 = arith.constant 0 : i32
    %c12_i32_5 = arith.constant 12 : i32
    %4 = arith.addi %c0_i32_4, %c12_i32_5 : i32
    %c1_i32_6 = arith.constant 1 : i32
    scf.for %arg20 = %c0_i32_4 to %4 step %c1_i32_6  : i32 {
      %c2_i32 = arith.constant 2 : i32
      %45 = arith.muli %c2_i32, %arg20 : i32
      %c14_i32 = arith.constant 14 : i32
      %46 = arith.muli %45, %c14_i32 : i32
      %c14_i32_96 = arith.constant 14 : i32
      %47 = arith.addi %46, %c14_i32_96 : i32
      %c672_i32 = arith.constant 672 : i32
      %48 = arith.addi %c672_i32, %46 : i32
      %49 = arith.index_cast %48 : i32 to index
      %c0_97 = arith.constant 0 : index
      %50 = vector.load %arg16[%49, %c0_97] : memref<4032x128xf32, #tpu.memory_space<vmem>>, vector<12x128xf32>
      %c1008_i32 = arith.constant 1008 : i32
      %51 = arith.addi %c1008_i32, %46 : i32
      %52 = arith.index_cast %51 : i32 to index
      %c0_98 = arith.constant 0 : index
      %53 = vector.load %arg16[%52, %c0_98] : memref<4032x128xf32, #tpu.memory_space<vmem>>, vector<12x128xf32>
      %54 = arith.maximumf %50, %53 : vector<12x128xf32>
      %c672_i32_99 = arith.constant 672 : i32
      %55 = arith.addi %c672_i32_99, %47 : i32
      %56 = arith.index_cast %55 : i32 to index
      %c0_100 = arith.constant 0 : index
      %57 = vector.load %arg16[%56, %c0_100] : memref<4032x128xf32, #tpu.memory_space<vmem>>, vector<12x128xf32>
      %c1008_i32_101 = arith.constant 1008 : i32
      %58 = arith.addi %c1008_i32_101, %47 : i32
      %59 = arith.index_cast %58 : i32 to index
      %c0_102 = arith.constant 0 : index
      %60 = vector.load %arg16[%59, %c0_102] : memref<4032x128xf32, #tpu.memory_space<vmem>>, vector<12x128xf32>
      %61 = arith.maximumf %57, %60 : vector<12x128xf32>
      %62 = arith.maximumf %54, %61 : vector<12x128xf32>
      %c12_i32_103 = arith.constant 12 : i32
      %63 = arith.muli %arg20, %c12_i32_103 : i32
      %c144_i32 = arith.constant 144 : i32
      %64 = arith.addi %c144_i32, %63 : i32
      %65 = arith.index_cast %64 : i32 to index
      %c0_104 = arith.constant 0 : index
      %66 = vector.load %arg17[%65, %c0_104] : memref<880x128xf32, #tpu.memory_space<vmem>>, vector<12x128xf32>
      tpu.vector_store %arg17[%65, %c0_104], %62 {strides = array<i32>} : memref<880x128xf32, #tpu.memory_space<vmem>>, vector<12x128xf32>,
    }
    %c12_i32_7 = arith.constant 12 : i32
    %c0_i32_8 = arith.constant 0 : i32
    %c12_i32_9 = arith.constant 12 : i32
    %5 = arith.addi %c0_i32_8, %c12_i32_9 : i32
    %c1_i32_10 = arith.constant 1 : i32
    scf.for %arg20 = %c0_i32_8 to %5 step %c1_i32_10  : i32 {
      %c2_i32 = arith.constant 2 : i32
      %45 = arith.muli %c2_i32, %arg20 : i32
      %c14_i32 = arith.constant 14 : i32
      %46 = arith.muli %45, %c14_i32 : i32
      %c14_i32_96 = arith.constant 14 : i32
      %47 = arith.addi %46, %c14_i32_96 : i32
      %c1344_i32 = arith.constant 1344 : i32
      %48 = arith.addi %c1344_i32, %46 : i32
      %49 = arith.index_cast %48 : i32 to index
      %c0_97 = arith.constant 0 : index
      %50 = vector.load %arg16[%49, %c0_97] : memref<4032x128xf32, #tpu.memory_space<vmem>>, vector<12x128xf32>
      %c1680_i32 = arith.constant 1680 : i32
      %51 = arith.addi %c1680_i32, %46 : i32
      %52 = arith.index_cast %51 : i32 to index
      %c0_98 = arith.constant 0 : index
      %53 = vector.load %arg16[%52, %c0_98] : memref<4032x128xf32, #tpu.memory_space<vmem>>, vector<12x128xf32>
      %54 = arith.maximumf %50, %53 : vector<12x128xf32>
      %c1344_i32_99 = arith.constant 1344 : i32
      %55 = arith.addi %c1344_i32_99, %47 : i32
      %56 = arith.index_cast %55 : i32 to index
      %c0_100 = arith.constant 0 : index
      %57 = vector.load %arg16[%56, %c0_100] : memref<4032x128xf32, #tpu.memory_space<vmem>>, vector<12x128xf32>
      %c1680_i32_101 = arith.constant 1680 : i32
      %58 = arith.addi %c1680_i32_101, %47 : i32
      %59 = arith.index_cast %58 : i32 to index
      %c0_102 = arith.constant 0 : index
      %60 = vector.load %arg16[%59, %c0_102] : memref<4032x128xf32, #tpu.memory_space<vmem>>, vector<12x128xf32>
      %61 = arith.maximumf %57, %60 : vector<12x128xf32>
      %62 = arith.maximumf %54, %61 : vector<12x128xf32>
      %c12_i32_103 = arith.constant 12 : i32
      %63 = arith.muli %arg20, %c12_i32_103 : i32
      %c288_i32 = arith.constant 288 : i32
      %64 = arith.addi %c288_i32, %63 : i32
      %65 = arith.index_cast %64 : i32 to index
      %c0_104 = arith.constant 0 : index
      %66 = vector.load %arg17[%65, %c0_104] : memref<880x128xf32, #tpu.memory_space<vmem>>, vector<12x128xf32>
      tpu.vector_store %arg17[%65, %c0_104], %62 {strides = array<i32>} : memref<880x128xf32, #tpu.memory_space<vmem>>, vector<12x128xf32>,
    }
    %c12_i32_11 = arith.constant 12 : i32
    %c0_i32_12 = arith.constant 0 : i32
    %c12_i32_13 = arith.constant 12 : i32
    %6 = arith.addi %c0_i32_12, %c12_i32_13 : i32
    %c1_i32_14 = arith.constant 1 : i32
    scf.for %arg20 = %c0_i32_12 to %6 step %c1_i32_14  : i32 {
      %c2_i32 = arith.constant 2 : i32
      %45 = arith.muli %c2_i32, %arg20 : i32
      %c14_i32 = arith.constant 14 : i32
      %46 = arith.muli %45, %c14_i32 : i32
      %c14_i32_96 = arith.constant 14 : i32
      %47 = arith.addi %46, %c14_i32_96 : i32
      %c2016_i32 = arith.constant 2016 : i32
      %48 = arith.addi %c2016_i32, %46 : i32
      %49 = arith.index_cast %48 : i32 to index
      %c0_97 = arith.constant 0 : index
      %50 = vector.load %arg16[%49, %c0_97] : memref<4032x128xf32, #tpu.memory_space<vmem>>, vector<12x128xf32>
      %c2352_i32 = arith.constant 2352 : i32
      %51 = arith.addi %c2352_i32, %46 : i32
      %52 = arith.index_cast %51 : i32 to index
      %c0_98 = arith.constant 0 : index
      %53 = vector.load %arg16[%52, %c0_98] : memref<4032x128xf32, #tpu.memory_space<vmem>>, vector<12x128xf32>
      %54 = arith.maximumf %50, %53 : vector<12x128xf32>
      %c2016_i32_99 = arith.constant 2016 : i32
      %55 = arith.addi %c2016_i32_99, %47 : i32
      %56 = arith.index_cast %55 : i32 to index
      %c0_100 = arith.constant 0 : index
      %57 = vector.load %arg16[%56, %c0_100] : memref<4032x128xf32, #tpu.memory_space<vmem>>, vector<12x128xf32>
      %c2352_i32_101 = arith.constant 2352 : i32
      %58 = arith.addi %c2352_i32_101, %47 : i32
      %59 = arith.index_cast %58 : i32 to index
      %c0_102 = arith.constant 0 : index
      %60 = vector.load %arg16[%59, %c0_102] : memref<4032x128xf32, #tpu.memory_space<vmem>>, vector<12x128xf32>
      %61 = arith.maximumf %57, %60 : vector<12x128xf32>
      %62 = arith.maximumf %54, %61 : vector<12x128xf32>
      %c12_i32_103 = arith.constant 12 : i32
      %63 = arith.muli %arg20, %c12_i32_103 : i32
      %c432_i32 = arith.constant 432 : i32
      %64 = arith.addi %c432_i32, %63 : i32
      %65 = arith.index_cast %64 : i32 to index
      %c0_104 = arith.constant 0 : index
      %66 = vector.load %arg17[%65, %c0_104] : memref<880x128xf32, #tpu.memory_space<vmem>>, vector<12x128xf32>
      tpu.vector_store %arg17[%65, %c0_104], %62 {strides = array<i32>} : memref<880x128xf32, #tpu.memory_space<vmem>>, vector<12x128xf32>,
    }
    %c12_i32_15 = arith.constant 12 : i32
    %c0_i32_16 = arith.constant 0 : i32
    %c12_i32_17 = arith.constant 12 : i32
    %7 = arith.addi %c0_i32_16, %c12_i32_17 : i32
    %c1_i32_18 = arith.constant 1 : i32
    scf.for %arg20 = %c0_i32_16 to %7 step %c1_i32_18  : i32 {
      %c2_i32 = arith.constant 2 : i32
      %45 = arith.muli %c2_i32, %arg20 : i32
      %c14_i32 = arith.constant 14 : i32
      %46 = arith.muli %45, %c14_i32 : i32
      %c14_i32_96 = arith.constant 14 : i32
      %47 = arith.addi %46, %c14_i32_96 : i32
      %c2688_i32 = arith.constant 2688 : i32
      %48 = arith.addi %c2688_i32, %46 : i32
      %49 = arith.index_cast %48 : i32 to index
      %c0_97 = arith.constant 0 : index
      %50 = vector.load %arg16[%49, %c0_97] : memref<4032x128xf32, #tpu.memory_space<vmem>>, vector<12x128xf32>
      %c3024_i32 = arith.constant 3024 : i32
      %51 = arith.addi %c3024_i32, %46 : i32
      %52 = arith.index_cast %51 : i32 to index
      %c0_98 = arith.constant 0 : index
      %53 = vector.load %arg16[%52, %c0_98] : memref<4032x128xf32, #tpu.memory_space<vmem>>, vector<12x128xf32>
      %54 = arith.maximumf %50, %53 : vector<12x128xf32>
      %c2688_i32_99 = arith.constant 2688 : i32
      %55 = arith.addi %c2688_i32_99, %47 : i32
      %56 = arith.index_cast %55 : i32 to index
      %c0_100 = arith.constant 0 : index
      %57 = vector.load %arg16[%56, %c0_100] : memref<4032x128xf32, #tpu.memory_space<vmem>>, vector<12x128xf32>
      %c3024_i32_101 = arith.constant 3024 : i32
      %58 = arith.addi %c3024_i32_101, %47 : i32
      %59 = arith.index_cast %58 : i32 to index
      %c0_102 = arith.constant 0 : index
      %60 = vector.load %arg16[%59, %c0_102] : memref<4032x128xf32, #tpu.memory_space<vmem>>, vector<12x128xf32>
      %61 = arith.maximumf %57, %60 : vector<12x128xf32>
      %62 = arith.maximumf %54, %61 : vector<12x128xf32>
      %c12_i32_103 = arith.constant 12 : i32
      %63 = arith.muli %arg20, %c12_i32_103 : i32
      %c576_i32 = arith.constant 576 : i32
      %64 = arith.addi %c576_i32, %63 : i32
      %65 = arith.index_cast %64 : i32 to index
      %c0_104 = arith.constant 0 : index
      %66 = vector.load %arg17[%65, %c0_104] : memref<880x128xf32, #tpu.memory_space<vmem>>, vector<12x128xf32>
      tpu.vector_store %arg17[%65, %c0_104], %62 {strides = array<i32>} : memref<880x128xf32, #tpu.memory_space<vmem>>, vector<12x128xf32>,
    }
    %c12_i32_19 = arith.constant 12 : i32
    %c0_i32_20 = arith.constant 0 : i32
    %c12_i32_21 = arith.constant 12 : i32
    %8 = arith.addi %c0_i32_20, %c12_i32_21 : i32
    %c1_i32_22 = arith.constant 1 : i32
    scf.for %arg20 = %c0_i32_20 to %8 step %c1_i32_22  : i32 {
      %c2_i32 = arith.constant 2 : i32
      %45 = arith.muli %c2_i32, %arg20 : i32
      %c14_i32 = arith.constant 14 : i32
      %46 = arith.muli %45, %c14_i32 : i32
      %c14_i32_96 = arith.constant 14 : i32
      %47 = arith.addi %46, %c14_i32_96 : i32
      %c3360_i32 = arith.constant 3360 : i32
      %48 = arith.addi %c3360_i32, %46 : i32
      %49 = arith.index_cast %48 : i32 to index
      %c0_97 = arith.constant 0 : index
      %50 = vector.load %arg16[%49, %c0_97] : memref<4032x128xf32, #tpu.memory_space<vmem>>, vector<12x128xf32>
      %c3696_i32 = arith.constant 3696 : i32
      %51 = arith.addi %c3696_i32, %46 : i32
      %52 = arith.index_cast %51 : i32 to index
      %c0_98 = arith.constant 0 : index
      %53 = vector.load %arg16[%52, %c0_98] : memref<4032x128xf32, #tpu.memory_space<vmem>>, vector<12x128xf32>
      %54 = arith.maximumf %50, %53 : vector<12x128xf32>
      %c3360_i32_99 = arith.constant 3360 : i32
      %55 = arith.addi %c3360_i32_99, %47 : i32
      %56 = arith.index_cast %55 : i32 to index
      %c0_100 = arith.constant 0 : index
      %57 = vector.load %arg16[%56, %c0_100] : memref<4032x128xf32, #tpu.memory_space<vmem>>, vector<12x128xf32>
      %c3696_i32_101 = arith.constant 3696 : i32
      %58 = arith.addi %c3696_i32_101, %47 : i32
      %59 = arith.index_cast %58 : i32 to index
      %c0_102 = arith.constant 0 : index
      %60 = vector.load %arg16[%59, %c0_102] : memref<4032x128xf32, #tpu.memory_space<vmem>>, vector<12x128xf32>
      %61 = arith.maximumf %57, %60 : vector<12x128xf32>
      %62 = arith.maximumf %54, %61 : vector<12x128xf32>
      %c12_i32_103 = arith.constant 12 : i32
      %63 = arith.muli %arg20, %c12_i32_103 : i32
      %c720_i32 = arith.constant 720 : i32
      %64 = arith.addi %c720_i32, %63 : i32
      %65 = arith.index_cast %64 : i32 to index
      %c0_104 = arith.constant 0 : index
      %66 = vector.load %arg17[%65, %c0_104] : memref<880x128xf32, #tpu.memory_space<vmem>>, vector<12x128xf32>
      tpu.vector_store %arg17[%65, %c0_104], %62 {strides = array<i32>} : memref<880x128xf32, #tpu.memory_space<vmem>>, vector<12x128xf32>,
    }
    %c12_i32_23 = arith.constant 12 : i32
    %c0_i32_24 = arith.constant 0 : i32
    %c6_i32 = arith.constant 6 : i32
    %9 = arith.addi %c0_i32_24, %c6_i32 : i32
    %c1_i32_25 = arith.constant 1 : i32
    scf.for %arg20 = %c0_i32_24 to %9 step %c1_i32_25  : i32 {
      %c16_i32 = arith.constant 16 : i32
      %45 = arith.muli %arg20, %c16_i32 : i32
      %cst_96 = arith.constant 0.000000e+00 : f32
      %46 = vector.broadcast %cst_96 : f32 to vector<16x128xf32>
      %cst_97 = arith.constant 0.000000e+00 : f32
      %47 = vector.broadcast %cst_97 : f32 to vector<16x128xf32>
      %cst_98 = arith.constant 0.000000e+00 : f32
      %48 = vector.broadcast %cst_98 : f32 to vector<16x128xf32>
      %cst_99 = arith.constant 0.000000e+00 : f32
      %49 = vector.broadcast %cst_99 : f32 to vector<16x128xf32>
      %cst_100 = arith.constant 0.000000e+00 : f32
      %50 = vector.broadcast %cst_100 : f32 to vector<16x128xf32>
      %cst_101 = arith.constant 0.000000e+00 : f32
      %51 = vector.broadcast %cst_101 : f32 to vector<16x128xf32>
      %cst_102 = arith.constant 0.000000e+00 : f32
      %52 = vector.broadcast %cst_102 : f32 to vector<16x128xf32>
      %cst_103 = arith.constant 0.000000e+00 : f32
      %53 = vector.broadcast %cst_103 : f32 to vector<16x128xf32>
      %cst_104 = arith.constant 0.000000e+00 : f32
      %54 = vector.broadcast %cst_104 : f32 to vector<16x128xf32>
      %cst_105 = arith.constant 0.000000e+00 : f32
      %55 = vector.broadcast %cst_105 : f32 to vector<16x128xf32>
      %cst_106 = arith.constant 0.000000e+00 : f32
      %56 = vector.broadcast %cst_106 : f32 to vector<16x128xf32>
      %cst_107 = arith.constant 0.000000e+00 : f32
      %57 = vector.broadcast %cst_107 : f32 to vector<16x128xf32>
      %c0_i32_108 = arith.constant 0 : i32
      %c25_i32 = arith.constant 25 : i32
      %58 = arith.addi %c0_i32_108, %c25_i32 : i32
      %c1_i32_109 = arith.constant 1 : i32
      %59:12 = scf.for %arg21 = %c0_i32_108 to %58 step %c1_i32_109 iter_args(%arg22 = %46, %arg23 = %47, %arg24 = %48, %arg25 = %49, %arg26 = %50, %arg27 = %51, %arg28 = %52, %arg29 = %53, %arg30 = %54, %arg31 = %55, %arg32 = %56, %arg33 = %57) -> (vector<16x128xf32>, vector<16x128xf32>, vector<16x128xf32>, vector<16x128xf32>, vector<16x128xf32>, vector<16x128xf32>, vector<16x128xf32>, vector<16x128xf32>, vector<16x128xf32>, vector<16x128xf32>, vector<16x128xf32>, vector<16x128xf32>)  : i32 {
        %156 = arith.index_cast %arg21 : i32 to index
        %157 = memref.load %arg8[%156] : memref<25xi32, #tpu.memory_space<smem>>
        %c12_i32_137 = arith.constant 12 : i32
        %158 = arith.muli %arg21, %c12_i32_137 : i32
        %c0_i32_138 = arith.constant 0 : i32
        %159 = arith.addi %c0_i32_138, %45 : i32
        %160 = arith.addi %159, %157 : i32
        %161 = arith.index_cast %160 : i32 to index
        %c0_139 = arith.constant 0 : index
        %162 = vector.load %arg17[%161, %c0_139] : memref<880x128xf32, #tpu.memory_space<vmem>>, vector<16x128xf32>
        %c0_i32_140 = arith.constant 0 : i32
        %163 = arith.addi %c0_i32_140, %158 : i32
        %c0_i32_141 = arith.constant 0 : i32
        %164 = arith.addi %163, %c0_i32_141 : i32
        %165 = arith.index_cast %164 : i32 to index
        %166 = memref.load %arg6[%165] : memref<1800xf32, #tpu.memory_space<smem>>
        %167 = vector.broadcast %166 : f32 to vector<16x128xf32>
        %168 = arith.mulf %167, %162 : vector<16x128xf32>
        %169 = arith.addf %arg22, %168 : vector<16x128xf32>
        %c1_i32_142 = arith.constant 1 : i32
        %170 = arith.addi %163, %c1_i32_142 : i32
        %171 = arith.index_cast %170 : i32 to index
        %172 = memref.load %arg6[%171] : memref<1800xf32, #tpu.memory_space<smem>>
        %173 = vector.broadcast %172 : f32 to vector<16x128xf32>
        %174 = arith.mulf %173, %162 : vector<16x128xf32>
        %175 = arith.addf %arg23, %174 : vector<16x128xf32>
        %c2_i32 = arith.constant 2 : i32
        %176 = arith.addi %163, %c2_i32 : i32
        %177 = arith.index_cast %176 : i32 to index
        %178 = memref.load %arg6[%177] : memref<1800xf32, #tpu.memory_space<smem>>
        %179 = vector.broadcast %178 : f32 to vector<16x128xf32>
        %180 = arith.mulf %179, %162 : vector<16x128xf32>
        %181 = arith.addf %arg24, %180 : vector<16x128xf32>
        %c3_i32 = arith.constant 3 : i32
        %182 = arith.addi %163, %c3_i32 : i32
        %183 = arith.index_cast %182 : i32 to index
        %184 = memref.load %arg6[%183] : memref<1800xf32, #tpu.memory_space<smem>>
        %185 = vector.broadcast %184 : f32 to vector<16x128xf32>
        %186 = arith.mulf %185, %162 : vector<16x128xf32>
        %187 = arith.addf %arg25, %186 : vector<16x128xf32>
        %c4_i32_143 = arith.constant 4 : i32
        %188 = arith.addi %163, %c4_i32_143 : i32
        %189 = arith.index_cast %188 : i32 to index
        %190 = memref.load %arg6[%189] : memref<1800xf32, #tpu.memory_space<smem>>
        %191 = vector.broadcast %190 : f32 to vector<16x128xf32>
        %192 = arith.mulf %191, %162 : vector<16x128xf32>
        %193 = arith.addf %arg26, %192 : vector<16x128xf32>
        %c5_i32 = arith.constant 5 : i32
        %194 = arith.addi %163, %c5_i32 : i32
        %195 = arith.index_cast %194 : i32 to index
        %196 = memref.load %arg6[%195] : memref<1800xf32, #tpu.memory_space<smem>>
        %197 = vector.broadcast %196 : f32 to vector<16x128xf32>
        %198 = arith.mulf %197, %162 : vector<16x128xf32>
        %199 = arith.addf %arg27, %198 : vector<16x128xf32>
        %c6_i32_144 = arith.constant 6 : i32
        %200 = arith.addi %163, %c6_i32_144 : i32
        %201 = arith.index_cast %200 : i32 to index
        %202 = memref.load %arg6[%201] : memref<1800xf32, #tpu.memory_space<smem>>
        %203 = vector.broadcast %202 : f32 to vector<16x128xf32>
        %204 = arith.mulf %203, %162 : vector<16x128xf32>
        %205 = arith.addf %arg28, %204 : vector<16x128xf32>
        %c7_i32 = arith.constant 7 : i32
        %206 = arith.addi %163, %c7_i32 : i32
        %207 = arith.index_cast %206 : i32 to index
        %208 = memref.load %arg6[%207] : memref<1800xf32, #tpu.memory_space<smem>>
        %209 = vector.broadcast %208 : f32 to vector<16x128xf32>
        %210 = arith.mulf %209, %162 : vector<16x128xf32>
        %211 = arith.addf %arg29, %210 : vector<16x128xf32>
        %c8_i32 = arith.constant 8 : i32
        %212 = arith.addi %163, %c8_i32 : i32
        %213 = arith.index_cast %212 : i32 to index
        %214 = memref.load %arg6[%213] : memref<1800xf32, #tpu.memory_space<smem>>
        %215 = vector.broadcast %214 : f32 to vector<16x128xf32>
        %216 = arith.mulf %215, %162 : vector<16x128xf32>
        %217 = arith.addf %arg30, %216 : vector<16x128xf32>
        %c9_i32 = arith.constant 9 : i32
        %218 = arith.addi %163, %c9_i32 : i32
        %219 = arith.index_cast %218 : i32 to index
        %220 = memref.load %arg6[%219] : memref<1800xf32, #tpu.memory_space<smem>>
        %221 = vector.broadcast %220 : f32 to vector<16x128xf32>
        %222 = arith.mulf %221, %162 : vector<16x128xf32>
        %223 = arith.addf %arg31, %222 : vector<16x128xf32>
        %c10_i32 = arith.constant 10 : i32
        %224 = arith.addi %163, %c10_i32 : i32
        %225 = arith.index_cast %224 : i32 to index
        %226 = memref.load %arg6[%225] : memref<1800xf32, #tpu.memory_space<smem>>
        %227 = vector.broadcast %226 : f32 to vector<16x128xf32>
        %228 = arith.mulf %227, %162 : vector<16x128xf32>
        %229 = arith.addf %arg32, %228 : vector<16x128xf32>
        %c11_i32 = arith.constant 11 : i32
        %230 = arith.addi %163, %c11_i32 : i32
        %231 = arith.index_cast %230 : i32 to index
        %232 = memref.load %arg6[%231] : memref<1800xf32, #tpu.memory_space<smem>>
        %233 = vector.broadcast %232 : f32 to vector<16x128xf32>
        %234 = arith.mulf %233, %162 : vector<16x128xf32>
        %235 = arith.addf %arg33, %234 : vector<16x128xf32>
        %c144_i32 = arith.constant 144 : i32
        %236 = arith.addi %c144_i32, %45 : i32
        %237 = arith.addi %236, %157 : i32
        %238 = arith.index_cast %237 : i32 to index
        %c0_145 = arith.constant 0 : index
        %239 = vector.load %arg17[%238, %c0_145] : memref<880x128xf32, #tpu.memory_space<vmem>>, vector<16x128xf32>
        %c300_i32 = arith.constant 300 : i32
        %240 = arith.addi %c300_i32, %158 : i32
        %c0_i32_146 = arith.constant 0 : i32
        %241 = arith.addi %240, %c0_i32_146 : i32
        %242 = arith.index_cast %241 : i32 to index
        %243 = memref.load %arg6[%242] : memref<1800xf32, #tpu.memory_space<smem>>
        %244 = vector.broadcast %243 : f32 to vector<16x128xf32>
        %245 = arith.mulf %244, %239 : vector<16x128xf32>
        %246 = arith.addf %169, %245 : vector<16x128xf32>
        %c1_i32_147 = arith.constant 1 : i32
        %247 = arith.addi %240, %c1_i32_147 : i32
        %248 = arith.index_cast %247 : i32 to index
        %249 = memref.load %arg6[%248] : memref<1800xf32, #tpu.memory_space<smem>>
        %250 = vector.broadcast %249 : f32 to vector<16x128xf32>
        %251 = arith.mulf %250, %239 : vector<16x128xf32>
        %252 = arith.addf %175, %251 : vector<16x128xf32>
        %c2_i32_148 = arith.constant 2 : i32
        %253 = arith.addi %240, %c2_i32_148 : i32
        %254 = arith.index_cast %253 : i32 to index
        %255 = memref.load %arg6[%254] : memref<1800xf32, #tpu.memory_space<smem>>
        %256 = vector.broadcast %255 : f32 to vector<16x128xf32>
        %257 = arith.mulf %256, %239 : vector<16x128xf32>
        %258 = arith.addf %181, %257 : vector<16x128xf32>
        %c3_i32_149 = arith.constant 3 : i32
        %259 = arith.addi %240, %c3_i32_149 : i32
        %260 = arith.index_cast %259 : i32 to index
        %261 = memref.load %arg6[%260] : memref<1800xf32, #tpu.memory_space<smem>>
        %262 = vector.broadcast %261 : f32 to vector<16x128xf32>
        %263 = arith.mulf %262, %239 : vector<16x128xf32>
        %264 = arith.addf %187, %263 : vector<16x128xf32>
        %c4_i32_150 = arith.constant 4 : i32
        %265 = arith.addi %240, %c4_i32_150 : i32
        %266 = arith.index_cast %265 : i32 to index
        %267 = memref.load %arg6[%266] : memref<1800xf32, #tpu.memory_space<smem>>
        %268 = vector.broadcast %267 : f32 to vector<16x128xf32>
        %269 = arith.mulf %268, %239 : vector<16x128xf32>
        %270 = arith.addf %193, %269 : vector<16x128xf32>
        %c5_i32_151 = arith.constant 5 : i32
        %271 = arith.addi %240, %c5_i32_151 : i32
        %272 = arith.index_cast %271 : i32 to index
        %273 = memref.load %arg6[%272] : memref<1800xf32, #tpu.memory_space<smem>>
        %274 = vector.broadcast %273 : f32 to vector<16x128xf32>
        %275 = arith.mulf %274, %239 : vector<16x128xf32>
        %276 = arith.addf %199, %275 : vector<16x128xf32>
        %c6_i32_152 = arith.constant 6 : i32
        %277 = arith.addi %240, %c6_i32_152 : i32
        %278 = arith.index_cast %277 : i32 to index
        %279 = memref.load %arg6[%278] : memref<1800xf32, #tpu.memory_space<smem>>
        %280 = vector.broadcast %279 : f32 to vector<16x128xf32>
        %281 = arith.mulf %280, %239 : vector<16x128xf32>
        %282 = arith.addf %205, %281 : vector<16x128xf32>
        %c7_i32_153 = arith.constant 7 : i32
        %283 = arith.addi %240, %c7_i32_153 : i32
        %284 = arith.index_cast %283 : i32 to index
        %285 = memref.load %arg6[%284] : memref<1800xf32, #tpu.memory_space<smem>>
        %286 = vector.broadcast %285 : f32 to vector<16x128xf32>
        %287 = arith.mulf %286, %239 : vector<16x128xf32>
        %288 = arith.addf %211, %287 : vector<16x128xf32>
        %c8_i32_154 = arith.constant 8 : i32
        %289 = arith.addi %240, %c8_i32_154 : i32
        %290 = arith.index_cast %289 : i32 to index
        %291 = memref.load %arg6[%290] : memref<1800xf32, #tpu.memory_space<smem>>
        %292 = vector.broadcast %291 : f32 to vector<16x128xf32>
        %293 = arith.mulf %292, %239 : vector<16x128xf32>
        %294 = arith.addf %217, %293 : vector<16x128xf32>
        %c9_i32_155 = arith.constant 9 : i32
        %295 = arith.addi %240, %c9_i32_155 : i32
        %296 = arith.index_cast %295 : i32 to index
        %297 = memref.load %arg6[%296] : memref<1800xf32, #tpu.memory_space<smem>>
        %298 = vector.broadcast %297 : f32 to vector<16x128xf32>
        %299 = arith.mulf %298, %239 : vector<16x128xf32>
        %300 = arith.addf %223, %299 : vector<16x128xf32>
        %c10_i32_156 = arith.constant 10 : i32
        %301 = arith.addi %240, %c10_i32_156 : i32
        %302 = arith.index_cast %301 : i32 to index
        %303 = memref.load %arg6[%302] : memref<1800xf32, #tpu.memory_space<smem>>
        %304 = vector.broadcast %303 : f32 to vector<16x128xf32>
        %305 = arith.mulf %304, %239 : vector<16x128xf32>
        %306 = arith.addf %229, %305 : vector<16x128xf32>
        %c11_i32_157 = arith.constant 11 : i32
        %307 = arith.addi %240, %c11_i32_157 : i32
        %308 = arith.index_cast %307 : i32 to index
        %309 = memref.load %arg6[%308] : memref<1800xf32, #tpu.memory_space<smem>>
        %310 = vector.broadcast %309 : f32 to vector<16x128xf32>
        %311 = arith.mulf %310, %239 : vector<16x128xf32>
        %312 = arith.addf %235, %311 : vector<16x128xf32>
        %c288_i32_158 = arith.constant 288 : i32
        %313 = arith.addi %c288_i32_158, %45 : i32
        %314 = arith.addi %313, %157 : i32
        %315 = arith.index_cast %314 : i32 to index
        %c0_159 = arith.constant 0 : index
        %316 = vector.load %arg17[%315, %c0_159] : memref<880x128xf32, #tpu.memory_space<vmem>>, vector<16x128xf32>
        %c600_i32 = arith.constant 600 : i32
        %317 = arith.addi %c600_i32, %158 : i32
        %c0_i32_160 = arith.constant 0 : i32
        %318 = arith.addi %317, %c0_i32_160 : i32
        %319 = arith.index_cast %318 : i32 to index
        %320 = memref.load %arg6[%319] : memref<1800xf32, #tpu.memory_space<smem>>
        %321 = vector.broadcast %320 : f32 to vector<16x128xf32>
        %322 = arith.mulf %321, %316 : vector<16x128xf32>
        %323 = arith.addf %246, %322 : vector<16x128xf32>
        %c1_i32_161 = arith.constant 1 : i32
        %324 = arith.addi %317, %c1_i32_161 : i32
        %325 = arith.index_cast %324 : i32 to index
        %326 = memref.load %arg6[%325] : memref<1800xf32, #tpu.memory_space<smem>>
        %327 = vector.broadcast %326 : f32 to vector<16x128xf32>
        %328 = arith.mulf %327, %316 : vector<16x128xf32>
        %329 = arith.addf %252, %328 : vector<16x128xf32>
        %c2_i32_162 = arith.constant 2 : i32
        %330 = arith.addi %317, %c2_i32_162 : i32
        %331 = arith.index_cast %330 : i32 to index
        %332 = memref.load %arg6[%331] : memref<1800xf32, #tpu.memory_space<smem>>
        %333 = vector.broadcast %332 : f32 to vector<16x128xf32>
        %334 = arith.mulf %333, %316 : vector<16x128xf32>
        %335 = arith.addf %258, %334 : vector<16x128xf32>
        %c3_i32_163 = arith.constant 3 : i32
        %336 = arith.addi %317, %c3_i32_163 : i32
        %337 = arith.index_cast %336 : i32 to index
        %338 = memref.load %arg6[%337] : memref<1800xf32, #tpu.memory_space<smem>>
        %339 = vector.broadcast %338 : f32 to vector<16x128xf32>
        %340 = arith.mulf %339, %316 : vector<16x128xf32>
        %341 = arith.addf %264, %340 : vector<16x128xf32>
        %c4_i32_164 = arith.constant 4 : i32
        %342 = arith.addi %317, %c4_i32_164 : i32
        %343 = arith.index_cast %342 : i32 to index
        %344 = memref.load %arg6[%343] : memref<1800xf32, #tpu.memory_space<smem>>
        %345 = vector.broadcast %344 : f32 to vector<16x128xf32>
        %346 = arith.mulf %345, %316 : vector<16x128xf32>
        %347 = arith.addf %270, %346 : vector<16x128xf32>
        %c5_i32_165 = arith.constant 5 : i32
        %348 = arith.addi %317, %c5_i32_165 : i32
        %349 = arith.index_cast %348 : i32 to index
        %350 = memref.load %arg6[%349] : memref<1800xf32, #tpu.memory_space<smem>>
        %351 = vector.broadcast %350 : f32 to vector<16x128xf32>
        %352 = arith.mulf %351, %316 : vector<16x128xf32>
        %353 = arith.addf %276, %352 : vector<16x128xf32>
        %c6_i32_166 = arith.constant 6 : i32
        %354 = arith.addi %317, %c6_i32_166 : i32
        %355 = arith.index_cast %354 : i32 to index
        %356 = memref.load %arg6[%355] : memref<1800xf32, #tpu.memory_space<smem>>
        %357 = vector.broadcast %356 : f32 to vector<16x128xf32>
        %358 = arith.mulf %357, %316 : vector<16x128xf32>
        %359 = arith.addf %282, %358 : vector<16x128xf32>
        %c7_i32_167 = arith.constant 7 : i32
        %360 = arith.addi %317, %c7_i32_167 : i32
        %361 = arith.index_cast %360 : i32 to index
        %362 = memref.load %arg6[%361] : memref<1800xf32, #tpu.memory_space<smem>>
        %363 = vector.broadcast %362 : f32 to vector<16x128xf32>
        %364 = arith.mulf %363, %316 : vector<16x128xf32>
        %365 = arith.addf %288, %364 : vector<16x128xf32>
        %c8_i32_168 = arith.constant 8 : i32
        %366 = arith.addi %317, %c8_i32_168 : i32
        %367 = arith.index_cast %366 : i32 to index
        %368 = memref.load %arg6[%367] : memref<1800xf32, #tpu.memory_space<smem>>
        %369 = vector.broadcast %368 : f32 to vector<16x128xf32>
        %370 = arith.mulf %369, %316 : vector<16x128xf32>
        %371 = arith.addf %294, %370 : vector<16x128xf32>
        %c9_i32_169 = arith.constant 9 : i32
        %372 = arith.addi %317, %c9_i32_169 : i32
        %373 = arith.index_cast %372 : i32 to index
        %374 = memref.load %arg6[%373] : memref<1800xf32, #tpu.memory_space<smem>>
        %375 = vector.broadcast %374 : f32 to vector<16x128xf32>
        %376 = arith.mulf %375, %316 : vector<16x128xf32>
        %377 = arith.addf %300, %376 : vector<16x128xf32>
        %c10_i32_170 = arith.constant 10 : i32
        %378 = arith.addi %317, %c10_i32_170 : i32
        %379 = arith.index_cast %378 : i32 to index
        %380 = memref.load %arg6[%379] : memref<1800xf32, #tpu.memory_space<smem>>
        %381 = vector.broadcast %380 : f32 to vector<16x128xf32>
        %382 = arith.mulf %381, %316 : vector<16x128xf32>
        %383 = arith.addf %306, %382 : vector<16x128xf32>
        %c11_i32_171 = arith.constant 11 : i32
        %384 = arith.addi %317, %c11_i32_171 : i32
        %385 = arith.index_cast %384 : i32 to index
        %386 = memref.load %arg6[%385] : memref<1800xf32, #tpu.memory_space<smem>>
        %387 = vector.broadcast %386 : f32 to vector<16x128xf32>
        %388 = arith.mulf %387, %316 : vector<16x128xf32>
        %389 = arith.addf %312, %388 : vector<16x128xf32>
        %c432_i32 = arith.constant 432 : i32
        %390 = arith.addi %c432_i32, %45 : i32
        %391 = arith.addi %390, %157 : i32
        %392 = arith.index_cast %391 : i32 to index
        %c0_172 = arith.constant 0 : index
        %393 = vector.load %arg17[%392, %c0_172] : memref<880x128xf32, #tpu.memory_space<vmem>>, vector<16x128xf32>
        %c900_i32 = arith.constant 900 : i32
        %394 = arith.addi %c900_i32, %158 : i32
        %c0_i32_173 = arith.constant 0 : i32
        %395 = arith.addi %394, %c0_i32_173 : i32
        %396 = arith.index_cast %395 : i32 to index
        %397 = memref.load %arg6[%396] : memref<1800xf32, #tpu.memory_space<smem>>
        %398 = vector.broadcast %397 : f32 to vector<16x128xf32>
        %399 = arith.mulf %398, %393 : vector<16x128xf32>
        %400 = arith.addf %323, %399 : vector<16x128xf32>
        %c1_i32_174 = arith.constant 1 : i32
        %401 = arith.addi %394, %c1_i32_174 : i32
        %402 = arith.index_cast %401 : i32 to index
        %403 = memref.load %arg6[%402] : memref<1800xf32, #tpu.memory_space<smem>>
        %404 = vector.broadcast %403 : f32 to vector<16x128xf32>
        %405 = arith.mulf %404, %393 : vector<16x128xf32>
        %406 = arith.addf %329, %405 : vector<16x128xf32>
        %c2_i32_175 = arith.constant 2 : i32
        %407 = arith.addi %394, %c2_i32_175 : i32
        %408 = arith.index_cast %407 : i32 to index
        %409 = memref.load %arg6[%408] : memref<1800xf32, #tpu.memory_space<smem>>
        %410 = vector.broadcast %409 : f32 to vector<16x128xf32>
        %411 = arith.mulf %410, %393 : vector<16x128xf32>
        %412 = arith.addf %335, %411 : vector<16x128xf32>
        %c3_i32_176 = arith.constant 3 : i32
        %413 = arith.addi %394, %c3_i32_176 : i32
        %414 = arith.index_cast %413 : i32 to index
        %415 = memref.load %arg6[%414] : memref<1800xf32, #tpu.memory_space<smem>>
        %416 = vector.broadcast %415 : f32 to vector<16x128xf32>
        %417 = arith.mulf %416, %393 : vector<16x128xf32>
        %418 = arith.addf %341, %417 : vector<16x128xf32>
        %c4_i32_177 = arith.constant 4 : i32
        %419 = arith.addi %394, %c4_i32_177 : i32
        %420 = arith.index_cast %419 : i32 to index
        %421 = memref.load %arg6[%420] : memref<1800xf32, #tpu.memory_space<smem>>
        %422 = vector.broadcast %421 : f32 to vector<16x128xf32>
        %423 = arith.mulf %422, %393 : vector<16x128xf32>
        %424 = arith.addf %347, %423 : vector<16x128xf32>
        %c5_i32_178 = arith.constant 5 : i32
        %425 = arith.addi %394, %c5_i32_178 : i32
        %426 = arith.index_cast %425 : i32 to index
        %427 = memref.load %arg6[%426] : memref<1800xf32, #tpu.memory_space<smem>>
        %428 = vector.broadcast %427 : f32 to vector<16x128xf32>
        %429 = arith.mulf %428, %393 : vector<16x128xf32>
        %430 = arith.addf %353, %429 : vector<16x128xf32>
        %c6_i32_179 = arith.constant 6 : i32
        %431 = arith.addi %394, %c6_i32_179 : i32
        %432 = arith.index_cast %431 : i32 to index
        %433 = memref.load %arg6[%432] : memref<1800xf32, #tpu.memory_space<smem>>
        %434 = vector.broadcast %433 : f32 to vector<16x128xf32>
        %435 = arith.mulf %434, %393 : vector<16x128xf32>
        %436 = arith.addf %359, %435 : vector<16x128xf32>
        %c7_i32_180 = arith.constant 7 : i32
        %437 = arith.addi %394, %c7_i32_180 : i32
        %438 = arith.index_cast %437 : i32 to index
        %439 = memref.load %arg6[%438] : memref<1800xf32, #tpu.memory_space<smem>>
        %440 = vector.broadcast %439 : f32 to vector<16x128xf32>
        %441 = arith.mulf %440, %393 : vector<16x128xf32>
        %442 = arith.addf %365, %441 : vector<16x128xf32>
        %c8_i32_181 = arith.constant 8 : i32
        %443 = arith.addi %394, %c8_i32_181 : i32
        %444 = arith.index_cast %443 : i32 to index
        %445 = memref.load %arg6[%444] : memref<1800xf32, #tpu.memory_space<smem>>
        %446 = vector.broadcast %445 : f32 to vector<16x128xf32>
        %447 = arith.mulf %446, %393 : vector<16x128xf32>
        %448 = arith.addf %371, %447 : vector<16x128xf32>
        %c9_i32_182 = arith.constant 9 : i32
        %449 = arith.addi %394, %c9_i32_182 : i32
        %450 = arith.index_cast %449 : i32 to index
        %451 = memref.load %arg6[%450] : memref<1800xf32, #tpu.memory_space<smem>>
        %452 = vector.broadcast %451 : f32 to vector<16x128xf32>
        %453 = arith.mulf %452, %393 : vector<16x128xf32>
        %454 = arith.addf %377, %453 : vector<16x128xf32>
        %c10_i32_183 = arith.constant 10 : i32
        %455 = arith.addi %394, %c10_i32_183 : i32
        %456 = arith.index_cast %455 : i32 to index
        %457 = memref.load %arg6[%456] : memref<1800xf32, #tpu.memory_space<smem>>
        %458 = vector.broadcast %457 : f32 to vector<16x128xf32>
        %459 = arith.mulf %458, %393 : vector<16x128xf32>
        %460 = arith.addf %383, %459 : vector<16x128xf32>
        %c11_i32_184 = arith.constant 11 : i32
        %461 = arith.addi %394, %c11_i32_184 : i32
        %462 = arith.index_cast %461 : i32 to index
        %463 = memref.load %arg6[%462] : memref<1800xf32, #tpu.memory_space<smem>>
        %464 = vector.broadcast %463 : f32 to vector<16x128xf32>
        %465 = arith.mulf %464, %393 : vector<16x128xf32>
        %466 = arith.addf %389, %465 : vector<16x128xf32>
        %c576_i32_185 = arith.constant 576 : i32
        %467 = arith.addi %c576_i32_185, %45 : i32
        %468 = arith.addi %467, %157 : i32
        %469 = arith.index_cast %468 : i32 to index
        %c0_186 = arith.constant 0 : index
        %470 = vector.load %arg17[%469, %c0_186] : memref<880x128xf32, #tpu.memory_space<vmem>>, vector<16x128xf32>
        %c1200_i32 = arith.constant 1200 : i32
        %471 = arith.addi %c1200_i32, %158 : i32
        %c0_i32_187 = arith.constant 0 : i32
        %472 = arith.addi %471, %c0_i32_187 : i32
        %473 = arith.index_cast %472 : i32 to index
        %474 = memref.load %arg6[%473] : memref<1800xf32, #tpu.memory_space<smem>>
        %475 = vector.broadcast %474 : f32 to vector<16x128xf32>
        %476 = arith.mulf %475, %470 : vector<16x128xf32>
        %477 = arith.addf %400, %476 : vector<16x128xf32>
        %c1_i32_188 = arith.constant 1 : i32
        %478 = arith.addi %471, %c1_i32_188 : i32
        %479 = arith.index_cast %478 : i32 to index
        %480 = memref.load %arg6[%479] : memref<1800xf32, #tpu.memory_space<smem>>
        %481 = vector.broadcast %480 : f32 to vector<16x128xf32>
        %482 = arith.mulf %481, %470 : vector<16x128xf32>
        %483 = arith.addf %406, %482 : vector<16x128xf32>
        %c2_i32_189 = arith.constant 2 : i32
        %484 = arith.addi %471, %c2_i32_189 : i32
        %485 = arith.index_cast %484 : i32 to index
        %486 = memref.load %arg6[%485] : memref<1800xf32, #tpu.memory_space<smem>>
        %487 = vector.broadcast %486 : f32 to vector<16x128xf32>
        %488 = arith.mulf %487, %470 : vector<16x128xf32>
        %489 = arith.addf %412, %488 : vector<16x128xf32>
        %c3_i32_190 = arith.constant 3 : i32
        %490 = arith.addi %471, %c3_i32_190 : i32
        %491 = arith.index_cast %490 : i32 to index
        %492 = memref.load %arg6[%491] : memref<1800xf32, #tpu.memory_space<smem>>
        %493 = vector.broadcast %492 : f32 to vector<16x128xf32>
        %494 = arith.mulf %493, %470 : vector<16x128xf32>
        %495 = arith.addf %418, %494 : vector<16x128xf32>
        %c4_i32_191 = arith.constant 4 : i32
        %496 = arith.addi %471, %c4_i32_191 : i32
        %497 = arith.index_cast %496 : i32 to index
        %498 = memref.load %arg6[%497] : memref<1800xf32, #tpu.memory_space<smem>>
        %499 = vector.broadcast %498 : f32 to vector<16x128xf32>
        %500 = arith.mulf %499, %470 : vector<16x128xf32>
        %501 = arith.addf %424, %500 : vector<16x128xf32>
        %c5_i32_192 = arith.constant 5 : i32
        %502 = arith.addi %471, %c5_i32_192 : i32
        %503 = arith.index_cast %502 : i32 to index
        %504 = memref.load %arg6[%503] : memref<1800xf32, #tpu.memory_space<smem>>
        %505 = vector.broadcast %504 : f32 to vector<16x128xf32>
        %506 = arith.mulf %505, %470 : vector<16x128xf32>
        %507 = arith.addf %430, %506 : vector<16x128xf32>
        %c6_i32_193 = arith.constant 6 : i32
        %508 = arith.addi %471, %c6_i32_193 : i32
        %509 = arith.index_cast %508 : i32 to index
        %510 = memref.load %arg6[%509] : memref<1800xf32, #tpu.memory_space<smem>>
        %511 = vector.broadcast %510 : f32 to vector<16x128xf32>
        %512 = arith.mulf %511, %470 : vector<16x128xf32>
        %513 = arith.addf %436, %512 : vector<16x128xf32>
        %c7_i32_194 = arith.constant 7 : i32
        %514 = arith.addi %471, %c7_i32_194 : i32
        %515 = arith.index_cast %514 : i32 to index
        %516 = memref.load %arg6[%515] : memref<1800xf32, #tpu.memory_space<smem>>
        %517 = vector.broadcast %516 : f32 to vector<16x128xf32>
        %518 = arith.mulf %517, %470 : vector<16x128xf32>
        %519 = arith.addf %442, %518 : vector<16x128xf32>
        %c8_i32_195 = arith.constant 8 : i32
        %520 = arith.addi %471, %c8_i32_195 : i32
        %521 = arith.index_cast %520 : i32 to index
        %522 = memref.load %arg6[%521] : memref<1800xf32, #tpu.memory_space<smem>>
        %523 = vector.broadcast %522 : f32 to vector<16x128xf32>
        %524 = arith.mulf %523, %470 : vector<16x128xf32>
        %525 = arith.addf %448, %524 : vector<16x128xf32>
        %c9_i32_196 = arith.constant 9 : i32
        %526 = arith.addi %471, %c9_i32_196 : i32
        %527 = arith.index_cast %526 : i32 to index
        %528 = memref.load %arg6[%527] : memref<1800xf32, #tpu.memory_space<smem>>
        %529 = vector.broadcast %528 : f32 to vector<16x128xf32>
        %530 = arith.mulf %529, %470 : vector<16x128xf32>
        %531 = arith.addf %454, %530 : vector<16x128xf32>
        %c10_i32_197 = arith.constant 10 : i32
        %532 = arith.addi %471, %c10_i32_197 : i32
        %533 = arith.index_cast %532 : i32 to index
        %534 = memref.load %arg6[%533] : memref<1800xf32, #tpu.memory_space<smem>>
        %535 = vector.broadcast %534 : f32 to vector<16x128xf32>
        %536 = arith.mulf %535, %470 : vector<16x128xf32>
        %537 = arith.addf %460, %536 : vector<16x128xf32>
        %c11_i32_198 = arith.constant 11 : i32
        %538 = arith.addi %471, %c11_i32_198 : i32
        %539 = arith.index_cast %538 : i32 to index
        %540 = memref.load %arg6[%539] : memref<1800xf32, #tpu.memory_space<smem>>
        %541 = vector.broadcast %540 : f32 to vector<16x128xf32>
        %542 = arith.mulf %541, %470 : vector<16x128xf32>
        %543 = arith.addf %466, %542 : vector<16x128xf32>
        %c720_i32 = arith.constant 720 : i32
        %544 = arith.addi %c720_i32, %45 : i32
        %545 = arith.addi %544, %157 : i32
        %546 = arith.index_cast %545 : i32 to index
        %c0_199 = arith.constant 0 : index
        %547 = vector.load %arg17[%546, %c0_199] : memref<880x128xf32, #tpu.memory_space<vmem>>, vector<16x128xf32>
        %c1500_i32 = arith.constant 1500 : i32
        %548 = arith.addi %c1500_i32, %158 : i32
        %c0_i32_200 = arith.constant 0 : i32
        %549 = arith.addi %548, %c0_i32_200 : i32
        %550 = arith.index_cast %549 : i32 to index
        %551 = memref.load %arg6[%550] : memref<1800xf32, #tpu.memory_space<smem>>
        %552 = vector.broadcast %551 : f32 to vector<16x128xf32>
        %553 = arith.mulf %552, %547 : vector<16x128xf32>
        %554 = arith.addf %477, %553 : vector<16x128xf32>
        %c1_i32_201 = arith.constant 1 : i32
        %555 = arith.addi %548, %c1_i32_201 : i32
        %556 = arith.index_cast %555 : i32 to index
        %557 = memref.load %arg6[%556] : memref<1800xf32, #tpu.memory_space<smem>>
        %558 = vector.broadcast %557 : f32 to vector<16x128xf32>
        %559 = arith.mulf %558, %547 : vector<16x128xf32>
        %560 = arith.addf %483, %559 : vector<16x128xf32>
        %c2_i32_202 = arith.constant 2 : i32
        %561 = arith.addi %548, %c2_i32_202 : i32
        %562 = arith.index_cast %561 : i32 to index
        %563 = memref.load %arg6[%562] : memref<1800xf32, #tpu.memory_space<smem>>
        %564 = vector.broadcast %563 : f32 to vector<16x128xf32>
        %565 = arith.mulf %564, %547 : vector<16x128xf32>
        %566 = arith.addf %489, %565 : vector<16x128xf32>
        %c3_i32_203 = arith.constant 3 : i32
        %567 = arith.addi %548, %c3_i32_203 : i32
        %568 = arith.index_cast %567 : i32 to index
        %569 = memref.load %arg6[%568] : memref<1800xf32, #tpu.memory_space<smem>>
        %570 = vector.broadcast %569 : f32 to vector<16x128xf32>
        %571 = arith.mulf %570, %547 : vector<16x128xf32>
        %572 = arith.addf %495, %571 : vector<16x128xf32>
        %c4_i32_204 = arith.constant 4 : i32
        %573 = arith.addi %548, %c4_i32_204 : i32
        %574 = arith.index_cast %573 : i32 to index
        %575 = memref.load %arg6[%574] : memref<1800xf32, #tpu.memory_space<smem>>
        %576 = vector.broadcast %575 : f32 to vector<16x128xf32>
        %577 = arith.mulf %576, %547 : vector<16x128xf32>
        %578 = arith.addf %501, %577 : vector<16x128xf32>
        %c5_i32_205 = arith.constant 5 : i32
        %579 = arith.addi %548, %c5_i32_205 : i32
        %580 = arith.index_cast %579 : i32 to index
        %581 = memref.load %arg6[%580] : memref<1800xf32, #tpu.memory_space<smem>>
        %582 = vector.broadcast %581 : f32 to vector<16x128xf32>
        %583 = arith.mulf %582, %547 : vector<16x128xf32>
        %584 = arith.addf %507, %583 : vector<16x128xf32>
        %c6_i32_206 = arith.constant 6 : i32
        %585 = arith.addi %548, %c6_i32_206 : i32
        %586 = arith.index_cast %585 : i32 to index
        %587 = memref.load %arg6[%586] : memref<1800xf32, #tpu.memory_space<smem>>
        %588 = vector.broadcast %587 : f32 to vector<16x128xf32>
        %589 = arith.mulf %588, %547 : vector<16x128xf32>
        %590 = arith.addf %513, %589 : vector<16x128xf32>
        %c7_i32_207 = arith.constant 7 : i32
        %591 = arith.addi %548, %c7_i32_207 : i32
        %592 = arith.index_cast %591 : i32 to index
        %593 = memref.load %arg6[%592] : memref<1800xf32, #tpu.memory_space<smem>>
        %594 = vector.broadcast %593 : f32 to vector<16x128xf32>
        %595 = arith.mulf %594, %547 : vector<16x128xf32>
        %596 = arith.addf %519, %595 : vector<16x128xf32>
        %c8_i32_208 = arith.constant 8 : i32
        %597 = arith.addi %548, %c8_i32_208 : i32
        %598 = arith.index_cast %597 : i32 to index
        %599 = memref.load %arg6[%598] : memref<1800xf32, #tpu.memory_space<smem>>
        %600 = vector.broadcast %599 : f32 to vector<16x128xf32>
        %601 = arith.mulf %600, %547 : vector<16x128xf32>
        %602 = arith.addf %525, %601 : vector<16x128xf32>
        %c9_i32_209 = arith.constant 9 : i32
        %603 = arith.addi %548, %c9_i32_209 : i32
        %604 = arith.index_cast %603 : i32 to index
        %605 = memref.load %arg6[%604] : memref<1800xf32, #tpu.memory_space<smem>>
        %606 = vector.broadcast %605 : f32 to vector<16x128xf32>
        %607 = arith.mulf %606, %547 : vector<16x128xf32>
        %608 = arith.addf %531, %607 : vector<16x128xf32>
        %c10_i32_210 = arith.constant 10 : i32
        %609 = arith.addi %548, %c10_i32_210 : i32
        %610 = arith.index_cast %609 : i32 to index
        %611 = memref.load %arg6[%610] : memref<1800xf32, #tpu.memory_space<smem>>
        %612 = vector.broadcast %611 : f32 to vector<16x128xf32>
        %613 = arith.mulf %612, %547 : vector<16x128xf32>
        %614 = arith.addf %537, %613 : vector<16x128xf32>
        %c11_i32_211 = arith.constant 11 : i32
        %615 = arith.addi %548, %c11_i32_211 : i32
        %616 = arith.index_cast %615 : i32 to index
        %617 = memref.load %arg6[%616] : memref<1800xf32, #tpu.memory_space<smem>>
        %618 = vector.broadcast %617 : f32 to vector<16x128xf32>
        %619 = arith.mulf %618, %547 : vector<16x128xf32>
        %620 = arith.addf %543, %619 : vector<16x128xf32>
        scf.yield %554, %560, %566, %572, %578, %584, %590, %596, %602, %608, %614, %620 : vector<16x128xf32>, vector<16x128xf32>, vector<16x128xf32>, vector<16x128xf32>, vector<16x128xf32>, vector<16x128xf32>, vector<16x128xf32>, vector<16x128xf32>, vector<16x128xf32>, vector<16x128xf32>, vector<16x128xf32>, vector<16x128xf32>
      }
      %c25_i32_110 = arith.constant 25 : i32
      %c0_111 = arith.constant 0 : index
      %60 = memref.load %arg7[%c0_111] : memref<12xf32, #tpu.memory_space<smem>>
      %61 = vector.broadcast %60 : f32 to vector<16x128xf32>
      %62 = arith.addf %59#0, %61 : vector<16x128xf32>
      %cst_112 = arith.constant 0.000000e+00 : f32
      %63 = vector.broadcast %cst_112 : f32 to vector<16x128xf32>
      %64 = arith.maximumf %62, %63 : vector<16x128xf32>
      %c0_i32_113 = arith.constant 0 : i32
      %65 = arith.addi %c0_i32_113, %45 : i32
      %66 = arith.index_cast %65 : i32 to index
      %c0_114 = arith.constant 0 : index
      %67 = vector.load %arg18[%66, %c0_114] : memref<1152x128xf32, #tpu.memory_space<vmem>>, vector<16x128xf32>
      tpu.vector_store %arg18[%66, %c0_114], %64 {strides = array<i32>} : memref<1152x128xf32, #tpu.memory_space<vmem>>, vector<16x128xf32>,
      %c1 = arith.constant 1 : index
      %68 = memref.load %arg7[%c1] : memref<12xf32, #tpu.memory_space<smem>>
      %69 = vector.broadcast %68 : f32 to vector<16x128xf32>
      %70 = arith.addf %59#1, %69 : vector<16x128xf32>
      %cst_115 = arith.constant 0.000000e+00 : f32
      %71 = vector.broadcast %cst_115 : f32 to vector<16x128xf32>
      %72 = arith.maximumf %70, %71 : vector<16x128xf32>
      %c96_i32 = arith.constant 96 : i32
      %73 = arith.addi %c96_i32, %45 : i32
      %74 = arith.index_cast %73 : i32 to index
      %c0_116 = arith.constant 0 : index
      %75 = vector.load %arg18[%74, %c0_116] : memref<1152x128xf32, #tpu.memory_space<vmem>>, vector<16x128xf32>
      tpu.vector_store %arg18[%74, %c0_116], %72 {strides = array<i32>} : memref<1152x128xf32, #tpu.memory_space<vmem>>, vector<16x128xf32>,
      %c2 = arith.constant 2 : index
      %76 = memref.load %arg7[%c2] : memref<12xf32, #tpu.memory_space<smem>>
      %77 = vector.broadcast %76 : f32 to vector<16x128xf32>
      %78 = arith.addf %59#2, %77 : vector<16x128xf32>
      %cst_117 = arith.constant 0.000000e+00 : f32
      %79 = vector.broadcast %cst_117 : f32 to vector<16x128xf32>
      %80 = arith.maximumf %78, %79 : vector<16x128xf32>
      %c192_i32 = arith.constant 192 : i32
      %81 = arith.addi %c192_i32, %45 : i32
      %82 = arith.index_cast %81 : i32 to index
      %c0_118 = arith.constant 0 : index
      %83 = vector.load %arg18[%82, %c0_118] : memref<1152x128xf32, #tpu.memory_space<vmem>>, vector<16x128xf32>
      tpu.vector_store %arg18[%82, %c0_118], %80 {strides = array<i32>} : memref<1152x128xf32, #tpu.memory_space<vmem>>, vector<16x128xf32>,
      %c3 = arith.constant 3 : index
      %84 = memref.load %arg7[%c3] : memref<12xf32, #tpu.memory_space<smem>>
      %85 = vector.broadcast %84 : f32 to vector<16x128xf32>
      %86 = arith.addf %59#3, %85 : vector<16x128xf32>
      %cst_119 = arith.constant 0.000000e+00 : f32
      %87 = vector.broadcast %cst_119 : f32 to vector<16x128xf32>
      %88 = arith.maximumf %86, %87 : vector<16x128xf32>
      %c288_i32 = arith.constant 288 : i32
      %89 = arith.addi %c288_i32, %45 : i32
      %90 = arith.index_cast %89 : i32 to index
      %c0_120 = arith.constant 0 : index
      %91 = vector.load %arg18[%90, %c0_120] : memref<1152x128xf32, #tpu.memory_space<vmem>>, vector<16x128xf32>
      tpu.vector_store %arg18[%90, %c0_120], %88 {strides = array<i32>} : memref<1152x128xf32, #tpu.memory_space<vmem>>, vector<16x128xf32>,
      %c4 = arith.constant 4 : index
      %92 = memref.load %arg7[%c4] : memref<12xf32, #tpu.memory_space<smem>>
      %93 = vector.broadcast %92 : f32 to vector<16x128xf32>
      %94 = arith.addf %59#4, %93 : vector<16x128xf32>
      %cst_121 = arith.constant 0.000000e+00 : f32
      %95 = vector.broadcast %cst_121 : f32 to vector<16x128xf32>
      %96 = arith.maximumf %94, %95 : vector<16x128xf32>
      %c384_i32 = arith.constant 384 : i32
      %97 = arith.addi %c384_i32, %45 : i32
      %98 = arith.index_cast %97 : i32 to index
      %c0_122 = arith.constant 0 : index
      %99 = vector.load %arg18[%98, %c0_122] : memref<1152x128xf32, #tpu.memory_space<vmem>>, vector<16x128xf32>
      tpu.vector_store %arg18[%98, %c0_122], %96 {strides = array<i32>} : memref<1152x128xf32, #tpu.memory_space<vmem>>, vector<16x128xf32>,
      %c5 = arith.constant 5 : index
      %100 = memref.load %arg7[%c5] : memref<12xf32, #tpu.memory_space<smem>>
      %101 = vector.broadcast %100 : f32 to vector<16x128xf32>
      %102 = arith.addf %59#5, %101 : vector<16x128xf32>
      %cst_123 = arith.constant 0.000000e+00 : f32
      %103 = vector.broadcast %cst_123 : f32 to vector<16x128xf32>
      %104 = arith.maximumf %102, %103 : vector<16x128xf32>
      %c480_i32 = arith.constant 480 : i32
      %105 = arith.addi %c480_i32, %45 : i32
      %106 = arith.index_cast %105 : i32 to index
      %c0_124 = arith.constant 0 : index
      %107 = vector.load %arg18[%106, %c0_124] : memref<1152x128xf32, #tpu.memory_space<vmem>>, vector<16x128xf32>
      tpu.vector_store %arg18[%106, %c0_124], %104 {strides = array<i32>} : memref<1152x128xf32, #tpu.memory_space<vmem>>, vector<16x128xf32>,
      %c6 = arith.constant 6 : index
      %108 = memref.load %arg7[%c6] : memref<12xf32, #tpu.memory_space<smem>>
      %109 = vector.broadcast %108 : f32 to vector<16x128xf32>
      %110 = arith.addf %59#6, %109 : vector<16x128xf32>
      %cst_125 = arith.constant 0.000000e+00 : f32
      %111 = vector.broadcast %cst_125 : f32 to vector<16x128xf32>
      %112 = arith.maximumf %110, %111 : vector<16x128xf32>
      %c576_i32 = arith.constant 576 : i32
      %113 = arith.addi %c576_i32, %45 : i32
      %114 = arith.index_cast %113 : i32 to index
      %c0_126 = arith.constant 0 : index
      %115 = vector.load %arg18[%114, %c0_126] : memref<1152x128xf32, #tpu.memory_space<vmem>>, vector<16x128xf32>
      tpu.vector_store %arg18[%114, %c0_126], %112 {strides = array<i32>} : memref<1152x128xf32, #tpu.memory_space<vmem>>, vector<16x128xf32>,
      %c7 = arith.constant 7 : index
      %116 = memref.load %arg7[%c7] : memref<12xf32, #tpu.memory_space<smem>>
      %117 = vector.broadcast %116 : f32 to vector<16x128xf32>
      %118 = arith.addf %59#7, %117 : vector<16x128xf32>
      %cst_127 = arith.constant 0.000000e+00 : f32
      %119 = vector.broadcast %cst_127 : f32 to vector<16x128xf32>
      %120 = arith.maximumf %118, %119 : vector<16x128xf32>
      %c672_i32 = arith.constant 672 : i32
      %121 = arith.addi %c672_i32, %45 : i32
      %122 = arith.index_cast %121 : i32 to index
      %c0_128 = arith.constant 0 : index
      %123 = vector.load %arg18[%122, %c0_128] : memref<1152x128xf32, #tpu.memory_space<vmem>>, vector<16x128xf32>
      tpu.vector_store %arg18[%122, %c0_128], %120 {strides = array<i32>} : memref<1152x128xf32, #tpu.memory_space<vmem>>, vector<16x128xf32>,
      %c8 = arith.constant 8 : index
      %124 = memref.load %arg7[%c8] : memref<12xf32, #tpu.memory_space<smem>>
      %125 = vector.broadcast %124 : f32 to vector<16x128xf32>
      %126 = arith.addf %59#8, %125 : vector<16x128xf32>
      %cst_129 = arith.constant 0.000000e+00 : f32
      %127 = vector.broadcast %cst_129 : f32 to vector<16x128xf32>
      %128 = arith.maximumf %126, %127 : vector<16x128xf32>
      %c768_i32 = arith.constant 768 : i32
      %129 = arith.addi %c768_i32, %45 : i32
      %130 = arith.index_cast %129 : i32 to index
      %c0_130 = arith.constant 0 : index
      %131 = vector.load %arg18[%130, %c0_130] : memref<1152x128xf32, #tpu.memory_space<vmem>>, vector<16x128xf32>
      tpu.vector_store %arg18[%130, %c0_130], %128 {strides = array<i32>} : memref<1152x128xf32, #tpu.memory_space<vmem>>, vector<16x128xf32>,
      %c9 = arith.constant 9 : index
      %132 = memref.load %arg7[%c9] : memref<12xf32, #tpu.memory_space<smem>>
      %133 = vector.broadcast %132 : f32 to vector<16x128xf32>
      %134 = arith.addf %59#9, %133 : vector<16x128xf32>
      %cst_131 = arith.constant 0.000000e+00 : f32
      %135 = vector.broadcast %cst_131 : f32 to vector<16x128xf32>
      %136 = arith.maximumf %134, %135 : vector<16x128xf32>
      %c864_i32 = arith.constant 864 : i32
      %137 = arith.addi %c864_i32, %45 : i32
      %138 = arith.index_cast %137 : i32 to index
      %c0_132 = arith.constant 0 : index
      %139 = vector.load %arg18[%138, %c0_132] : memref<1152x128xf32, #tpu.memory_space<vmem>>, vector<16x128xf32>
      tpu.vector_store %arg18[%138, %c0_132], %136 {strides = array<i32>} : memref<1152x128xf32, #tpu.memory_space<vmem>>, vector<16x128xf32>,
      %c10 = arith.constant 10 : index
      %140 = memref.load %arg7[%c10] : memref<12xf32, #tpu.memory_space<smem>>
      %141 = vector.broadcast %140 : f32 to vector<16x128xf32>
      %142 = arith.addf %59#10, %141 : vector<16x128xf32>
      %cst_133 = arith.constant 0.000000e+00 : f32
      %143 = vector.broadcast %cst_133 : f32 to vector<16x128xf32>
      %144 = arith.maximumf %142, %143 : vector<16x128xf32>
      %c960_i32 = arith.constant 960 : i32
      %145 = arith.addi %c960_i32, %45 : i32
      %146 = arith.index_cast %145 : i32 to index
      %c0_134 = arith.constant 0 : index
      %147 = vector.load %arg18[%146, %c0_134] : memref<1152x128xf32, #tpu.memory_space<vmem>>, vector<16x128xf32>
      tpu.vector_store %arg18[%146, %c0_134], %144 {strides = array<i32>} : memref<1152x128xf32, #tpu.memory_space<vmem>>, vector<16x128xf32>,
      %c11 = arith.constant 11 : index
      %148 = memref.load %arg7[%c11] : memref<12xf32, #tpu.memory_space<smem>>
      %149 = vector.broadcast %148 : f32 to vector<16x128xf32>
      %150 = arith.addf %59#11, %149 : vector<16x128xf32>
      %cst_135 = arith.constant 0.000000e+00 : f32
      %151 = vector.broadcast %cst_135 : f32 to vector<16x128xf32>
      %152 = arith.maximumf %150, %151 : vector<16x128xf32>
      %c1056_i32 = arith.constant 1056 : i32
      %153 = arith.addi %c1056_i32, %45 : i32
      %154 = arith.index_cast %153 : i32 to index
      %c0_136 = arith.constant 0 : index
      %155 = vector.load %arg18[%154, %c0_136] : memref<1152x128xf32, #tpu.memory_space<vmem>>, vector<16x128xf32>
      tpu.vector_store %arg18[%154, %c0_136], %152 {strides = array<i32>} : memref<1152x128xf32, #tpu.memory_space<vmem>>, vector<16x128xf32>,
    }
    %c6_i32_26 = arith.constant 6 : i32
    %c0_i32_27 = arith.constant 0 : i32
    %c4_i32 = arith.constant 4 : i32
    %10 = arith.addi %c0_i32_27, %c4_i32 : i32
    %c1_i32_28 = arith.constant 1 : i32
    scf.for %arg20 = %c0_i32_27 to %10 step %c1_i32_28  : i32 {
      %c2_i32 = arith.constant 2 : i32
      %45 = arith.muli %c2_i32, %arg20 : i32
      %c12_i32_96 = arith.constant 12 : i32
      %46 = arith.muli %45, %c12_i32_96 : i32
      %c0_i32_97 = arith.constant 0 : i32
      %47 = arith.addi %c0_i32_97, %46 : i32
      %48 = arith.index_cast %47 : i32 to index
      %c0_98 = arith.constant 0 : index
      %49 = vector.load %arg18[%48, %c0_98] : memref<1152x128xf32, #tpu.memory_space<vmem>>, vector<8x128xf32>
      %c2_i32_99 = arith.constant 2 : i32
      %50 = arith.muli %c2_i32_99, %arg20 : i32
      %c1_i32_100 = arith.constant 1 : i32
      %51 = arith.addi %50, %c1_i32_100 : i32
      %c12_i32_101 = arith.constant 12 : i32
      %52 = arith.muli %51, %c12_i32_101 : i32
      %c0_i32_102 = arith.constant 0 : i32
      %53 = arith.addi %c0_i32_102, %52 : i32
      %54 = arith.index_cast %53 : i32 to index
      %c0_103 = arith.constant 0 : index
      %55 = vector.load %arg18[%54, %c0_103] : memref<1152x128xf32, #tpu.memory_space<vmem>>, vector<8x128xf32>
      %56 = arith.maximumf %49, %55 : vector<8x128xf32>
      %57 = vector.extract_strided_slice %56 {offsets = [0, 0], sizes = [1, 128], strides = [1, 1]} : vector<8x128xf32> to vector<1x128xf32>
      %58 = vector.extract_strided_slice %56 {offsets = [1, 0], sizes = [1, 128], strides = [1, 1]} : vector<8x128xf32> to vector<1x128xf32>
      %59 = arith.maximumf %57, %58 : vector<1x128xf32>
      %c4_i32_104 = arith.constant 4 : i32
      %60 = arith.muli %arg20, %c4_i32_104 : i32
      %c0_i32_105 = arith.constant 0 : i32
      %61 = arith.addi %c0_i32_105, %60 : i32
      %c0_i32_106 = arith.constant 0 : i32
      %62 = arith.addi %61, %c0_i32_106 : i32
      %63 = arith.index_cast %62 : i32 to index
      %c0_107 = arith.constant 0 : index
      %64 = vector.load %arg19[%63, %c0_107] : memref<192x128xf32, #tpu.memory_space<vmem>>, vector<1x128xf32>
      tpu.vector_store %arg19[%63, %c0_107], %59 {strides = array<i32>} : memref<192x128xf32, #tpu.memory_space<vmem>>, vector<1x128xf32>,
      %65 = vector.extract_strided_slice %56 {offsets = [2, 0], sizes = [1, 128], strides = [1, 1]} : vector<8x128xf32> to vector<1x128xf32>
      %66 = vector.extract_strided_slice %56 {offsets = [3, 0], sizes = [1, 128], strides = [1, 1]} : vector<8x128xf32> to vector<1x128xf32>
      %67 = arith.maximumf %65, %66 : vector<1x128xf32>
      %c4_i32_108 = arith.constant 4 : i32
      %68 = arith.muli %arg20, %c4_i32_108 : i32
      %c0_i32_109 = arith.constant 0 : i32
      %69 = arith.addi %c0_i32_109, %68 : i32
      %c1_i32_110 = arith.constant 1 : i32
      %70 = arith.addi %69, %c1_i32_110 : i32
      %71 = arith.index_cast %70 : i32 to index
      %c0_111 = arith.constant 0 : index
      %72 = vector.load %arg19[%71, %c0_111] : memref<192x128xf32, #tpu.memory_space<vmem>>, vector<1x128xf32>
      tpu.vector_store %arg19[%71, %c0_111], %67 {strides = array<i32>} : memref<192x128xf32, #tpu.memory_space<vmem>>, vector<1x128xf32>,
      %73 = vector.extract_strided_slice %56 {offsets = [4, 0], sizes = [1, 128], strides = [1, 1]} : vector<8x128xf32> to vector<1x128xf32>
      %74 = vector.extract_strided_slice %56 {offsets = [5, 0], sizes = [1, 128], strides = [1, 1]} : vector<8x128xf32> to vector<1x128xf32>
      %75 = arith.maximumf %73, %74 : vector<1x128xf32>
      %c4_i32_112 = arith.constant 4 : i32
      %76 = arith.muli %arg20, %c4_i32_112 : i32
      %c0_i32_113 = arith.constant 0 : i32
      %77 = arith.addi %c0_i32_113, %76 : i32
      %c2_i32_114 = arith.constant 2 : i32
      %78 = arith.addi %77, %c2_i32_114 : i32
      %79 = arith.index_cast %78 : i32 to index
      %c0_115 = arith.constant 0 : index
      %80 = vector.load %arg19[%79, %c0_115] : memref<192x128xf32, #tpu.memory_space<vmem>>, vector<1x128xf32>
      tpu.vector_store %arg19[%79, %c0_115], %75 {strides = array<i32>} : memref<192x128xf32, #tpu.memory_space<vmem>>, vector<1x128xf32>,
      %81 = vector.extract_strided_slice %56 {offsets = [6, 0], sizes = [1, 128], strides = [1, 1]} : vector<8x128xf32> to vector<1x128xf32>
      %82 = vector.extract_strided_slice %56 {offsets = [7, 0], sizes = [1, 128], strides = [1, 1]} : vector<8x128xf32> to vector<1x128xf32>
      %83 = arith.maximumf %81, %82 : vector<1x128xf32>
      %c4_i32_116 = arith.constant 4 : i32
      %84 = arith.muli %arg20, %c4_i32_116 : i32
      %c0_i32_117 = arith.constant 0 : i32
      %85 = arith.addi %c0_i32_117, %84 : i32
      %c3_i32 = arith.constant 3 : i32
      %86 = arith.addi %85, %c3_i32 : i32
      %87 = arith.index_cast %86 : i32 to index
      %c0_118 = arith.constant 0 : index
      %88 = vector.load %arg19[%87, %c0_118] : memref<192x128xf32, #tpu.memory_space<vmem>>, vector<1x128xf32>
      tpu.vector_store %arg19[%87, %c0_118], %83 {strides = array<i32>} : memref<192x128xf32, #tpu.memory_space<vmem>>, vector<1x128xf32>,
    }
    %c4_i32_29 = arith.constant 4 : i32
    %c0_i32_30 = arith.constant 0 : i32
    %c4_i32_31 = arith.constant 4 : i32
    %11 = arith.addi %c0_i32_30, %c4_i32_31 : i32
    %c1_i32_32 = arith.constant 1 : i32
    scf.for %arg20 = %c0_i32_30 to %11 step %c1_i32_32  : i32 {
      %c2_i32 = arith.constant 2 : i32
      %45 = arith.muli %c2_i32, %arg20 : i32
      %c12_i32_96 = arith.constant 12 : i32
      %46 = arith.muli %45, %c12_i32_96 : i32
      %c96_i32 = arith.constant 96 : i32
      %47 = arith.addi %c96_i32, %46 : i32
      %48 = arith.index_cast %47 : i32 to index
      %c0_97 = arith.constant 0 : index
      %49 = vector.load %arg18[%48, %c0_97] : memref<1152x128xf32, #tpu.memory_space<vmem>>, vector<8x128xf32>
      %c2_i32_98 = arith.constant 2 : i32
      %50 = arith.muli %c2_i32_98, %arg20 : i32
      %c1_i32_99 = arith.constant 1 : i32
      %51 = arith.addi %50, %c1_i32_99 : i32
      %c12_i32_100 = arith.constant 12 : i32
      %52 = arith.muli %51, %c12_i32_100 : i32
      %c96_i32_101 = arith.constant 96 : i32
      %53 = arith.addi %c96_i32_101, %52 : i32
      %54 = arith.index_cast %53 : i32 to index
      %c0_102 = arith.constant 0 : index
      %55 = vector.load %arg18[%54, %c0_102] : memref<1152x128xf32, #tpu.memory_space<vmem>>, vector<8x128xf32>
      %56 = arith.maximumf %49, %55 : vector<8x128xf32>
      %57 = vector.extract_strided_slice %56 {offsets = [0, 0], sizes = [1, 128], strides = [1, 1]} : vector<8x128xf32> to vector<1x128xf32>
      %58 = vector.extract_strided_slice %56 {offsets = [1, 0], sizes = [1, 128], strides = [1, 1]} : vector<8x128xf32> to vector<1x128xf32>
      %59 = arith.maximumf %57, %58 : vector<1x128xf32>
      %c4_i32_103 = arith.constant 4 : i32
      %60 = arith.muli %arg20, %c4_i32_103 : i32
      %c16_i32 = arith.constant 16 : i32
      %61 = arith.addi %c16_i32, %60 : i32
      %c0_i32_104 = arith.constant 0 : i32
      %62 = arith.addi %61, %c0_i32_104 : i32
      %63 = arith.index_cast %62 : i32 to index
      %c0_105 = arith.constant 0 : index
      %64 = vector.load %arg19[%63, %c0_105] : memref<192x128xf32, #tpu.memory_space<vmem>>, vector<1x128xf32>
      tpu.vector_store %arg19[%63, %c0_105], %59 {strides = array<i32>} : memref<192x128xf32, #tpu.memory_space<vmem>>, vector<1x128xf32>,
      %65 = vector.extract_strided_slice %56 {offsets = [2, 0], sizes = [1, 128], strides = [1, 1]} : vector<8x128xf32> to vector<1x128xf32>
      %66 = vector.extract_strided_slice %56 {offsets = [3, 0], sizes = [1, 128], strides = [1, 1]} : vector<8x128xf32> to vector<1x128xf32>
      %67 = arith.maximumf %65, %66 : vector<1x128xf32>
      %c4_i32_106 = arith.constant 4 : i32
      %68 = arith.muli %arg20, %c4_i32_106 : i32
      %c16_i32_107 = arith.constant 16 : i32
      %69 = arith.addi %c16_i32_107, %68 : i32
      %c1_i32_108 = arith.constant 1 : i32
      %70 = arith.addi %69, %c1_i32_108 : i32
      %71 = arith.index_cast %70 : i32 to index
      %c0_109 = arith.constant 0 : index
      %72 = vector.load %arg19[%71, %c0_109] : memref<192x128xf32, #tpu.memory_space<vmem>>, vector<1x128xf32>
      tpu.vector_store %arg19[%71, %c0_109], %67 {strides = array<i32>} : memref<192x128xf32, #tpu.memory_space<vmem>>, vector<1x128xf32>,
      %73 = vector.extract_strided_slice %56 {offsets = [4, 0], sizes = [1, 128], strides = [1, 1]} : vector<8x128xf32> to vector<1x128xf32>
      %74 = vector.extract_strided_slice %56 {offsets = [5, 0], sizes = [1, 128], strides = [1, 1]} : vector<8x128xf32> to vector<1x128xf32>
      %75 = arith.maximumf %73, %74 : vector<1x128xf32>
      %c4_i32_110 = arith.constant 4 : i32
      %76 = arith.muli %arg20, %c4_i32_110 : i32
      %c16_i32_111 = arith.constant 16 : i32
      %77 = arith.addi %c16_i32_111, %76 : i32
      %c2_i32_112 = arith.constant 2 : i32
      %78 = arith.addi %77, %c2_i32_112 : i32
      %79 = arith.index_cast %78 : i32 to index
      %c0_113 = arith.constant 0 : index
      %80 = vector.load %arg19[%79, %c0_113] : memref<192x128xf32, #tpu.memory_space<vmem>>, vector<1x128xf32>
      tpu.vector_store %arg19[%79, %c0_113], %75 {strides = array<i32>} : memref<192x128xf32, #tpu.memory_space<vmem>>, vector<1x128xf32>,
      %81 = vector.extract_strided_slice %56 {offsets = [6, 0], sizes = [1, 128], strides = [1, 1]} : vector<8x128xf32> to vector<1x128xf32>
      %82 = vector.extract_strided_slice %56 {offsets = [7, 0], sizes = [1, 128], strides = [1, 1]} : vector<8x128xf32> to vector<1x128xf32>
      %83 = arith.maximumf %81, %82 : vector<1x128xf32>
      %c4_i32_114 = arith.constant 4 : i32
      %84 = arith.muli %arg20, %c4_i32_114 : i32
      %c16_i32_115 = arith.constant 16 : i32
      %85 = arith.addi %c16_i32_115, %84 : i32
      %c3_i32 = arith.constant 3 : i32
      %86 = arith.addi %85, %c3_i32 : i32
      %87 = arith.index_cast %86 : i32 to index
      %c0_116 = arith.constant 0 : index
      %88 = vector.load %arg19[%87, %c0_116] : memref<192x128xf32, #tpu.memory_space<vmem>>, vector<1x128xf32>
      tpu.vector_store %arg19[%87, %c0_116], %83 {strides = array<i32>} : memref<192x128xf32, #tpu.memory_space<vmem>>, vector<1x128xf32>,
    }
    %c4_i32_33 = arith.constant 4 : i32
    %c0_i32_34 = arith.constant 0 : i32
    %c4_i32_35 = arith.constant 4 : i32
    %12 = arith.addi %c0_i32_34, %c4_i32_35 : i32
    %c1_i32_36 = arith.constant 1 : i32
    scf.for %arg20 = %c0_i32_34 to %12 step %c1_i32_36  : i32 {
      %c2_i32 = arith.constant 2 : i32
      %45 = arith.muli %c2_i32, %arg20 : i32
      %c12_i32_96 = arith.constant 12 : i32
      %46 = arith.muli %45, %c12_i32_96 : i32
      %c192_i32 = arith.constant 192 : i32
      %47 = arith.addi %c192_i32, %46 : i32
      %48 = arith.index_cast %47 : i32 to index
      %c0_97 = arith.constant 0 : index
      %49 = vector.load %arg18[%48, %c0_97] : memref<1152x128xf32, #tpu.memory_space<vmem>>, vector<8x128xf32>
      %c2_i32_98 = arith.constant 2 : i32
      %50 = arith.muli %c2_i32_98, %arg20 : i32
      %c1_i32_99 = arith.constant 1 : i32
      %51 = arith.addi %50, %c1_i32_99 : i32
      %c12_i32_100 = arith.constant 12 : i32
      %52 = arith.muli %51, %c12_i32_100 : i32
      %c192_i32_101 = arith.constant 192 : i32
      %53 = arith.addi %c192_i32_101, %52 : i32
      %54 = arith.index_cast %53 : i32 to index
      %c0_102 = arith.constant 0 : index
      %55 = vector.load %arg18[%54, %c0_102] : memref<1152x128xf32, #tpu.memory_space<vmem>>, vector<8x128xf32>
      %56 = arith.maximumf %49, %55 : vector<8x128xf32>
      %57 = vector.extract_strided_slice %56 {offsets = [0, 0], sizes = [1, 128], strides = [1, 1]} : vector<8x128xf32> to vector<1x128xf32>
      %58 = vector.extract_strided_slice %56 {offsets = [1, 0], sizes = [1, 128], strides = [1, 1]} : vector<8x128xf32> to vector<1x128xf32>
      %59 = arith.maximumf %57, %58 : vector<1x128xf32>
      %c4_i32_103 = arith.constant 4 : i32
      %60 = arith.muli %arg20, %c4_i32_103 : i32
      %c32_i32 = arith.constant 32 : i32
      %61 = arith.addi %c32_i32, %60 : i32
      %c0_i32_104 = arith.constant 0 : i32
      %62 = arith.addi %61, %c0_i32_104 : i32
      %63 = arith.index_cast %62 : i32 to index
      %c0_105 = arith.constant 0 : index
      %64 = vector.load %arg19[%63, %c0_105] : memref<192x128xf32, #tpu.memory_space<vmem>>, vector<1x128xf32>
      tpu.vector_store %arg19[%63, %c0_105], %59 {strides = array<i32>} : memref<192x128xf32, #tpu.memory_space<vmem>>, vector<1x128xf32>,
      %65 = vector.extract_strided_slice %56 {offsets = [2, 0], sizes = [1, 128], strides = [1, 1]} : vector<8x128xf32> to vector<1x128xf32>
      %66 = vector.extract_strided_slice %56 {offsets = [3, 0], sizes = [1, 128], strides = [1, 1]} : vector<8x128xf32> to vector<1x128xf32>
      %67 = arith.maximumf %65, %66 : vector<1x128xf32>
      %c4_i32_106 = arith.constant 4 : i32
      %68 = arith.muli %arg20, %c4_i32_106 : i32
      %c32_i32_107 = arith.constant 32 : i32
      %69 = arith.addi %c32_i32_107, %68 : i32
      %c1_i32_108 = arith.constant 1 : i32
      %70 = arith.addi %69, %c1_i32_108 : i32
      %71 = arith.index_cast %70 : i32 to index
      %c0_109 = arith.constant 0 : index
      %72 = vector.load %arg19[%71, %c0_109] : memref<192x128xf32, #tpu.memory_space<vmem>>, vector<1x128xf32>
      tpu.vector_store %arg19[%71, %c0_109], %67 {strides = array<i32>} : memref<192x128xf32, #tpu.memory_space<vmem>>, vector<1x128xf32>,
      %73 = vector.extract_strided_slice %56 {offsets = [4, 0], sizes = [1, 128], strides = [1, 1]} : vector<8x128xf32> to vector<1x128xf32>
      %74 = vector.extract_strided_slice %56 {offsets = [5, 0], sizes = [1, 128], strides = [1, 1]} : vector<8x128xf32> to vector<1x128xf32>
      %75 = arith.maximumf %73, %74 : vector<1x128xf32>
      %c4_i32_110 = arith.constant 4 : i32
      %76 = arith.muli %arg20, %c4_i32_110 : i32
      %c32_i32_111 = arith.constant 32 : i32
      %77 = arith.addi %c32_i32_111, %76 : i32
      %c2_i32_112 = arith.constant 2 : i32
      %78 = arith.addi %77, %c2_i32_112 : i32
      %79 = arith.index_cast %78 : i32 to index
      %c0_113 = arith.constant 0 : index
      %80 = vector.load %arg19[%79, %c0_113] : memref<192x128xf32, #tpu.memory_space<vmem>>, vector<1x128xf32>
      tpu.vector_store %arg19[%79, %c0_113], %75 {strides = array<i32>} : memref<192x128xf32, #tpu.memory_space<vmem>>, vector<1x128xf32>,
      %81 = vector.extract_strided_slice %56 {offsets = [6, 0], sizes = [1, 128], strides = [1, 1]} : vector<8x128xf32> to vector<1x128xf32>
      %82 = vector.extract_strided_slice %56 {offsets = [7, 0], sizes = [1, 128], strides = [1, 1]} : vector<8x128xf32> to vector<1x128xf32>
      %83 = arith.maximumf %81, %82 : vector<1x128xf32>
      %c4_i32_114 = arith.constant 4 : i32
      %84 = arith.muli %arg20, %c4_i32_114 : i32
      %c32_i32_115 = arith.constant 32 : i32
      %85 = arith.addi %c32_i32_115, %84 : i32
      %c3_i32 = arith.constant 3 : i32
      %86 = arith.addi %85, %c3_i32 : i32
      %87 = arith.index_cast %86 : i32 to index
      %c0_116 = arith.constant 0 : index
      %88 = vector.load %arg19[%87, %c0_116] : memref<192x128xf32, #tpu.memory_space<vmem>>, vector<1x128xf32>
      tpu.vector_store %arg19[%87, %c0_116], %83 {strides = array<i32>} : memref<192x128xf32, #tpu.memory_space<vmem>>, vector<1x128xf32>,
    }
    %c4_i32_37 = arith.constant 4 : i32
    %c0_i32_38 = arith.constant 0 : i32
    %c4_i32_39 = arith.constant 4 : i32
    %13 = arith.addi %c0_i32_38, %c4_i32_39 : i32
    %c1_i32_40 = arith.constant 1 : i32
    scf.for %arg20 = %c0_i32_38 to %13 step %c1_i32_40  : i32 {
      %c2_i32 = arith.constant 2 : i32
      %45 = arith.muli %c2_i32, %arg20 : i32
      %c12_i32_96 = arith.constant 12 : i32
      %46 = arith.muli %45, %c12_i32_96 : i32
      %c288_i32 = arith.constant 288 : i32
      %47 = arith.addi %c288_i32, %46 : i32
      %48 = arith.index_cast %47 : i32 to index
      %c0_97 = arith.constant 0 : index
      %49 = vector.load %arg18[%48, %c0_97] : memref<1152x128xf32, #tpu.memory_space<vmem>>, vector<8x128xf32>
      %c2_i32_98 = arith.constant 2 : i32
      %50 = arith.muli %c2_i32_98, %arg20 : i32
      %c1_i32_99 = arith.constant 1 : i32
      %51 = arith.addi %50, %c1_i32_99 : i32
      %c12_i32_100 = arith.constant 12 : i32
      %52 = arith.muli %51, %c12_i32_100 : i32
      %c288_i32_101 = arith.constant 288 : i32
      %53 = arith.addi %c288_i32_101, %52 : i32
      %54 = arith.index_cast %53 : i32 to index
      %c0_102 = arith.constant 0 : index
      %55 = vector.load %arg18[%54, %c0_102] : memref<1152x128xf32, #tpu.memory_space<vmem>>, vector<8x128xf32>
      %56 = arith.maximumf %49, %55 : vector<8x128xf32>
      %57 = vector.extract_strided_slice %56 {offsets = [0, 0], sizes = [1, 128], strides = [1, 1]} : vector<8x128xf32> to vector<1x128xf32>
      %58 = vector.extract_strided_slice %56 {offsets = [1, 0], sizes = [1, 128], strides = [1, 1]} : vector<8x128xf32> to vector<1x128xf32>
      %59 = arith.maximumf %57, %58 : vector<1x128xf32>
      %c4_i32_103 = arith.constant 4 : i32
      %60 = arith.muli %arg20, %c4_i32_103 : i32
      %c48_i32 = arith.constant 48 : i32
      %61 = arith.addi %c48_i32, %60 : i32
      %c0_i32_104 = arith.constant 0 : i32
      %62 = arith.addi %61, %c0_i32_104 : i32
      %63 = arith.index_cast %62 : i32 to index
      %c0_105 = arith.constant 0 : index
      %64 = vector.load %arg19[%63, %c0_105] : memref<192x128xf32, #tpu.memory_space<vmem>>, vector<1x128xf32>
      tpu.vector_store %arg19[%63, %c0_105], %59 {strides = array<i32>} : memref<192x128xf32, #tpu.memory_space<vmem>>, vector<1x128xf32>,
      %65 = vector.extract_strided_slice %56 {offsets = [2, 0], sizes = [1, 128], strides = [1, 1]} : vector<8x128xf32> to vector<1x128xf32>
      %66 = vector.extract_strided_slice %56 {offsets = [3, 0], sizes = [1, 128], strides = [1, 1]} : vector<8x128xf32> to vector<1x128xf32>
      %67 = arith.maximumf %65, %66 : vector<1x128xf32>
      %c4_i32_106 = arith.constant 4 : i32
      %68 = arith.muli %arg20, %c4_i32_106 : i32
      %c48_i32_107 = arith.constant 48 : i32
      %69 = arith.addi %c48_i32_107, %68 : i32
      %c1_i32_108 = arith.constant 1 : i32
      %70 = arith.addi %69, %c1_i32_108 : i32
      %71 = arith.index_cast %70 : i32 to index
      %c0_109 = arith.constant 0 : index
      %72 = vector.load %arg19[%71, %c0_109] : memref<192x128xf32, #tpu.memory_space<vmem>>, vector<1x128xf32>
      tpu.vector_store %arg19[%71, %c0_109], %67 {strides = array<i32>} : memref<192x128xf32, #tpu.memory_space<vmem>>, vector<1x128xf32>,
      %73 = vector.extract_strided_slice %56 {offsets = [4, 0], sizes = [1, 128], strides = [1, 1]} : vector<8x128xf32> to vector<1x128xf32>
      %74 = vector.extract_strided_slice %56 {offsets = [5, 0], sizes = [1, 128], strides = [1, 1]} : vector<8x128xf32> to vector<1x128xf32>
      %75 = arith.maximumf %73, %74 : vector<1x128xf32>
      %c4_i32_110 = arith.constant 4 : i32
      %76 = arith.muli %arg20, %c4_i32_110 : i32
      %c48_i32_111 = arith.constant 48 : i32
      %77 = arith.addi %c48_i32_111, %76 : i32
      %c2_i32_112 = arith.constant 2 : i32
      %78 = arith.addi %77, %c2_i32_112 : i32
      %79 = arith.index_cast %78 : i32 to index
      %c0_113 = arith.constant 0 : index
      %80 = vector.load %arg19[%79, %c0_113] : memref<192x128xf32, #tpu.memory_space<vmem>>, vector<1x128xf32>
      tpu.vector_store %arg19[%79, %c0_113], %75 {strides = array<i32>} : memref<192x128xf32, #tpu.memory_space<vmem>>, vector<1x128xf32>,
      %81 = vector.extract_strided_slice %56 {offsets = [6, 0], sizes = [1, 128], strides = [1, 1]} : vector<8x128xf32> to vector<1x128xf32>
      %82 = vector.extract_strided_slice %56 {offsets = [7, 0], sizes = [1, 128], strides = [1, 1]} : vector<8x128xf32> to vector<1x128xf32>
      %83 = arith.maximumf %81, %82 : vector<1x128xf32>
      %c4_i32_114 = arith.constant 4 : i32
      %84 = arith.muli %arg20, %c4_i32_114 : i32
      %c48_i32_115 = arith.constant 48 : i32
      %85 = arith.addi %c48_i32_115, %84 : i32
      %c3_i32 = arith.constant 3 : i32
      %86 = arith.addi %85, %c3_i32 : i32
      %87 = arith.index_cast %86 : i32 to index
      %c0_116 = arith.constant 0 : index
      %88 = vector.load %arg19[%87, %c0_116] : memref<192x128xf32, #tpu.memory_space<vmem>>, vector<1x128xf32>
      tpu.vector_store %arg19[%87, %c0_116], %83 {strides = array<i32>} : memref<192x128xf32, #tpu.memory_space<vmem>>, vector<1x128xf32>,
    }
    %c4_i32_41 = arith.constant 4 : i32
    %c0_i32_42 = arith.constant 0 : i32
    %c4_i32_43 = arith.constant 4 : i32
    %14 = arith.addi %c0_i32_42, %c4_i32_43 : i32
    %c1_i32_44 = arith.constant 1 : i32
    scf.for %arg20 = %c0_i32_42 to %14 step %c1_i32_44  : i32 {
      %c2_i32 = arith.constant 2 : i32
      %45 = arith.muli %c2_i32, %arg20 : i32
      %c12_i32_96 = arith.constant 12 : i32
      %46 = arith.muli %45, %c12_i32_96 : i32
      %c384_i32 = arith.constant 384 : i32
      %47 = arith.addi %c384_i32, %46 : i32
      %48 = arith.index_cast %47 : i32 to index
      %c0_97 = arith.constant 0 : index
      %49 = vector.load %arg18[%48, %c0_97] : memref<1152x128xf32, #tpu.memory_space<vmem>>, vector<8x128xf32>
      %c2_i32_98 = arith.constant 2 : i32
      %50 = arith.muli %c2_i32_98, %arg20 : i32
      %c1_i32_99 = arith.constant 1 : i32
      %51 = arith.addi %50, %c1_i32_99 : i32
      %c12_i32_100 = arith.constant 12 : i32
      %52 = arith.muli %51, %c12_i32_100 : i32
      %c384_i32_101 = arith.constant 384 : i32
      %53 = arith.addi %c384_i32_101, %52 : i32
      %54 = arith.index_cast %53 : i32 to index
      %c0_102 = arith.constant 0 : index
      %55 = vector.load %arg18[%54, %c0_102] : memref<1152x128xf32, #tpu.memory_space<vmem>>, vector<8x128xf32>
      %56 = arith.maximumf %49, %55 : vector<8x128xf32>
      %57 = vector.extract_strided_slice %56 {offsets = [0, 0], sizes = [1, 128], strides = [1, 1]} : vector<8x128xf32> to vector<1x128xf32>
      %58 = vector.extract_strided_slice %56 {offsets = [1, 0], sizes = [1, 128], strides = [1, 1]} : vector<8x128xf32> to vector<1x128xf32>
      %59 = arith.maximumf %57, %58 : vector<1x128xf32>
      %c4_i32_103 = arith.constant 4 : i32
      %60 = arith.muli %arg20, %c4_i32_103 : i32
      %c64_i32 = arith.constant 64 : i32
      %61 = arith.addi %c64_i32, %60 : i32
      %c0_i32_104 = arith.constant 0 : i32
      %62 = arith.addi %61, %c0_i32_104 : i32
      %63 = arith.index_cast %62 : i32 to index
      %c0_105 = arith.constant 0 : index
      %64 = vector.load %arg19[%63, %c0_105] : memref<192x128xf32, #tpu.memory_space<vmem>>, vector<1x128xf32>
      tpu.vector_store %arg19[%63, %c0_105], %59 {strides = array<i32>} : memref<192x128xf32, #tpu.memory_space<vmem>>, vector<1x128xf32>,
      %65 = vector.extract_strided_slice %56 {offsets = [2, 0], sizes = [1, 128], strides = [1, 1]} : vector<8x128xf32> to vector<1x128xf32>
      %66 = vector.extract_strided_slice %56 {offsets = [3, 0], sizes = [1, 128], strides = [1, 1]} : vector<8x128xf32> to vector<1x128xf32>
      %67 = arith.maximumf %65, %66 : vector<1x128xf32>
      %c4_i32_106 = arith.constant 4 : i32
      %68 = arith.muli %arg20, %c4_i32_106 : i32
      %c64_i32_107 = arith.constant 64 : i32
      %69 = arith.addi %c64_i32_107, %68 : i32
      %c1_i32_108 = arith.constant 1 : i32
      %70 = arith.addi %69, %c1_i32_108 : i32
      %71 = arith.index_cast %70 : i32 to index
      %c0_109 = arith.constant 0 : index
      %72 = vector.load %arg19[%71, %c0_109] : memref<192x128xf32, #tpu.memory_space<vmem>>, vector<1x128xf32>
      tpu.vector_store %arg19[%71, %c0_109], %67 {strides = array<i32>} : memref<192x128xf32, #tpu.memory_space<vmem>>, vector<1x128xf32>,
      %73 = vector.extract_strided_slice %56 {offsets = [4, 0], sizes = [1, 128], strides = [1, 1]} : vector<8x128xf32> to vector<1x128xf32>
      %74 = vector.extract_strided_slice %56 {offsets = [5, 0], sizes = [1, 128], strides = [1, 1]} : vector<8x128xf32> to vector<1x128xf32>
      %75 = arith.maximumf %73, %74 : vector<1x128xf32>
      %c4_i32_110 = arith.constant 4 : i32
      %76 = arith.muli %arg20, %c4_i32_110 : i32
      %c64_i32_111 = arith.constant 64 : i32
      %77 = arith.addi %c64_i32_111, %76 : i32
      %c2_i32_112 = arith.constant 2 : i32
      %78 = arith.addi %77, %c2_i32_112 : i32
      %79 = arith.index_cast %78 : i32 to index
      %c0_113 = arith.constant 0 : index
      %80 = vector.load %arg19[%79, %c0_113] : memref<192x128xf32, #tpu.memory_space<vmem>>, vector<1x128xf32>
      tpu.vector_store %arg19[%79, %c0_113], %75 {strides = array<i32>} : memref<192x128xf32, #tpu.memory_space<vmem>>, vector<1x128xf32>,
      %81 = vector.extract_strided_slice %56 {offsets = [6, 0], sizes = [1, 128], strides = [1, 1]} : vector<8x128xf32> to vector<1x128xf32>
      %82 = vector.extract_strided_slice %56 {offsets = [7, 0], sizes = [1, 128], strides = [1, 1]} : vector<8x128xf32> to vector<1x128xf32>
      %83 = arith.maximumf %81, %82 : vector<1x128xf32>
      %c4_i32_114 = arith.constant 4 : i32
      %84 = arith.muli %arg20, %c4_i32_114 : i32
      %c64_i32_115 = arith.constant 64 : i32
      %85 = arith.addi %c64_i32_115, %84 : i32
      %c3_i32 = arith.constant 3 : i32
      %86 = arith.addi %85, %c3_i32 : i32
      %87 = arith.index_cast %86 : i32 to index
      %c0_116 = arith.constant 0 : index
      %88 = vector.load %arg19[%87, %c0_116] : memref<192x128xf32, #tpu.memory_space<vmem>>, vector<1x128xf32>
      tpu.vector_store %arg19[%87, %c0_116], %83 {strides = array<i32>} : memref<192x128xf32, #tpu.memory_space<vmem>>, vector<1x128xf32>,
    }
    %c4_i32_45 = arith.constant 4 : i32
    %c0_i32_46 = arith.constant 0 : i32
    %c4_i32_47 = arith.constant 4 : i32
    %15 = arith.addi %c0_i32_46, %c4_i32_47 : i32
    %c1_i32_48 = arith.constant 1 : i32
    scf.for %arg20 = %c0_i32_46 to %15 step %c1_i32_48  : i32 {
      %c2_i32 = arith.constant 2 : i32
      %45 = arith.muli %c2_i32, %arg20 : i32
      %c12_i32_96 = arith.constant 12 : i32
      %46 = arith.muli %45, %c12_i32_96 : i32
      %c480_i32 = arith.constant 480 : i32
      %47 = arith.addi %c480_i32, %46 : i32
      %48 = arith.index_cast %47 : i32 to index
      %c0_97 = arith.constant 0 : index
      %49 = vector.load %arg18[%48, %c0_97] : memref<1152x128xf32, #tpu.memory_space<vmem>>, vector<8x128xf32>
      %c2_i32_98 = arith.constant 2 : i32
      %50 = arith.muli %c2_i32_98, %arg20 : i32
      %c1_i32_99 = arith.constant 1 : i32
      %51 = arith.addi %50, %c1_i32_99 : i32
      %c12_i32_100 = arith.constant 12 : i32
      %52 = arith.muli %51, %c12_i32_100 : i32
      %c480_i32_101 = arith.constant 480 : i32
      %53 = arith.addi %c480_i32_101, %52 : i32
      %54 = arith.index_cast %53 : i32 to index
      %c0_102 = arith.constant 0 : index
      %55 = vector.load %arg18[%54, %c0_102] : memref<1152x128xf32, #tpu.memory_space<vmem>>, vector<8x128xf32>
      %56 = arith.maximumf %49, %55 : vector<8x128xf32>
      %57 = vector.extract_strided_slice %56 {offsets = [0, 0], sizes = [1, 128], strides = [1, 1]} : vector<8x128xf32> to vector<1x128xf32>
      %58 = vector.extract_strided_slice %56 {offsets = [1, 0], sizes = [1, 128], strides = [1, 1]} : vector<8x128xf32> to vector<1x128xf32>
      %59 = arith.maximumf %57, %58 : vector<1x128xf32>
      %c4_i32_103 = arith.constant 4 : i32
      %60 = arith.muli %arg20, %c4_i32_103 : i32
      %c80_i32 = arith.constant 80 : i32
      %61 = arith.addi %c80_i32, %60 : i32
      %c0_i32_104 = arith.constant 0 : i32
      %62 = arith.addi %61, %c0_i32_104 : i32
      %63 = arith.index_cast %62 : i32 to index
      %c0_105 = arith.constant 0 : index
      %64 = vector.load %arg19[%63, %c0_105] : memref<192x128xf32, #tpu.memory_space<vmem>>, vector<1x128xf32>
      tpu.vector_store %arg19[%63, %c0_105], %59 {strides = array<i32>} : memref<192x128xf32, #tpu.memory_space<vmem>>, vector<1x128xf32>,
      %65 = vector.extract_strided_slice %56 {offsets = [2, 0], sizes = [1, 128], strides = [1, 1]} : vector<8x128xf32> to vector<1x128xf32>
      %66 = vector.extract_strided_slice %56 {offsets = [3, 0], sizes = [1, 128], strides = [1, 1]} : vector<8x128xf32> to vector<1x128xf32>
      %67 = arith.maximumf %65, %66 : vector<1x128xf32>
      %c4_i32_106 = arith.constant 4 : i32
      %68 = arith.muli %arg20, %c4_i32_106 : i32
      %c80_i32_107 = arith.constant 80 : i32
      %69 = arith.addi %c80_i32_107, %68 : i32
      %c1_i32_108 = arith.constant 1 : i32
      %70 = arith.addi %69, %c1_i32_108 : i32
      %71 = arith.index_cast %70 : i32 to index
      %c0_109 = arith.constant 0 : index
      %72 = vector.load %arg19[%71, %c0_109] : memref<192x128xf32, #tpu.memory_space<vmem>>, vector<1x128xf32>
      tpu.vector_store %arg19[%71, %c0_109], %67 {strides = array<i32>} : memref<192x128xf32, #tpu.memory_space<vmem>>, vector<1x128xf32>,
      %73 = vector.extract_strided_slice %56 {offsets = [4, 0], sizes = [1, 128], strides = [1, 1]} : vector<8x128xf32> to vector<1x128xf32>
      %74 = vector.extract_strided_slice %56 {offsets = [5, 0], sizes = [1, 128], strides = [1, 1]} : vector<8x128xf32> to vector<1x128xf32>
      %75 = arith.maximumf %73, %74 : vector<1x128xf32>
      %c4_i32_110 = arith.constant 4 : i32
      %76 = arith.muli %arg20, %c4_i32_110 : i32
      %c80_i32_111 = arith.constant 80 : i32
      %77 = arith.addi %c80_i32_111, %76 : i32
      %c2_i32_112 = arith.constant 2 : i32
      %78 = arith.addi %77, %c2_i32_112 : i32
      %79 = arith.index_cast %78 : i32 to index
      %c0_113 = arith.constant 0 : index
      %80 = vector.load %arg19[%79, %c0_113] : memref<192x128xf32, #tpu.memory_space<vmem>>, vector<1x128xf32>
      tpu.vector_store %arg19[%79, %c0_113], %75 {strides = array<i32>} : memref<192x128xf32, #tpu.memory_space<vmem>>, vector<1x128xf32>,
      %81 = vector.extract_strided_slice %56 {offsets = [6, 0], sizes = [1, 128], strides = [1, 1]} : vector<8x128xf32> to vector<1x128xf32>
      %82 = vector.extract_strided_slice %56 {offsets = [7, 0], sizes = [1, 128], strides = [1, 1]} : vector<8x128xf32> to vector<1x128xf32>
      %83 = arith.maximumf %81, %82 : vector<1x128xf32>
      %c4_i32_114 = arith.constant 4 : i32
      %84 = arith.muli %arg20, %c4_i32_114 : i32
      %c80_i32_115 = arith.constant 80 : i32
      %85 = arith.addi %c80_i32_115, %84 : i32
      %c3_i32 = arith.constant 3 : i32
      %86 = arith.addi %85, %c3_i32 : i32
      %87 = arith.index_cast %86 : i32 to index
      %c0_116 = arith.constant 0 : index
      %88 = vector.load %arg19[%87, %c0_116] : memref<192x128xf32, #tpu.memory_space<vmem>>, vector<1x128xf32>
      tpu.vector_store %arg19[%87, %c0_116], %83 {strides = array<i32>} : memref<192x128xf32, #tpu.memory_space<vmem>>, vector<1x128xf32>,
    }
    %c4_i32_49 = arith.constant 4 : i32
    %c0_i32_50 = arith.constant 0 : i32
    %c4_i32_51 = arith.constant 4 : i32
    %16 = arith.addi %c0_i32_50, %c4_i32_51 : i32
    %c1_i32_52 = arith.constant 1 : i32
    scf.for %arg20 = %c0_i32_50 to %16 step %c1_i32_52  : i32 {
      %c2_i32 = arith.constant 2 : i32
      %45 = arith.muli %c2_i32, %arg20 : i32
      %c12_i32_96 = arith.constant 12 : i32
      %46 = arith.muli %45, %c12_i32_96 : i32
      %c576_i32 = arith.constant 576 : i32
      %47 = arith.addi %c576_i32, %46 : i32
      %48 = arith.index_cast %47 : i32 to index
      %c0_97 = arith.constant 0 : index
      %49 = vector.load %arg18[%48, %c0_97] : memref<1152x128xf32, #tpu.memory_space<vmem>>, vector<8x128xf32>
      %c2_i32_98 = arith.constant 2 : i32
      %50 = arith.muli %c2_i32_98, %arg20 : i32
      %c1_i32_99 = arith.constant 1 : i32
      %51 = arith.addi %50, %c1_i32_99 : i32
      %c12_i32_100 = arith.constant 12 : i32
      %52 = arith.muli %51, %c12_i32_100 : i32
      %c576_i32_101 = arith.constant 576 : i32
      %53 = arith.addi %c576_i32_101, %52 : i32
      %54 = arith.index_cast %53 : i32 to index
      %c0_102 = arith.constant 0 : index
      %55 = vector.load %arg18[%54, %c0_102] : memref<1152x128xf32, #tpu.memory_space<vmem>>, vector<8x128xf32>
      %56 = arith.maximumf %49, %55 : vector<8x128xf32>
      %57 = vector.extract_strided_slice %56 {offsets = [0, 0], sizes = [1, 128], strides = [1, 1]} : vector<8x128xf32> to vector<1x128xf32>
      %58 = vector.extract_strided_slice %56 {offsets = [1, 0], sizes = [1, 128], strides = [1, 1]} : vector<8x128xf32> to vector<1x128xf32>
      %59 = arith.maximumf %57, %58 : vector<1x128xf32>
      %c4_i32_103 = arith.constant 4 : i32
      %60 = arith.muli %arg20, %c4_i32_103 : i32
      %c96_i32 = arith.constant 96 : i32
      %61 = arith.addi %c96_i32, %60 : i32
      %c0_i32_104 = arith.constant 0 : i32
      %62 = arith.addi %61, %c0_i32_104 : i32
      %63 = arith.index_cast %62 : i32 to index
      %c0_105 = arith.constant 0 : index
      %64 = vector.load %arg19[%63, %c0_105] : memref<192x128xf32, #tpu.memory_space<vmem>>, vector<1x128xf32>
      tpu.vector_store %arg19[%63, %c0_105], %59 {strides = array<i32>} : memref<192x128xf32, #tpu.memory_space<vmem>>, vector<1x128xf32>,
      %65 = vector.extract_strided_slice %56 {offsets = [2, 0], sizes = [1, 128], strides = [1, 1]} : vector<8x128xf32> to vector<1x128xf32>
      %66 = vector.extract_strided_slice %56 {offsets = [3, 0], sizes = [1, 128], strides = [1, 1]} : vector<8x128xf32> to vector<1x128xf32>
      %67 = arith.maximumf %65, %66 : vector<1x128xf32>
      %c4_i32_106 = arith.constant 4 : i32
      %68 = arith.muli %arg20, %c4_i32_106 : i32
      %c96_i32_107 = arith.constant 96 : i32
      %69 = arith.addi %c96_i32_107, %68 : i32
      %c1_i32_108 = arith.constant 1 : i32
      %70 = arith.addi %69, %c1_i32_108 : i32
      %71 = arith.index_cast %70 : i32 to index
      %c0_109 = arith.constant 0 : index
      %72 = vector.load %arg19[%71, %c0_109] : memref<192x128xf32, #tpu.memory_space<vmem>>, vector<1x128xf32>
      tpu.vector_store %arg19[%71, %c0_109], %67 {strides = array<i32>} : memref<192x128xf32, #tpu.memory_space<vmem>>, vector<1x128xf32>,
      %73 = vector.extract_strided_slice %56 {offsets = [4, 0], sizes = [1, 128], strides = [1, 1]} : vector<8x128xf32> to vector<1x128xf32>
      %74 = vector.extract_strided_slice %56 {offsets = [5, 0], sizes = [1, 128], strides = [1, 1]} : vector<8x128xf32> to vector<1x128xf32>
      %75 = arith.maximumf %73, %74 : vector<1x128xf32>
      %c4_i32_110 = arith.constant 4 : i32
      %76 = arith.muli %arg20, %c4_i32_110 : i32
      %c96_i32_111 = arith.constant 96 : i32
      %77 = arith.addi %c96_i32_111, %76 : i32
      %c2_i32_112 = arith.constant 2 : i32
      %78 = arith.addi %77, %c2_i32_112 : i32
      %79 = arith.index_cast %78 : i32 to index
      %c0_113 = arith.constant 0 : index
      %80 = vector.load %arg19[%79, %c0_113] : memref<192x128xf32, #tpu.memory_space<vmem>>, vector<1x128xf32>
      tpu.vector_store %arg19[%79, %c0_113], %75 {strides = array<i32>} : memref<192x128xf32, #tpu.memory_space<vmem>>, vector<1x128xf32>,
      %81 = vector.extract_strided_slice %56 {offsets = [6, 0], sizes = [1, 128], strides = [1, 1]} : vector<8x128xf32> to vector<1x128xf32>
      %82 = vector.extract_strided_slice %56 {offsets = [7, 0], sizes = [1, 128], strides = [1, 1]} : vector<8x128xf32> to vector<1x128xf32>
      %83 = arith.maximumf %81, %82 : vector<1x128xf32>
      %c4_i32_114 = arith.constant 4 : i32
      %84 = arith.muli %arg20, %c4_i32_114 : i32
      %c96_i32_115 = arith.constant 96 : i32
      %85 = arith.addi %c96_i32_115, %84 : i32
      %c3_i32 = arith.constant 3 : i32
      %86 = arith.addi %85, %c3_i32 : i32
      %87 = arith.index_cast %86 : i32 to index
      %c0_116 = arith.constant 0 : index
      %88 = vector.load %arg19[%87, %c0_116] : memref<192x128xf32, #tpu.memory_space<vmem>>, vector<1x128xf32>
      tpu.vector_store %arg19[%87, %c0_116], %83 {strides = array<i32>} : memref<192x128xf32, #tpu.memory_space<vmem>>, vector<1x128xf32>,
    }
    %c4_i32_53 = arith.constant 4 : i32
    %c0_i32_54 = arith.constant 0 : i32
    %c4_i32_55 = arith.constant 4 : i32
    %17 = arith.addi %c0_i32_54, %c4_i32_55 : i32
    %c1_i32_56 = arith.constant 1 : i32
    scf.for %arg20 = %c0_i32_54 to %17 step %c1_i32_56  : i32 {
      %c2_i32 = arith.constant 2 : i32
      %45 = arith.muli %c2_i32, %arg20 : i32
      %c12_i32_96 = arith.constant 12 : i32
      %46 = arith.muli %45, %c12_i32_96 : i32
      %c672_i32 = arith.constant 672 : i32
      %47 = arith.addi %c672_i32, %46 : i32
      %48 = arith.index_cast %47 : i32 to index
      %c0_97 = arith.constant 0 : index
      %49 = vector.load %arg18[%48, %c0_97] : memref<1152x128xf32, #tpu.memory_space<vmem>>, vector<8x128xf32>
      %c2_i32_98 = arith.constant 2 : i32
      %50 = arith.muli %c2_i32_98, %arg20 : i32
      %c1_i32_99 = arith.constant 1 : i32
      %51 = arith.addi %50, %c1_i32_99 : i32
      %c12_i32_100 = arith.constant 12 : i32
      %52 = arith.muli %51, %c12_i32_100 : i32
      %c672_i32_101 = arith.constant 672 : i32
      %53 = arith.addi %c672_i32_101, %52 : i32
      %54 = arith.index_cast %53 : i32 to index
      %c0_102 = arith.constant 0 : index
      %55 = vector.load %arg18[%54, %c0_102] : memref<1152x128xf32, #tpu.memory_space<vmem>>, vector<8x128xf32>
      %56 = arith.maximumf %49, %55 : vector<8x128xf32>
      %57 = vector.extract_strided_slice %56 {offsets = [0, 0], sizes = [1, 128], strides = [1, 1]} : vector<8x128xf32> to vector<1x128xf32>
      %58 = vector.extract_strided_slice %56 {offsets = [1, 0], sizes = [1, 128], strides = [1, 1]} : vector<8x128xf32> to vector<1x128xf32>
      %59 = arith.maximumf %57, %58 : vector<1x128xf32>
      %c4_i32_103 = arith.constant 4 : i32
      %60 = arith.muli %arg20, %c4_i32_103 : i32
      %c112_i32 = arith.constant 112 : i32
      %61 = arith.addi %c112_i32, %60 : i32
      %c0_i32_104 = arith.constant 0 : i32
      %62 = arith.addi %61, %c0_i32_104 : i32
      %63 = arith.index_cast %62 : i32 to index
      %c0_105 = arith.constant 0 : index
      %64 = vector.load %arg19[%63, %c0_105] : memref<192x128xf32, #tpu.memory_space<vmem>>, vector<1x128xf32>
      tpu.vector_store %arg19[%63, %c0_105], %59 {strides = array<i32>} : memref<192x128xf32, #tpu.memory_space<vmem>>, vector<1x128xf32>,
      %65 = vector.extract_strided_slice %56 {offsets = [2, 0], sizes = [1, 128], strides = [1, 1]} : vector<8x128xf32> to vector<1x128xf32>
      %66 = vector.extract_strided_slice %56 {offsets = [3, 0], sizes = [1, 128], strides = [1, 1]} : vector<8x128xf32> to vector<1x128xf32>
      %67 = arith.maximumf %65, %66 : vector<1x128xf32>
      %c4_i32_106 = arith.constant 4 : i32
      %68 = arith.muli %arg20, %c4_i32_106 : i32
      %c112_i32_107 = arith.constant 112 : i32
      %69 = arith.addi %c112_i32_107, %68 : i32
      %c1_i32_108 = arith.constant 1 : i32
      %70 = arith.addi %69, %c1_i32_108 : i32
      %71 = arith.index_cast %70 : i32 to index
      %c0_109 = arith.constant 0 : index
      %72 = vector.load %arg19[%71, %c0_109] : memref<192x128xf32, #tpu.memory_space<vmem>>, vector<1x128xf32>
      tpu.vector_store %arg19[%71, %c0_109], %67 {strides = array<i32>} : memref<192x128xf32, #tpu.memory_space<vmem>>, vector<1x128xf32>,
      %73 = vector.extract_strided_slice %56 {offsets = [4, 0], sizes = [1, 128], strides = [1, 1]} : vector<8x128xf32> to vector<1x128xf32>
      %74 = vector.extract_strided_slice %56 {offsets = [5, 0], sizes = [1, 128], strides = [1, 1]} : vector<8x128xf32> to vector<1x128xf32>
      %75 = arith.maximumf %73, %74 : vector<1x128xf32>
      %c4_i32_110 = arith.constant 4 : i32
      %76 = arith.muli %arg20, %c4_i32_110 : i32
      %c112_i32_111 = arith.constant 112 : i32
      %77 = arith.addi %c112_i32_111, %76 : i32
      %c2_i32_112 = arith.constant 2 : i32
      %78 = arith.addi %77, %c2_i32_112 : i32
      %79 = arith.index_cast %78 : i32 to index
      %c0_113 = arith.constant 0 : index
      %80 = vector.load %arg19[%79, %c0_113] : memref<192x128xf32, #tpu.memory_space<vmem>>, vector<1x128xf32>
      tpu.vector_store %arg19[%79, %c0_113], %75 {strides = array<i32>} : memref<192x128xf32, #tpu.memory_space<vmem>>, vector<1x128xf32>,
      %81 = vector.extract_strided_slice %56 {offsets = [6, 0], sizes = [1, 128], strides = [1, 1]} : vector<8x128xf32> to vector<1x128xf32>
      %82 = vector.extract_strided_slice %56 {offsets = [7, 0], sizes = [1, 128], strides = [1, 1]} : vector<8x128xf32> to vector<1x128xf32>
      %83 = arith.maximumf %81, %82 : vector<1x128xf32>
      %c4_i32_114 = arith.constant 4 : i32
      %84 = arith.muli %arg20, %c4_i32_114 : i32
      %c112_i32_115 = arith.constant 112 : i32
      %85 = arith.addi %c112_i32_115, %84 : i32
      %c3_i32 = arith.constant 3 : i32
      %86 = arith.addi %85, %c3_i32 : i32
      %87 = arith.index_cast %86 : i32 to index
      %c0_116 = arith.constant 0 : index
      %88 = vector.load %arg19[%87, %c0_116] : memref<192x128xf32, #tpu.memory_space<vmem>>, vector<1x128xf32>
      tpu.vector_store %arg19[%87, %c0_116], %83 {strides = array<i32>} : memref<192x128xf32, #tpu.memory_space<vmem>>, vector<1x128xf32>,
    }
    %c4_i32_57 = arith.constant 4 : i32
    %c0_i32_58 = arith.constant 0 : i32
    %c4_i32_59 = arith.constant 4 : i32
    %18 = arith.addi %c0_i32_58, %c4_i32_59 : i32
    %c1_i32_60 = arith.constant 1 : i32
    scf.for %arg20 = %c0_i32_58 to %18 step %c1_i32_60  : i32 {
      %c2_i32 = arith.constant 2 : i32
      %45 = arith.muli %c2_i32, %arg20 : i32
      %c12_i32_96 = arith.constant 12 : i32
      %46 = arith.muli %45, %c12_i32_96 : i32
      %c768_i32 = arith.constant 768 : i32
      %47 = arith.addi %c768_i32, %46 : i32
      %48 = arith.index_cast %47 : i32 to index
      %c0_97 = arith.constant 0 : index
      %49 = vector.load %arg18[%48, %c0_97] : memref<1152x128xf32, #tpu.memory_space<vmem>>, vector<8x128xf32>
      %c2_i32_98 = arith.constant 2 : i32
      %50 = arith.muli %c2_i32_98, %arg20 : i32
      %c1_i32_99 = arith.constant 1 : i32
      %51 = arith.addi %50, %c1_i32_99 : i32
      %c12_i32_100 = arith.constant 12 : i32
      %52 = arith.muli %51, %c12_i32_100 : i32
      %c768_i32_101 = arith.constant 768 : i32
      %53 = arith.addi %c768_i32_101, %52 : i32
      %54 = arith.index_cast %53 : i32 to index
      %c0_102 = arith.constant 0 : index
      %55 = vector.load %arg18[%54, %c0_102] : memref<1152x128xf32, #tpu.memory_space<vmem>>, vector<8x128xf32>
      %56 = arith.maximumf %49, %55 : vector<8x128xf32>
      %57 = vector.extract_strided_slice %56 {offsets = [0, 0], sizes = [1, 128], strides = [1, 1]} : vector<8x128xf32> to vector<1x128xf32>
      %58 = vector.extract_strided_slice %56 {offsets = [1, 0], sizes = [1, 128], strides = [1, 1]} : vector<8x128xf32> to vector<1x128xf32>
      %59 = arith.maximumf %57, %58 : vector<1x128xf32>
      %c4_i32_103 = arith.constant 4 : i32
      %60 = arith.muli %arg20, %c4_i32_103 : i32
      %c128_i32 = arith.constant 128 : i32
      %61 = arith.addi %c128_i32, %60 : i32
      %c0_i32_104 = arith.constant 0 : i32
      %62 = arith.addi %61, %c0_i32_104 : i32
      %63 = arith.index_cast %62 : i32 to index
      %c0_105 = arith.constant 0 : index
      %64 = vector.load %arg19[%63, %c0_105] : memref<192x128xf32, #tpu.memory_space<vmem>>, vector<1x128xf32>
      tpu.vector_store %arg19[%63, %c0_105], %59 {strides = array<i32>} : memref<192x128xf32, #tpu.memory_space<vmem>>, vector<1x128xf32>,
      %65 = vector.extract_strided_slice %56 {offsets = [2, 0], sizes = [1, 128], strides = [1, 1]} : vector<8x128xf32> to vector<1x128xf32>
      %66 = vector.extract_strided_slice %56 {offsets = [3, 0], sizes = [1, 128], strides = [1, 1]} : vector<8x128xf32> to vector<1x128xf32>
      %67 = arith.maximumf %65, %66 : vector<1x128xf32>
      %c4_i32_106 = arith.constant 4 : i32
      %68 = arith.muli %arg20, %c4_i32_106 : i32
      %c128_i32_107 = arith.constant 128 : i32
      %69 = arith.addi %c128_i32_107, %68 : i32
      %c1_i32_108 = arith.constant 1 : i32
      %70 = arith.addi %69, %c1_i32_108 : i32
      %71 = arith.index_cast %70 : i32 to index
      %c0_109 = arith.constant 0 : index
      %72 = vector.load %arg19[%71, %c0_109] : memref<192x128xf32, #tpu.memory_space<vmem>>, vector<1x128xf32>
      tpu.vector_store %arg19[%71, %c0_109], %67 {strides = array<i32>} : memref<192x128xf32, #tpu.memory_space<vmem>>, vector<1x128xf32>,
      %73 = vector.extract_strided_slice %56 {offsets = [4, 0], sizes = [1, 128], strides = [1, 1]} : vector<8x128xf32> to vector<1x128xf32>
      %74 = vector.extract_strided_slice %56 {offsets = [5, 0], sizes = [1, 128], strides = [1, 1]} : vector<8x128xf32> to vector<1x128xf32>
      %75 = arith.maximumf %73, %74 : vector<1x128xf32>
      %c4_i32_110 = arith.constant 4 : i32
      %76 = arith.muli %arg20, %c4_i32_110 : i32
      %c128_i32_111 = arith.constant 128 : i32
      %77 = arith.addi %c128_i32_111, %76 : i32
      %c2_i32_112 = arith.constant 2 : i32
      %78 = arith.addi %77, %c2_i32_112 : i32
      %79 = arith.index_cast %78 : i32 to index
      %c0_113 = arith.constant 0 : index
      %80 = vector.load %arg19[%79, %c0_113] : memref<192x128xf32, #tpu.memory_space<vmem>>, vector<1x128xf32>
      tpu.vector_store %arg19[%79, %c0_113], %75 {strides = array<i32>} : memref<192x128xf32, #tpu.memory_space<vmem>>, vector<1x128xf32>,
      %81 = vector.extract_strided_slice %56 {offsets = [6, 0], sizes = [1, 128], strides = [1, 1]} : vector<8x128xf32> to vector<1x128xf32>
      %82 = vector.extract_strided_slice %56 {offsets = [7, 0], sizes = [1, 128], strides = [1, 1]} : vector<8x128xf32> to vector<1x128xf32>
      %83 = arith.maximumf %81, %82 : vector<1x128xf32>
      %c4_i32_114 = arith.constant 4 : i32
      %84 = arith.muli %arg20, %c4_i32_114 : i32
      %c128_i32_115 = arith.constant 128 : i32
      %85 = arith.addi %c128_i32_115, %84 : i32
      %c3_i32 = arith.constant 3 : i32
      %86 = arith.addi %85, %c3_i32 : i32
      %87 = arith.index_cast %86 : i32 to index
      %c0_116 = arith.constant 0 : index
      %88 = vector.load %arg19[%87, %c0_116] : memref<192x128xf32, #tpu.memory_space<vmem>>, vector<1x128xf32>
      tpu.vector_store %arg19[%87, %c0_116], %83 {strides = array<i32>} : memref<192x128xf32, #tpu.memory_space<vmem>>, vector<1x128xf32>,
    }
    %c4_i32_61 = arith.constant 4 : i32
    %c0_i32_62 = arith.constant 0 : i32
    %c4_i32_63 = arith.constant 4 : i32
    %19 = arith.addi %c0_i32_62, %c4_i32_63 : i32
    %c1_i32_64 = arith.constant 1 : i32
    scf.for %arg20 = %c0_i32_62 to %19 step %c1_i32_64  : i32 {
      %c2_i32 = arith.constant 2 : i32
      %45 = arith.muli %c2_i32, %arg20 : i32
      %c12_i32_96 = arith.constant 12 : i32
      %46 = arith.muli %45, %c12_i32_96 : i32
      %c864_i32 = arith.constant 864 : i32
      %47 = arith.addi %c864_i32, %46 : i32
      %48 = arith.index_cast %47 : i32 to index
      %c0_97 = arith.constant 0 : index
      %49 = vector.load %arg18[%48, %c0_97] : memref<1152x128xf32, #tpu.memory_space<vmem>>, vector<8x128xf32>
      %c2_i32_98 = arith.constant 2 : i32
      %50 = arith.muli %c2_i32_98, %arg20 : i32
      %c1_i32_99 = arith.constant 1 : i32
      %51 = arith.addi %50, %c1_i32_99 : i32
      %c12_i32_100 = arith.constant 12 : i32
      %52 = arith.muli %51, %c12_i32_100 : i32
      %c864_i32_101 = arith.constant 864 : i32
      %53 = arith.addi %c864_i32_101, %52 : i32
      %54 = arith.index_cast %53 : i32 to index
      %c0_102 = arith.constant 0 : index
      %55 = vector.load %arg18[%54, %c0_102] : memref<1152x128xf32, #tpu.memory_space<vmem>>, vector<8x128xf32>
      %56 = arith.maximumf %49, %55 : vector<8x128xf32>
      %57 = vector.extract_strided_slice %56 {offsets = [0, 0], sizes = [1, 128], strides = [1, 1]} : vector<8x128xf32> to vector<1x128xf32>
      %58 = vector.extract_strided_slice %56 {offsets = [1, 0], sizes = [1, 128], strides = [1, 1]} : vector<8x128xf32> to vector<1x128xf32>
      %59 = arith.maximumf %57, %58 : vector<1x128xf32>
      %c4_i32_103 = arith.constant 4 : i32
      %60 = arith.muli %arg20, %c4_i32_103 : i32
      %c144_i32 = arith.constant 144 : i32
      %61 = arith.addi %c144_i32, %60 : i32
      %c0_i32_104 = arith.constant 0 : i32
      %62 = arith.addi %61, %c0_i32_104 : i32
      %63 = arith.index_cast %62 : i32 to index
      %c0_105 = arith.constant 0 : index
      %64 = vector.load %arg19[%63, %c0_105] : memref<192x128xf32, #tpu.memory_space<vmem>>, vector<1x128xf32>
      tpu.vector_store %arg19[%63, %c0_105], %59 {strides = array<i32>} : memref<192x128xf32, #tpu.memory_space<vmem>>, vector<1x128xf32>,
      %65 = vector.extract_strided_slice %56 {offsets = [2, 0], sizes = [1, 128], strides = [1, 1]} : vector<8x128xf32> to vector<1x128xf32>
      %66 = vector.extract_strided_slice %56 {offsets = [3, 0], sizes = [1, 128], strides = [1, 1]} : vector<8x128xf32> to vector<1x128xf32>
      %67 = arith.maximumf %65, %66 : vector<1x128xf32>
      %c4_i32_106 = arith.constant 4 : i32
      %68 = arith.muli %arg20, %c4_i32_106 : i32
      %c144_i32_107 = arith.constant 144 : i32
      %69 = arith.addi %c144_i32_107, %68 : i32
      %c1_i32_108 = arith.constant 1 : i32
      %70 = arith.addi %69, %c1_i32_108 : i32
      %71 = arith.index_cast %70 : i32 to index
      %c0_109 = arith.constant 0 : index
      %72 = vector.load %arg19[%71, %c0_109] : memref<192x128xf32, #tpu.memory_space<vmem>>, vector<1x128xf32>
      tpu.vector_store %arg19[%71, %c0_109], %67 {strides = array<i32>} : memref<192x128xf32, #tpu.memory_space<vmem>>, vector<1x128xf32>,
      %73 = vector.extract_strided_slice %56 {offsets = [4, 0], sizes = [1, 128], strides = [1, 1]} : vector<8x128xf32> to vector<1x128xf32>
      %74 = vector.extract_strided_slice %56 {offsets = [5, 0], sizes = [1, 128], strides = [1, 1]} : vector<8x128xf32> to vector<1x128xf32>
      %75 = arith.maximumf %73, %74 : vector<1x128xf32>
      %c4_i32_110 = arith.constant 4 : i32
      %76 = arith.muli %arg20, %c4_i32_110 : i32
      %c144_i32_111 = arith.constant 144 : i32
      %77 = arith.addi %c144_i32_111, %76 : i32
      %c2_i32_112 = arith.constant 2 : i32
      %78 = arith.addi %77, %c2_i32_112 : i32
      %79 = arith.index_cast %78 : i32 to index
      %c0_113 = arith.constant 0 : index
      %80 = vector.load %arg19[%79, %c0_113] : memref<192x128xf32, #tpu.memory_space<vmem>>, vector<1x128xf32>
      tpu.vector_store %arg19[%79, %c0_113], %75 {strides = array<i32>} : memref<192x128xf32, #tpu.memory_space<vmem>>, vector<1x128xf32>,
      %81 = vector.extract_strided_slice %56 {offsets = [6, 0], sizes = [1, 128], strides = [1, 1]} : vector<8x128xf32> to vector<1x128xf32>
      %82 = vector.extract_strided_slice %56 {offsets = [7, 0], sizes = [1, 128], strides = [1, 1]} : vector<8x128xf32> to vector<1x128xf32>
      %83 = arith.maximumf %81, %82 : vector<1x128xf32>
      %c4_i32_114 = arith.constant 4 : i32
      %84 = arith.muli %arg20, %c4_i32_114 : i32
      %c144_i32_115 = arith.constant 144 : i32
      %85 = arith.addi %c144_i32_115, %84 : i32
      %c3_i32 = arith.constant 3 : i32
      %86 = arith.addi %85, %c3_i32 : i32
      %87 = arith.index_cast %86 : i32 to index
      %c0_116 = arith.constant 0 : index
      %88 = vector.load %arg19[%87, %c0_116] : memref<192x128xf32, #tpu.memory_space<vmem>>, vector<1x128xf32>
      tpu.vector_store %arg19[%87, %c0_116], %83 {strides = array<i32>} : memref<192x128xf32, #tpu.memory_space<vmem>>, vector<1x128xf32>,
    }
    %c4_i32_65 = arith.constant 4 : i32
    %c0_i32_66 = arith.constant 0 : i32
    %c4_i32_67 = arith.constant 4 : i32
    %20 = arith.addi %c0_i32_66, %c4_i32_67 : i32
    %c1_i32_68 = arith.constant 1 : i32
    scf.for %arg20 = %c0_i32_66 to %20 step %c1_i32_68  : i32 {
      %c2_i32 = arith.constant 2 : i32
      %45 = arith.muli %c2_i32, %arg20 : i32
      %c12_i32_96 = arith.constant 12 : i32
      %46 = arith.muli %45, %c12_i32_96 : i32
      %c960_i32 = arith.constant 960 : i32
      %47 = arith.addi %c960_i32, %46 : i32
      %48 = arith.index_cast %47 : i32 to index
      %c0_97 = arith.constant 0 : index
      %49 = vector.load %arg18[%48, %c0_97] : memref<1152x128xf32, #tpu.memory_space<vmem>>, vector<8x128xf32>
      %c2_i32_98 = arith.constant 2 : i32
      %50 = arith.muli %c2_i32_98, %arg20 : i32
      %c1_i32_99 = arith.constant 1 : i32
      %51 = arith.addi %50, %c1_i32_99 : i32
      %c12_i32_100 = arith.constant 12 : i32
      %52 = arith.muli %51, %c12_i32_100 : i32
      %c960_i32_101 = arith.constant 960 : i32
      %53 = arith.addi %c960_i32_101, %52 : i32
      %54 = arith.index_cast %53 : i32 to index
      %c0_102 = arith.constant 0 : index
      %55 = vector.load %arg18[%54, %c0_102] : memref<1152x128xf32, #tpu.memory_space<vmem>>, vector<8x128xf32>
      %56 = arith.maximumf %49, %55 : vector<8x128xf32>
      %57 = vector.extract_strided_slice %56 {offsets = [0, 0], sizes = [1, 128], strides = [1, 1]} : vector<8x128xf32> to vector<1x128xf32>
      %58 = vector.extract_strided_slice %56 {offsets = [1, 0], sizes = [1, 128], strides = [1, 1]} : vector<8x128xf32> to vector<1x128xf32>
      %59 = arith.maximumf %57, %58 : vector<1x128xf32>
      %c4_i32_103 = arith.constant 4 : i32
      %60 = arith.muli %arg20, %c4_i32_103 : i32
      %c160_i32 = arith.constant 160 : i32
      %61 = arith.addi %c160_i32, %60 : i32
      %c0_i32_104 = arith.constant 0 : i32
      %62 = arith.addi %61, %c0_i32_104 : i32
      %63 = arith.index_cast %62 : i32 to index
      %c0_105 = arith.constant 0 : index
      %64 = vector.load %arg19[%63, %c0_105] : memref<192x128xf32, #tpu.memory_space<vmem>>, vector<1x128xf32>
      tpu.vector_store %arg19[%63, %c0_105], %59 {strides = array<i32>} : memref<192x128xf32, #tpu.memory_space<vmem>>, vector<1x128xf32>,
      %65 = vector.extract_strided_slice %56 {offsets = [2, 0], sizes = [1, 128], strides = [1, 1]} : vector<8x128xf32> to vector<1x128xf32>
      %66 = vector.extract_strided_slice %56 {offsets = [3, 0], sizes = [1, 128], strides = [1, 1]} : vector<8x128xf32> to vector<1x128xf32>
      %67 = arith.maximumf %65, %66 : vector<1x128xf32>
      %c4_i32_106 = arith.constant 4 : i32
      %68 = arith.muli %arg20, %c4_i32_106 : i32
      %c160_i32_107 = arith.constant 160 : i32
      %69 = arith.addi %c160_i32_107, %68 : i32
      %c1_i32_108 = arith.constant 1 : i32
      %70 = arith.addi %69, %c1_i32_108 : i32
      %71 = arith.index_cast %70 : i32 to index
      %c0_109 = arith.constant 0 : index
      %72 = vector.load %arg19[%71, %c0_109] : memref<192x128xf32, #tpu.memory_space<vmem>>, vector<1x128xf32>
      tpu.vector_store %arg19[%71, %c0_109], %67 {strides = array<i32>} : memref<192x128xf32, #tpu.memory_space<vmem>>, vector<1x128xf32>,
      %73 = vector.extract_strided_slice %56 {offsets = [4, 0], sizes = [1, 128], strides = [1, 1]} : vector<8x128xf32> to vector<1x128xf32>
      %74 = vector.extract_strided_slice %56 {offsets = [5, 0], sizes = [1, 128], strides = [1, 1]} : vector<8x128xf32> to vector<1x128xf32>
      %75 = arith.maximumf %73, %74 : vector<1x128xf32>
      %c4_i32_110 = arith.constant 4 : i32
      %76 = arith.muli %arg20, %c4_i32_110 : i32
      %c160_i32_111 = arith.constant 160 : i32
      %77 = arith.addi %c160_i32_111, %76 : i32
      %c2_i32_112 = arith.constant 2 : i32
      %78 = arith.addi %77, %c2_i32_112 : i32
      %79 = arith.index_cast %78 : i32 to index
      %c0_113 = arith.constant 0 : index
      %80 = vector.load %arg19[%79, %c0_113] : memref<192x128xf32, #tpu.memory_space<vmem>>, vector<1x128xf32>
      tpu.vector_store %arg19[%79, %c0_113], %75 {strides = array<i32>} : memref<192x128xf32, #tpu.memory_space<vmem>>, vector<1x128xf32>,
      %81 = vector.extract_strided_slice %56 {offsets = [6, 0], sizes = [1, 128], strides = [1, 1]} : vector<8x128xf32> to vector<1x128xf32>
      %82 = vector.extract_strided_slice %56 {offsets = [7, 0], sizes = [1, 128], strides = [1, 1]} : vector<8x128xf32> to vector<1x128xf32>
      %83 = arith.maximumf %81, %82 : vector<1x128xf32>
      %c4_i32_114 = arith.constant 4 : i32
      %84 = arith.muli %arg20, %c4_i32_114 : i32
      %c160_i32_115 = arith.constant 160 : i32
      %85 = arith.addi %c160_i32_115, %84 : i32
      %c3_i32 = arith.constant 3 : i32
      %86 = arith.addi %85, %c3_i32 : i32
      %87 = arith.index_cast %86 : i32 to index
      %c0_116 = arith.constant 0 : index
      %88 = vector.load %arg19[%87, %c0_116] : memref<192x128xf32, #tpu.memory_space<vmem>>, vector<1x128xf32>
      tpu.vector_store %arg19[%87, %c0_116], %83 {strides = array<i32>} : memref<192x128xf32, #tpu.memory_space<vmem>>, vector<1x128xf32>,
    }
    %c4_i32_69 = arith.constant 4 : i32
    %c0_i32_70 = arith.constant 0 : i32
    %c4_i32_71 = arith.constant 4 : i32
    %21 = arith.addi %c0_i32_70, %c4_i32_71 : i32
    %c1_i32_72 = arith.constant 1 : i32
    scf.for %arg20 = %c0_i32_70 to %21 step %c1_i32_72  : i32 {
      %c2_i32 = arith.constant 2 : i32
      %45 = arith.muli %c2_i32, %arg20 : i32
      %c12_i32_96 = arith.constant 12 : i32
      %46 = arith.muli %45, %c12_i32_96 : i32
      %c1056_i32 = arith.constant 1056 : i32
      %47 = arith.addi %c1056_i32, %46 : i32
      %48 = arith.index_cast %47 : i32 to index
      %c0_97 = arith.constant 0 : index
      %49 = vector.load %arg18[%48, %c0_97] : memref<1152x128xf32, #tpu.memory_space<vmem>>, vector<8x128xf32>
      %c2_i32_98 = arith.constant 2 : i32
      %50 = arith.muli %c2_i32_98, %arg20 : i32
      %c1_i32_99 = arith.constant 1 : i32
      %51 = arith.addi %50, %c1_i32_99 : i32
      %c12_i32_100 = arith.constant 12 : i32
      %52 = arith.muli %51, %c12_i32_100 : i32
      %c1056_i32_101 = arith.constant 1056 : i32
      %53 = arith.addi %c1056_i32_101, %52 : i32
      %54 = arith.index_cast %53 : i32 to index
      %c0_102 = arith.constant 0 : index
      %55 = vector.load %arg18[%54, %c0_102] : memref<1152x128xf32, #tpu.memory_space<vmem>>, vector<8x128xf32>
      %56 = arith.maximumf %49, %55 : vector<8x128xf32>
      %57 = vector.extract_strided_slice %56 {offsets = [0, 0], sizes = [1, 128], strides = [1, 1]} : vector<8x128xf32> to vector<1x128xf32>
      %58 = vector.extract_strided_slice %56 {offsets = [1, 0], sizes = [1, 128], strides = [1, 1]} : vector<8x128xf32> to vector<1x128xf32>
      %59 = arith.maximumf %57, %58 : vector<1x128xf32>
      %c4_i32_103 = arith.constant 4 : i32
      %60 = arith.muli %arg20, %c4_i32_103 : i32
      %c176_i32 = arith.constant 176 : i32
      %61 = arith.addi %c176_i32, %60 : i32
      %c0_i32_104 = arith.constant 0 : i32
      %62 = arith.addi %61, %c0_i32_104 : i32
      %63 = arith.index_cast %62 : i32 to index
      %c0_105 = arith.constant 0 : index
      %64 = vector.load %arg19[%63, %c0_105] : memref<192x128xf32, #tpu.memory_space<vmem>>, vector<1x128xf32>
      tpu.vector_store %arg19[%63, %c0_105], %59 {strides = array<i32>} : memref<192x128xf32, #tpu.memory_space<vmem>>, vector<1x128xf32>,
      %65 = vector.extract_strided_slice %56 {offsets = [2, 0], sizes = [1, 128], strides = [1, 1]} : vector<8x128xf32> to vector<1x128xf32>
      %66 = vector.extract_strided_slice %56 {offsets = [3, 0], sizes = [1, 128], strides = [1, 1]} : vector<8x128xf32> to vector<1x128xf32>
      %67 = arith.maximumf %65, %66 : vector<1x128xf32>
      %c4_i32_106 = arith.constant 4 : i32
      %68 = arith.muli %arg20, %c4_i32_106 : i32
      %c176_i32_107 = arith.constant 176 : i32
      %69 = arith.addi %c176_i32_107, %68 : i32
      %c1_i32_108 = arith.constant 1 : i32
      %70 = arith.addi %69, %c1_i32_108 : i32
      %71 = arith.index_cast %70 : i32 to index
      %c0_109 = arith.constant 0 : index
      %72 = vector.load %arg19[%71, %c0_109] : memref<192x128xf32, #tpu.memory_space<vmem>>, vector<1x128xf32>
      tpu.vector_store %arg19[%71, %c0_109], %67 {strides = array<i32>} : memref<192x128xf32, #tpu.memory_space<vmem>>, vector<1x128xf32>,
      %73 = vector.extract_strided_slice %56 {offsets = [4, 0], sizes = [1, 128], strides = [1, 1]} : vector<8x128xf32> to vector<1x128xf32>
      %74 = vector.extract_strided_slice %56 {offsets = [5, 0], sizes = [1, 128], strides = [1, 1]} : vector<8x128xf32> to vector<1x128xf32>
      %75 = arith.maximumf %73, %74 : vector<1x128xf32>
      %c4_i32_110 = arith.constant 4 : i32
      %76 = arith.muli %arg20, %c4_i32_110 : i32
      %c176_i32_111 = arith.constant 176 : i32
      %77 = arith.addi %c176_i32_111, %76 : i32
      %c2_i32_112 = arith.constant 2 : i32
      %78 = arith.addi %77, %c2_i32_112 : i32
      %79 = arith.index_cast %78 : i32 to index
      %c0_113 = arith.constant 0 : index
      %80 = vector.load %arg19[%79, %c0_113] : memref<192x128xf32, #tpu.memory_space<vmem>>, vector<1x128xf32>
      tpu.vector_store %arg19[%79, %c0_113], %75 {strides = array<i32>} : memref<192x128xf32, #tpu.memory_space<vmem>>, vector<1x128xf32>,
      %81 = vector.extract_strided_slice %56 {offsets = [6, 0], sizes = [1, 128], strides = [1, 1]} : vector<8x128xf32> to vector<1x128xf32>
      %82 = vector.extract_strided_slice %56 {offsets = [7, 0], sizes = [1, 128], strides = [1, 1]} : vector<8x128xf32> to vector<1x128xf32>
      %83 = arith.maximumf %81, %82 : vector<1x128xf32>
      %c4_i32_114 = arith.constant 4 : i32
      %84 = arith.muli %arg20, %c4_i32_114 : i32
      %c176_i32_115 = arith.constant 176 : i32
      %85 = arith.addi %c176_i32_115, %84 : i32
      %c3_i32 = arith.constant 3 : i32
      %86 = arith.addi %85, %c3_i32 : i32
      %87 = arith.index_cast %86 : i32 to index
      %c0_116 = arith.constant 0 : index
      %88 = vector.load %arg19[%87, %c0_116] : memref<192x128xf32, #tpu.memory_space<vmem>>, vector<1x128xf32>
      tpu.vector_store %arg19[%87, %c0_116], %83 {strides = array<i32>} : memref<192x128xf32, #tpu.memory_space<vmem>>, vector<1x128xf32>,
    }
    %c4_i32_73 = arith.constant 4 : i32
    %c0_74 = arith.constant 0 : index
    %c0_75 = arith.constant 0 : index
    %22 = vector.load %arg19[%c0_74, %c0_75] : memref<192x128xf32, #tpu.memory_space<vmem>>, vector<192x128xf32>
    %c0_76 = arith.constant 0 : index
    %c0_77 = arith.constant 0 : index
    %23 = vector.load %arg9[%c0_76, %c0_77] : memref<120x192xf32, #tpu.memory_space<vmem>>, vector<120x192xf32>
    %cst_78 = arith.constant dense<0.000000e+00> : vector<120x128xf32>
    %24 = tpu.matmul %23, %22, %cst_78 {dimension_numbers = #tpu.dot_dimension_numbers<[1], [0], [0], [1], [0, 0, 1, 1], [], []>} : vector<120x192xf32>, vector<192x128xf32>, vector<120x128xf32> -> vector<120x128xf32>
    %c0_79 = arith.constant 0 : index
    %c0_80 = arith.constant 0 : index
    %25 = vector.load %arg10[%c0_79, %c0_80] : memref<120x1xf32, #tpu.memory_space<vmem>>, vector<120x1xf32>
    %26 = vector.broadcast %25 : vector<120x1xf32> to vector<120x128xf32>
    %27 = arith.addf %24, %26 : vector<120x128xf32>
    %cst_81 = arith.constant 0.000000e+00 : f32
    %28 = vector.broadcast %cst_81 : f32 to vector<120x128xf32>
    %29 = arith.maximumf %27, %28 : vector<120x128xf32>
    %c0_82 = arith.constant 0 : index
    %c0_83 = arith.constant 0 : index
    %30 = vector.load %arg11[%c0_82, %c0_83] : memref<60x120xf32, #tpu.memory_space<vmem>>, vector<60x120xf32>
    %cst_84 = arith.constant dense<0.000000e+00> : vector<60x128xf32>
    %31 = tpu.matmul %30, %29, %cst_84 {dimension_numbers = #tpu.dot_dimension_numbers<[1], [0], [0], [1], [0, 0, 1, 1], [], []>} : vector<60x120xf32>, vector<120x128xf32>, vector<60x128xf32> -> vector<60x128xf32>
    %c0_85 = arith.constant 0 : index
    %c0_86 = arith.constant 0 : index
    %32 = vector.load %arg12[%c0_85, %c0_86] : memref<60x1xf32, #tpu.memory_space<vmem>>, vector<60x1xf32>
    %33 = vector.broadcast %32 : vector<60x1xf32> to vector<60x128xf32>
    %34 = arith.addf %31, %33 : vector<60x128xf32>
    %cst_87 = arith.constant 0.000000e+00 : f32
    %35 = vector.broadcast %cst_87 : f32 to vector<60x128xf32>
    %36 = arith.maximumf %34, %35 : vector<60x128xf32>
    %c0_88 = arith.constant 0 : index
    %c0_89 = arith.constant 0 : index
    %37 = vector.load %arg13[%c0_88, %c0_89] : memref<10x60xf32, #tpu.memory_space<vmem>>, vector<10x60xf32>
    %cst_90 = arith.constant dense<0.000000e+00> : vector<10x128xf32>
    %38 = tpu.matmul %37, %36, %cst_90 {dimension_numbers = #tpu.dot_dimension_numbers<[1], [0], [0], [1], [0, 0, 1, 1], [], []>} : vector<10x60xf32>, vector<60x128xf32>, vector<10x128xf32> -> vector<10x128xf32>
    %c0_91 = arith.constant 0 : index
    %c0_92 = arith.constant 0 : index
    %39 = vector.load %arg14[%c0_91, %c0_92] : memref<10x1xf32, #tpu.memory_space<vmem>>, vector<10x1xf32>
    %40 = vector.broadcast %39 : vector<10x1xf32> to vector<10x128xf32>
    %41 = arith.addf %38, %40 : vector<10x128xf32>
    %c0_93 = arith.constant 0 : index
    %c0_94 = arith.constant 0 : index
    %c0_95 = arith.constant 0 : index
    %42 = vector.load %arg15[%c0_93, %c0_94, %c0_95] : memref<1x10x128xf32, #tpu.memory_space<vmem>>, vector<1x10x128xf32>
    %43 = vector.shape_cast %42 : vector<1x10x128xf32> to vector<10x128xf32>
    %44 = vector.shape_cast %41 : vector<10x128xf32> to vector<1x10x128xf32>
    tpu.vector_store %arg15[%c0_93, %c0_94, %c0_95], %44 {strides = array<i32>} : memref<1x10x128xf32, #tpu.memory_space<vmem>>, vector<1x10x128xf32>,
    return
  }
  func.func @transform_0(%arg0: i32) -> (i32, i32) {
    %c0_i32 = arith.constant 0 : i32
    %c0_i32_0 = arith.constant 0 : i32
    return %c0_i32, %arg0 : i32, i32
  }
  func.func @transform_1(%arg0: i32) -> i32 {
    %c0_i32 = arith.constant 0 : i32
    %c0_i32_0 = arith.constant 0 : i32
    return %c0_i32 : i32
  }
  func.func @transform_2(%arg0: i32) -> i32 {
    %c0_i32 = arith.constant 0 : i32
    %c0_i32_0 = arith.constant 0 : i32
    return %c0_i32 : i32
  }
  func.func @transform_3(%arg0: i32) -> i32 {
    %c0_i32 = arith.constant 0 : i32
    %c0_i32_0 = arith.constant 0 : i32
    return %c0_i32 : i32
  }
  func.func @transform_4(%arg0: i32) -> i32 {
    %c0_i32 = arith.constant 0 : i32
    %c0_i32_0 = arith.constant 0 : i32
    return %c0_i32 : i32
  }
  func.func @transform_5(%arg0: i32) -> i32 {
    %c0_i32 = arith.constant 0 : i32
    %c0_i32_0 = arith.constant 0 : i32
    return %c0_i32 : i32
  }
  func.func @transform_6(%arg0: i32) -> i32 {
    %c0_i32 = arith.constant 0 : i32
    %c0_i32_0 = arith.constant 0 : i32
    return %c0_i32 : i32
  }
  func.func @transform_7(%arg0: i32) -> i32 {
    %c0_i32 = arith.constant 0 : i32
    %c0_i32_0 = arith.constant 0 : i32
    return %c0_i32 : i32
  }
  func.func @transform_8(%arg0: i32) -> (i32, i32) {
    %c0_i32 = arith.constant 0 : i32
    %c0_i32_0 = arith.constant 0 : i32
    %c0_i32_1 = arith.constant 0 : i32
    return %c0_i32, %c0_i32_0 : i32, i32
  }
  func.func @transform_9(%arg0: i32) -> (i32, i32) {
    %c0_i32 = arith.constant 0 : i32
    %c0_i32_0 = arith.constant 0 : i32
    %c0_i32_1 = arith.constant 0 : i32
    return %c0_i32, %c0_i32_0 : i32, i32
  }
  func.func @transform_10(%arg0: i32) -> (i32, i32) {
    %c0_i32 = arith.constant 0 : i32
    %c0_i32_0 = arith.constant 0 : i32
    %c0_i32_1 = arith.constant 0 : i32
    return %c0_i32, %c0_i32_0 : i32, i32
  }
  func.func @transform_11(%arg0: i32) -> (i32, i32) {
    %c0_i32 = arith.constant 0 : i32
    %c0_i32_0 = arith.constant 0 : i32
    %c0_i32_1 = arith.constant 0 : i32
    return %c0_i32, %c0_i32_0 : i32, i32
  }
  func.func @transform_12(%arg0: i32) -> (i32, i32) {
    %c0_i32 = arith.constant 0 : i32
    %c0_i32_0 = arith.constant 0 : i32
    %c0_i32_1 = arith.constant 0 : i32
    return %c0_i32, %c0_i32_0 : i32, i32
  }
  func.func @transform_13(%arg0: i32) -> (i32, i32) {
    %c0_i32 = arith.constant 0 : i32
    %c0_i32_0 = arith.constant 0 : i32
    %c0_i32_1 = arith.constant 0 : i32
    return %c0_i32, %c0_i32_0 : i32, i32
  }
  func.func @transform_14(%arg0: i32) -> (i32, i32, i32) {
    %c0_i32 = arith.constant 0 : i32
    %c0_i32_0 = arith.constant 0 : i32
    %c0_i32_1 = arith.constant 0 : i32
    return %arg0, %c0_i32, %c0_i32_0 : i32, i32, i32
  }
}

</mosaic_0001>

<bundles_post_ra>
// kernel: tpu_custom_call.1
= control target key start
LH: loop header
LB: loop body
LE: loop exit
PB: predicated region body
PF: predicated region fallthrough
CT: control target
= control target key end

     0   :  { %19 = vsyncpa [#allocation7], 0  ;;  %s6316_s0 = inlined_call_operand.hbm [shape: f32[800,128], index: 0, kind: input, shape index: {}]   ;;  %s6317_s1 = inlined_call_operand.vmem [shape: f32[150], index: 1, kind: input, shape index: {}]   ;;  %s6318_s2 = inlined_call_operand.vmem [shape: f32[6], index: 2, kind: input, shape index: {}]   ;;  %s6319_s3 = inlined_call_operand.vmem [shape: s32[25], index: 3, kind: input, shape index: {}]   ;;  %s6320_s4 = inlined_call_operand.vmem [shape: s32[25], index: 4, kind: input, shape index: {}]   ;;  %s6321_s5 = inlined_call_operand.vmem [shape: f32[1800], index: 5, kind: input, shape index: {}]   ;;  %s6322_s6 = inlined_call_operand.vmem [shape: f32[12], index: 6, kind: input, shape index: {}]   ;;  %s6323_s7 = inlined_call_operand.vmem [shape: s32[25], index: 7, kind: input, shape index: {}]   ;;  %s6324_s8 = inlined_call_operand.vmem [shape: f32[120,192], index: 8, kind: input, shape index: {}]   ;;  %s6325_s9 = inlined_call_operand.vmem [shape: f32[120,1], index: 9, kind: input, shape index: {}]   ;;  %s6326_s10 = inlined_call_operand.vmem [shape: f32[60,120], index: 10, kind: input, shape index: {}]   ;;  %s6327_s11 = inlined_call_operand.vmem [shape: f32[60,1], index: 11, kind: input, shape index: {}]   ;;  %s6328_s12 = inlined_call_operand.vmem [shape: f32[10,60], index: 12, kind: input, shape index: {}]   ;;  %s6329_s13 = inlined_call_operand.vmem [shape: f32[10,1], index: 13, kind: input, shape index: {}]   ;;  %s6330_s14 = inlined_call_operand.vmem [shape: f32[1,10,128], index: 14, kind: output, shape index: {}]  }
   0x1   :  { %20 = vsyncpa [#allocation8], 0 }
   0x2   :  { %21 = vsyncpa [#allocation11], 0 }
   0x3   :  { %22 = vsyncpa [#allocation14], 0  ;;  %s51_s15 = sshll.u32 %s6318_s2, 4  ;;  %s52_s15 = int_to_ptr.vmem [resolvable:$true] %s51_s15 }
   0x4   :  { %23 = vsyncpa [#allocation17], 0  ;;  %s69_s18 = sshll.u32 %s6320_s4, 4  ;;  %s4466_s19 = smov [#allocation10]   ;;  %s70_s18 = int_to_ptr.vmem [resolvable:$true] %s69_s18 }
   0x5   :  { %54 = dma.vmem_to_smem %s52_s15, 16, %s4466_s19, [#allocation11]  }
   0x6   :  { %s4467_s20 = smov [#allocation13]   ;;  %s87_s23 = sshll.u32 %s6322_s6, 4  ;;  %s88_s23 = int_to_ptr.vmem [resolvable:$true] %s87_s23 }
   0x7   :  { %72 = dma.vmem_to_smem %s70_s18, 16, %s4467_s20, [#allocation14]  }
   0x8   :  { %s28_s2 = sshll.u32 %s6316_s0, 4  ;;  %s4468_s26 = smov [#allocation16]   ;;  %s29_s2 = int_to_ptr.hbm [resolvable:$true] %s28_s2 }
   0x9   :  { %90 = dma.vmem_to_smem %s88_s23, 16, %s4468_s26, [#allocation17]  }
   0xa   :  { %s4469_s27 = smov [#allocation6]   ;;  %s4470_s4 = smov 128  }
   0xb   :  { %s30_s28 = sshll.u32 %s4469_s27, 4  ;;  %s4471_s29 = smov 8   ;;  %s31_s28 = int_to_ptr.vmem [resolvable:$true] %s30_s28 }
   0xc   :  { %36 = dma.hbm_to_vmem [thread:$0]  %s29_s2, 12800, %s31_s28, [#allocation7], %s4470_s4, %s4470_s4, %s4471_s29  }
   0xd   :  { %s42_s16 = sshll.u32 %s6317_s1, 4  ;;  %s60_s18 = sshll.u32 %s6319_s3, 4  ;;  %s43_s16 = int_to_ptr.vmem [resolvable:$true] %s42_s16  ;;  %s61_s18 = int_to_ptr.vmem [resolvable:$true] %s60_s18 }
   0xe   :  { %s4472_s19 = smov [#allocation9]   ;;  %s4473_s0 = smov [#allocation12]  }
   0xf   :  { %45 = dma.vmem_to_smem %s43_s16, 32, %s4472_s19, [#allocation8]  }
  0x10   :  { %63 = dma.vmem_to_smem %s61_s18, 16, %s4473_s0, [#allocation11]  }
  0x11   :  { %s78_s22 = sshll.u32 %s6321_s5, 4  ;;  %s96_s25 = sshll.u32 %s6323_s7, 4  ;;  %s79_s22 = int_to_ptr.vmem [resolvable:$true] %s78_s22  ;;  %s97_s25 = int_to_ptr.vmem [resolvable:$true] %s96_s25 }
  0x12   :  { %s4474_s1 = smov [#allocation15]   ;;  %s4475_s2 = smov [#allocation18]  }
  0x13   :  { %81 = dma.vmem_to_smem %s79_s22, 240, %s4474_s1, [#allocation14]  }
  0x14   :  { %99 = dma.vmem_to_smem %s97_s25, 16, %s4475_s2, [#allocation17]  }
  0x15   :  { %4176 = dma.done.wait [#allocation7], 12800  }
  0x16   :  { %4177 = vsyncadd [#allocation7], 4294954496 }
  0x17   :  { %4178 = dma.done.wait [#allocation8], 32  }
  0x18   :  { %4179 = vsyncadd [#allocation8], 4294967264 }
  0x19   :  { %4180 = dma.done.wait [#allocation11], 32  }
  0x1a   :  { %4181 = vsyncadd [#allocation11], 4294967264 }
  0x1b   :  { %4182 = dma.done.wait [#allocation14], 256  }
  0x1c   :  { %4183 = vsyncadd [#allocation14], 4294967040 }
  0x1d   :  { %4184 = dma.done.wait [#allocation17], 32  }
  0x1e   :  { %4185 = vsyncadd [#allocation17], 4294967264 }
  0x1f   :  { %144 = sfence }
  0x20   :  { %s4577_s3 = smov 0  }
  0x21 LB: > { %s4583_s5 = sshll.u32 %s4188_s3, 4  ;;  %v4585_v0 = vmov 0.0   ;;  %v4587_v1 = vmov 0.0   ;;  %v4589_v2 = vmov 0.0   ;;  %v4591_v3 = vmov 0.0   ;;  %s4633_s7 = smov 0   ;;  %s4188_s3 = sphi %s4577_s3, %s150_s3  }
  0x22   : > { %v4593_v4 = vmov 0.0   ;;  %v4595_v5 = vmov 0.0   ;;  %v4597_v6 = vmov 0.0   ;;  %v4599_v7 = vmov 0.0  }
  0x23   : > { %v4601_v8 = vmov 0.0   ;;  %v4603_v9 = vmov 0.0   ;;  %v4605_v10 = vmov 0.0   ;;  %v4607_v11 = vmov 0.0  }
  0x24   : > { %v4609_v12 = vmov 0.0   ;;  %v4611_v13 = vmov 0.0   ;;  %v4613_v14 = vmov 0.0   ;;  %v4615_v15 = vmov 0.0  }
  0x25   : > { %v4617_v16 = vmov 0.0   ;;  %v4619_v17 = vmov 0.0   ;;  %v4621_v18 = vmov 0.0   ;;  %v4623_v19 = vmov 0.0  }
  0x26   : > { %v4625_v20 = vmov 0.0   ;;  %v4627_v21 = vmov 0.0   ;;  %v4629_v22 = vmov 0.0   ;;  %v4631_v23 = vmov 0.0  }
  0x27 LB: >> { %s182_s26 = sld [smem:[#allocation12 + %s4288_s7]]  ;;  %s192_s27 = smul.u32 6, %s4288_s7  ;;  %s4288_s7 = sphi %s4633_s7, %s157_s7   ;;  %v4284_v23 = vphi %v4631_v23, %v6375_v23   ;;  %v4280_v22 = vphi %v4629_v22, %v6374_v22   ;;  %v4276_v21 = vphi %v4627_v21, %v6373_v21   ;;  %v4272_v20 = vphi %v4625_v20, %v6372_v20   ;;  %v4268_v19 = vphi %v4623_v19, %v6371_v19   ;;  %v4264_v18 = vphi %v4621_v18, %v6370_v18   ;;  %v4260_v17 = vphi %v4619_v17, %v6369_v17   ;;  %v4256_v16 = vphi %v4617_v16, %v6368_v16   ;;  %v4252_v15 = vphi %v4615_v15, %v6367_v15   ;;  %v4248_v14 = vphi %v4613_v14, %v6366_v14   ;;  %v4244_v13 = vphi %v4611_v13, %v6365_v13   ;;  %v4240_v12 = vphi %v4609_v12, %v6364_v12   ;;  %v4236_v11 = vphi %v4607_v11, %v6363_v11   ;;  %v4232_v10 = vphi %v4605_v10, %v6362_v10   ;;  %v4228_v9 = vphi %v4603_v9, %v6361_v9   ;;  %v4224_v8 = vphi %v4601_v8, %v6360_v8   ;;  %v4220_v7 = vphi %v4599_v7, %v6359_v7   ;;  %v4216_v6 = vphi %v4597_v6, %v6358_v6   ;;  %v4212_v5 = vphi %v4595_v5, %v6357_v5   ;;  %v4208_v4 = vphi %v4593_v4, %v6356_v4   ;;  %v4204_v3 = vphi %v4591_v3, %v6355_v3   ;;  %v4200_v2 = vphi %v4589_v2, %v6354_v2   ;;  %v4196_v1 = vphi %v4587_v1, %v6353_v1   ;;  %v4192_v0 = vphi %v4585_v0, %v6352_v0  }
  0x28   : >> { %s187_s28 = sld [smem:[#allocation13 + %s4288_s7]]  ;;  %s157_s7 = sadd.s32 1, %s4288_s7  }
  0x29   : >> { %s193_s4 = sld [smem:[#allocation9 + %s192_s27]]  ;;  %s199_s29 = sadd.s32 1, %s192_s27 }
  0x2a   : >> { %s200_s30 = sld [smem:[#allocation9 + %s199_s29]]  ;;  %s206_s15 = sadd.s32 2, %s192_s27 }
  0x2b   : >> { %s207_s16 = sld [smem:[#allocation9 + %s206_s15]]  ;;  %s213_s6 = sadd.s32 3, %s192_s27 }
  0x2c   : >> { %s214_s17 = sld [smem:[#allocation9 + %s213_s6]]  ;;  %s220_s18 = sadd.s32 4, %s192_s27 }
  0x2d   : >> { %s183_s19 = sadd.s32 %s4583_s5, %s182_s26  ;;  %s221_s0 = sld [smem:[#allocation9 + %s220_s18]] }
  0x2e   : >> { %s188_s20 = sadd.s32 %s4583_s5, %s187_s28  ;;  %s184_s21 = scalar_lea.vmem [#allocation6], %s183_s19 }
  0x2f   : >> { %v185_v24 = vld [vmem:[%s184_s21] sm:$0xff]  ;;  %v186_v25 = vld [vmem:[%s184_s21 + $0x8] sm:$0xff]  ;;  %s227_s22 = sadd.s32 5, %s192_s27  ;;  %v194_v26 = vstv %s193_s4  ;;  %s189_s24 = scalar_lea.vmem [#allocation6], %s188_s20 }
  0x30   : >> { %s228_s23 = sld [smem:[#allocation9 + %s227_s22]]  ;;  %v201_v27 = vstv %s200_s30  ;;  %v195_v29 = vmul.f32 %v194_v26, %v185_v24  ;;  %v196_v30 = vmul.f32 %v194_v26, %v186_v25  ;;  %v190_v33 = vld [vmem:[%s189_s24] sm:$0xff]  ;;  %v191_v42 = vld [vmem:[%s189_s24 + $0x8] sm:$0xff]  ;;  %p4750_p0 = scmp.ge.s32.totalorder %s157_s7, 25  }
  0x31   : >> { %v208_v28 = vstv %s207_s16  ;;  %v202_v31 = vmul.f32 %v201_v27, %v185_v24  ;;  %v203_v32 = vmul.f32 %v201_v27, %v186_v25  ;;  %v234_v50 = vmul.f32 %v194_v26, %v190_v33  ;;  %s258_s1 = sld [smem:[#allocation10]] (%p4750_p0)  ;;  %s4831_s7 = scalar_lea.vmem (%p4750_p0), [#allocation2], %s4583_s5 }
  0x32   : >> { %v209_v34 = vmul.f32 %v208_v28, %v185_v24  ;;  %v210_v35 = vmul.f32 %v208_v28, %v186_v25  ;;  %v215_v36 = vstv %s214_s17  ;;  %v4695_v23 = vadd.f32 %v4284_v23, %v195_v29   ;;  %s2865_s2 = sld [smem:[#allocation10 + $0x1]] (%p4750_p0)  ;;  %s150_s3 = sadd.s32 (%p4750_p0), 1, %s4188_s3  }
  0x33   : >> { %v222_v37 = vstv %s221_s0  ;;  %v4697_v22 = vadd.f32 %v4280_v22, %v196_v30   ;;  %v4699_v21 = vadd.f32 %v4276_v21, %v202_v31   ;;  %v4701_v20 = vadd.f32 %v4272_v20, %v203_v32   ;;  %s2873_s26 = sld [smem:[#allocation10 + $0x2]] (%p4750_p0)  ;;  %p147_p1 = scmp.ge.s32.totalorder (%p4750_p0), %s150_s3, 21  }
  0x34   : >> { %v6331_v38 = vmov %v4695_v23  ;;  %v4703_v19 = vadd.f32 %v4268_v19, %v209_v34   ;;  %v4705_v18 = vadd.f32 %v4264_v18, %v210_v35   ;;  %v216_v45 = vmul.f32 %v215_v36, %v185_v24  ;;  %s2881_s27 = sld [smem:[#allocation10 + $0x3]] (%p4750_p0) }
  0x35   : >> { %v6332_v39 = vmov %v4697_v22  ;;  %v6333_v40 = vmov %v4699_v21  ;;  %v6334_v41 = vmov %v4701_v20  ;;  %v217_v46 = vmul.f32 %v215_v36, %v186_v25  ;;  %s2889_s28 = sld [smem:[#allocation10 + $0x4]] (%p4750_p0) }
  0x36   : >> { %v6335_v43 = vmov %v4703_v19  ;;  %v6336_v44 = vmov %v4705_v18  ;;  %v223_v47 = vmul.f32 %v222_v37, %v185_v24  ;;  %v224_v48 = vmul.f32 %v222_v37, %v186_v25  ;;  %s2897_s4 = sld [smem:[#allocation10 + $0x5]] (%p4750_p0) }
  0x37   : >> { %v229_v49 = vstv %s228_s23  ;;  %v4707_v17 = vadd.f32 %v4260_v17, %v216_v45   ;;  %v4709_v16 = vadd.f32 %v4256_v16, %v217_v46   ;;  %v235_v57 = vmul.f32 %v194_v26, %v191_v42 }
  0x38   : >> { %v230_v53 = vmul.f32 %v229_v49, %v185_v24  ;;  %v231_v54 = vmul.f32 %v229_v49, %v186_v25  ;;  %v4711_v15 = vadd.f32 %v4252_v15, %v223_v47   ;;  %v4713_v14 = vadd.f32 %v4248_v14, %v224_v48  }
  0x39   : >> { %v6337_v51 = vmov %v4707_v17  ;;  %v6338_v52 = vmov %v4709_v16  ;;  %v236_v58 = vadd.f32 %v4236_v11, %v234_v50   ;;  %v238_v61 = vmul.f32 %v201_v27, %v190_v33 }
  0x3a   : >> { %v6339_v55 = vmov %v4711_v15  ;;  %v6340_v56 = vmov %v4713_v14  ;;  %v4717_v13 = vadd.f32 %v4244_v13, %v230_v53   ;;  %v4720_v12 = vadd.f32 %v4240_v12, %v231_v54  }
  0x3b   : >> { %v239_v62 = vmul.f32 %v201_v27, %v191_v42  ;;  %v237_v63 = vadd.f32 %v4232_v10, %v235_v57   ;;  %v242_v16 = vmul.f32 %v208_v28, %v190_v33  ;;  %v243_v17 = vmul.f32 %v208_v28, %v191_v42 }
  0x3c   : >> { %v6341_v59 = vmov %v4717_v13  ;;  %v6342_v60 = vmov %v4720_v12  ;;  %v246_v18 = vmul.f32 %v215_v36, %v190_v33  ;;  %v240_v24 = vadd.f32 %v4228_v9, %v238_v61  }
  0x3d   : >> { %v241_v25 = vadd.f32 %v4224_v8, %v239_v62   ;;  %v247_v14 = vmul.f32 %v215_v36, %v191_v42  ;;  %v250_v15 = vmul.f32 %v222_v37, %v190_v33  ;;  %v4726_v7 = vadd.f32 %v4220_v7, %v242_v16  }
  0x3e   : >> { %v4729_v6 = vadd.f32 %v4216_v6, %v243_v17   ;;  %v4732_v5 = vadd.f32 %v4212_v5, %v246_v18   ;;  %v251_v11 = vmul.f32 %v222_v37, %v191_v42  ;;  %v254_v9 = vmul.f32 %v229_v49, %v190_v33 }
  0x3f   : >> { %v6343_v26 = vmov %v4726_v7  ;;  %v4735_v4 = vadd.f32 %v4208_v4, %v247_v14   ;;  %v4738_v3 = vadd.f32 %v4204_v3, %v250_v15   ;;  %v255_v8 = vmul.f32 %v229_v49, %v191_v42 }
  0x40   : >> { %v6344_v29 = vmov %v4729_v6  ;;  %v6345_v27 = vmov %v4732_v5  ;;  %v4741_v2 = vadd.f32 %v4200_v2, %v251_v11   ;;  %v4744_v1 = vadd.f32 %v4196_v1, %v254_v9  }
  0x41   : >> { %v6346_v28 = vmov %v4735_v4  ;;  %v6347_v30 = vmov %v4738_v3  ;;  %v4747_v0 = vadd.f32 %v4192_v0, %v255_v8   ;;  %v6357_v5 = vmov %v6345_v27 }
  0x42   : >> { %v6348_v31 = vmov %v4741_v2  ;;  %v6349_v32 = vmov %v4744_v1  ;;  %v6355_v3 = vmov %v6347_v30  ;;  %v6356_v4 = vmov %v6346_v28 }
  0x43   : >> { %v6350_v34 = vmov %v4747_v0  ;;  %v6353_v1 = vmov %v6349_v32  ;;  %v6354_v2 = vmov %v6348_v31  ;;  %v6358_v6 = vmov %v6344_v29 }
  0x44   : >> { %v6352_v0 = vmov %v6350_v34  ;;  %v6359_v7 = vmov %v6343_v26  ;;  %v6360_v8 = vmov %v241_v25  ;;  %v6361_v9 = vmov %v240_v24  ;;  %156 = sbr.rel (!%p4750_p0) target bundleno = 39 (0x27), region = 396 }
  0x45   : >> { %v6362_v10 = vmov %v237_v63  ;;  %v6363_v11 = vmov %v236_v58  ;;  %v6364_v12 = vmov %v6342_v60  ;;  %v6365_v13 = vmov %v6341_v59 }
  0x46   : >> { %v6366_v14 = vmov %v6340_v56  ;;  %v6367_v15 = vmov %v6339_v55  ;;  %v6368_v16 = vmov %v6338_v52  ;;  %v6369_v17 = vmov %v6337_v51 }
  0x47   : >> { %v6370_v18 = vmov %v6336_v44  ;;  %v6371_v19 = vmov %v6335_v43  ;;  %v6372_v20 = vmov %v6334_v41  ;;  %v6373_v21 = vmov %v6333_v40 }
  0x48   : >> { %v6374_v22 = vmov %v6332_v39  ;;  %v6375_v23 = vmov %v6331_v38  ;;  %v278_v42 = vstv (%p4750_p0), %s2865_s2  ;;  %v298_v45 = vstv (%p4750_p0), %s2873_s26 }
  0x49   : > { %v259_v23 = vstv %s258_s1  ;;  %v279_v0 = vadd.f32 %v278_v42, %v6333_v40  ;;  %v280_v1 = vadd.f32 %v278_v42, %v6334_v41  ;;  %v289_v2 = vadd.f32 %v278_v42, %v240_v24  ;;  %s4290_s5 = smov (%p147_p1), 0  }
  0x4a   : > { %v260_v33 = vadd.f32 %v259_v23, %v6331_v38  ;;  %v261_v35 = vadd.f32 %v259_v23, %v6332_v39  ;;  %v269_v36 = vadd.f32 %v259_v23, %v236_v58  ;;  %v270_v37 = vadd.f32 %v259_v23, %v237_v63 }
  0x4b   : > { %v290_v3 = vadd.f32 %v278_v42, %v241_v25  ;;  %v299_v4 = vadd.f32 %v298_v45, %v6335_v43  ;;  %v281_v5 = vmax.f32 %v279_v0, 0.0  ;;  %v282_v6 = vmax.f32 %v280_v1, 0.0 }
  0x4c   : > { %v262_v46 = vmax.f32 %v260_v33, 0.0  ;;  %v263_v47 = vmax.f32 %v261_v35, 0.0  ;;  %v271_v48 = vmax.f32 %v269_v36, 0.0  ;;  %v272_v49 = vmax.f32 %v270_v37, 0.0 }
  0x4d   : > { %v300_v7 = vadd.f32 %v298_v45, %v6336_v44  ;;  %v291_v10 = vmax.f32 %v289_v2, 0.0  ;;  %v309_v12 = vadd.f32 %v298_v45, %v6343_v26  ;;  %v292_v13 = vmax.f32 %v290_v3, 0.0  ;;  %2867 = vst [vmem:[%s4831_s7 + $0x2a0] sm:$0xff] %v281_v5 }
  0x4e   : > { %265 = vst [vmem:[%s4831_s7] sm:$0xff] %v262_v46  ;;  %v310_v19 = vadd.f32 %v298_v45, %v6344_v29  ;;  %v318_v20 = vstv %s2881_s27  ;;  %v301_v21 = vmax.f32 %v299_v4, 0.0  ;;  %v338_v40 = vstv %s2889_s28 }
  0x4f   : > { %266 = vst [vmem:[%s4831_s7 + $0x8] sm:$0xff] %v263_v47  ;;  %v319_v22 = vadd.f32 %v318_v20, %v6337_v51  ;;  %v302_v38 = vmax.f32 %v300_v7, 0.0  ;;  %v320_v39 = vadd.f32 %v318_v20, %v6338_v52  ;;  %v311_v41 = vmax.f32 %v309_v12, 0.0 }
  0x50   : > { %2863 = vst [vmem:[%s4831_s7 + $0x150] sm:$0xff] %v271_v48  ;;  %v329_v43 = vadd.f32 %v318_v20, %v6345_v27  ;;  %v312_v44 = vmax.f32 %v310_v19, 0.0  ;;  %v330_v50 = vadd.f32 %v318_v20, %v6346_v28  ;;  %v339_v51 = vadd.f32 %v338_v40, %v6339_v55 }
  0x51   : > { %2864 = vst [vmem:[%s4831_s7 + $0x158] sm:$0xff] %v272_v49  ;;  %v321_v53 = vmax.f32 %v319_v22, 0.0  ;;  %v322_v54 = vmax.f32 %v320_v39, 0.0  ;;  %v340_v52 = vadd.f32 %v338_v40, %v6340_v56  ;;  %v358_v57 = vstv %s2897_s4 }
  0x52   : > { %2868 = vst [vmem:[%s4831_s7 + $0x2a8] sm:$0xff] %v282_v6  ;;  %v331_v58 = vmax.f32 %v329_v43, 0.0  ;;  %v349_v61 = vadd.f32 %v338_v40, %v6347_v30  ;;  %v332_v62 = vmax.f32 %v330_v50, 0.0  ;;  %v350_v63 = vadd.f32 %v338_v40, %v6348_v31 }
  0x53   : > { %2871 = vst [vmem:[%s4831_s7 + $0x3f0] sm:$0xff] %v291_v10  ;;  %v341_v55 = vmax.f32 %v339_v51, 0.0  ;;  %v359_v16 = vadd.f32 %v358_v57, %v6341_v59  ;;  %v342_v56 = vmax.f32 %v340_v52, 0.0  ;;  %v360_v17 = vadd.f32 %v358_v57, %v6342_v60 }
  0x54   : > { %2872 = vst [vmem:[%s4831_s7 + $0x3f8] sm:$0xff] %v292_v13  ;;  %v351_v18 = vmax.f32 %v349_v61, 0.0  ;;  %v369_v24 = vadd.f32 %v358_v57, %v6349_v32  ;;  %v352_v25 = vmax.f32 %v350_v63, 0.0  ;;  %v370_v14 = vadd.f32 %v358_v57, %v6350_v34 }
  0x55   : > { %2875 = vst [vmem:[%s4831_s7 + $0x540] sm:$0xff] %v301_v21  ;;  %v361_v15 = vmax.f32 %v359_v16, 0.0  ;;  %v362_v59 = vmax.f32 %v360_v17, 0.0  ;;  %v4476_v60 = vmov (%p147_p1), 0.0  }
  0x56   : > { %2876 = vst [vmem:[%s4831_s7 + $0x548] sm:$0xff] %v302_v38  ;;  %v371_v26 = vmax.f32 %v369_v24, 0.0  ;;  %v372_v29 = vmax.f32 %v370_v14, 0.0 }
  0x57   : > { %2879 = vst [vmem:[%s4831_s7 + $0x690] sm:$0xff] %v311_v41 }
  0x58   : > { %2880 = vst [vmem:[%s4831_s7 + $0x698] sm:$0xff] %v312_v44 }
  0x59   : > { %2883 = vst [vmem:[%s4831_s7 + $0x7e0] sm:$0xff] %v321_v53 }
  0x5a   : > { %2884 = vst [vmem:[%s4831_s7 + $0x7e8] sm:$0xff] %v322_v54 }
  0x5b   : > { %2887 = vst [vmem:[%s4831_s7 + $0x930] sm:$0xff] %v331_v58 }
  0x5c   : > { %2888 = vst [vmem:[%s4831_s7 + $0x938] sm:$0xff] %v332_v62 }
  0x5d   : > { %2891 = vst [vmem:[%s4831_s7 + $0xa80] sm:$0xff] %v341_v55 }
  0x5e   : > { %2892 = vst [vmem:[%s4831_s7 + $0xa88] sm:$0xff] %v342_v56 }
  0x5f   : > { %2895 = vst [vmem:[%s4831_s7 + $0xbd0] sm:$0xff] %v351_v18 }
  0x60   : > { %2896 = vst [vmem:[%s4831_s7 + $0xbd8] sm:$0xff] %v352_v25  ;;  %149 = sbr.rel (!%p147_p1) target bundleno = 33 (0x21), region = 407 }
  0x61   : > { %2899 = vst [vmem:[%s4831_s7 + $0xd20] sm:$0xff] %v361_v15 }
  0x62   : > { %2900 = vst [vmem:[%s4831_s7 + $0xd28] sm:$0xff] %v362_v59 }
  0x63   : > { %2903 = vst [vmem:[%s4831_s7 + $0xe70] sm:$0xff] %v371_v26 }
  0x64   : > { %2904 = vst [vmem:[%s4831_s7 + $0xe78] sm:$0xff] %v372_v29 }
  0x65   :  { %377 = vst [vmem:[#allocation3 + $0x360] sm:$0xff] %v4476_v60 }
  0x66   :  { %378 = vst [vmem:[#allocation3 + $0x368] sm:$0xff] %v4476_v60 }
  0x67 LB: > { %s385_s29 = smul.u32 28, %s4292_s5  ;;  %s4292_s5 = sphi %s4290_s5, %s384_s5  }
  0x68   : > { %s407_s30 = smul.u32 12, %s4292_s5  ;;  %s384_s5 = sadd.s32 1, %s4292_s5  }
  0x69   : > { %s387_s15 = scalar_lea.vmem [#allocation2], %s385_s29  ;;  %p381_p2 = scmp.ge.s32.totalorder %s384_s5, 12  }
  0x6a   : > { %s408_s3 = scalar_lea.vmem [#allocation3], %s407_s30  ;;  %s4294_s16 = smov (%p381_p2), 0  }
  0x6b   : > { %v388_v27 = vld [vmem:[%s387_s15] sm:$0xff]  ;;  %v2905_v11 = vld [vmem:[%s387_s15 + $0x150] sm:$0xff]  ;;  %v389_v8 = vld [vmem:[%s387_s15 + $0x8] sm:$0xf] }
  0x6c   : > { %v2907_v28 = vld [vmem:[%s387_s15 + $0xe] sm:$0xff]  ;;  %v394_v30 = vmax.f32 %v388_v27, %v2905_v11  ;;  %v2909_v9 = vld [vmem:[%s387_s15 + $0x15e] sm:$0xff]  ;;  %v2906_v31 = vld [vmem:[%s387_s15 + $0x158] sm:$0xf] }
  0x6d   : > { %v403_v32 = vmax.f32 %v2907_v28, %v2909_v9  ;;  %v395_v34 = vmax.f32 %v389_v8, %v2906_v31  ;;  %v2908_v23 = vld [vmem:[%s387_s15 + $0x16] sm:$0xf]  ;;  %v2910_v33 = vld [vmem:[%s387_s15 + $0x166] sm:$0xf] }
  0x6e   : > { %v404_v35 = vmax.f32 %v2908_v23, %v2910_v33  ;;  %383 = sbr.rel (!%p381_p2) target bundleno = 103 (0x67), region = 418 }
  0x6f   : > { %v405_v36 = vmax.f32 %v394_v30, %v403_v32 }
  0x70   : > { %v406_v37 = vmax.f32 %v395_v34, %v404_v35 }
  0x71   : > { %409 = vst [vmem:[%s408_s3] sm:$0xff] %v405_v36 }
  0x72   : > { %410 = vst [vmem:[%s408_s3 + $0x8] sm:$0xf] %v406_v37 }
  0x73 LB: > { %s2248_s6 = smul.u32 28, %s4296_s16  ;;  %s4296_s16 = sphi %s4294_s16, %s416_s16  }
  0x74   : > { %s2260_s17 = smul.u32 12, %s4296_s16  ;;  %s416_s16 = sadd.s32 1, %s4296_s16  }
  0x75   : > { %s2249_s18 = scalar_lea.vmem [#allocation2], %s2248_s6  ;;  %p413_p3 = scmp.ge.s32.totalorder %s416_s16, 12  }
  0x76   : > { %v2911_v42 = vld [vmem:[%s2249_s18 + $0x2a0] sm:$0xff]  ;;  %v2913_v45 = vld [vmem:[%s2249_s18 + $0x3f0] sm:$0xff]  ;;  %v2912_v49 = vld [vmem:[%s2249_s18 + $0x2a8] sm:$0xf]  ;;  %s2261_s19 = scalar_lea.vmem [#allocation3], %s2260_s17  ;;  %s4298_s0 = smov (%p413_p3), 0  }
  0x77   : > { %v2915_v46 = vld [vmem:[%s2249_s18 + $0x2ae] sm:$0xff]  ;;  %v426_v47 = vmax.f32 %v2911_v42, %v2913_v45  ;;  %v2917_v48 = vld [vmem:[%s2249_s18 + $0x3fe] sm:$0xff]  ;;  %v2914_v0 = vld [vmem:[%s2249_s18 + $0x3f8] sm:$0xf] }
  0x78   : > { %v436_v1 = vmax.f32 %v2915_v46, %v2917_v48  ;;  %v427_v2 = vmax.f32 %v2912_v49, %v2914_v0  ;;  %v2916_v3 = vld [vmem:[%s2249_s18 + $0x2b6] sm:$0xf]  ;;  %v2918_v4 = vld [vmem:[%s2249_s18 + $0x406] sm:$0xf] }
  0x79   : > { %v437_v5 = vmax.f32 %v2916_v3, %v2918_v4  ;;  %415 = sbr.rel (!%p413_p3) target bundleno = 115 (0x73), region = 429 }
  0x7a   : > { %v438_v6 = vmax.f32 %v426_v47, %v436_v1 }
  0x7b   : > { %v439_v7 = vmax.f32 %v427_v2, %v437_v5 }
  0x7c   : > { %2919 = vst [vmem:[%s2261_s19 + $0x90] sm:$0xff] %v438_v6 }
  0x7d   : > { %2920 = vst [vmem:[%s2261_s19 + $0x98] sm:$0xf] %v439_v7 }
  0x7e LB: > { %s2263_s20 = smul.u32 28, %s4300_s0  ;;  %s4300_s0 = sphi %s4298_s0, %s450_s0  }
  0x7f   : > { %s2275_s21 = smul.u32 12, %s4300_s0  ;;  %s450_s0 = sadd.s32 1, %s4300_s0  }
  0x80   : > { %s2264_s22 = scalar_lea.vmem [#allocation2], %s2263_s20  ;;  %p447_p4 = scmp.ge.s32.totalorder %s450_s0, 12  }
  0x81   : > { %v2921_v10 = vld [vmem:[%s2264_s22 + $0x540] sm:$0xff]  ;;  %v2923_v12 = vld [vmem:[%s2264_s22 + $0x690] sm:$0xff]  ;;  %v2922_v21 = vld [vmem:[%s2264_s22 + $0x548] sm:$0xf]  ;;  %s2276_s23 = scalar_lea.vmem [#allocation3], %s2275_s21  ;;  %s4302_s24 = smov (%p447_p4), 0  }
  0x82   : > { %v2925_v13 = vld [vmem:[%s2264_s22 + $0x54e] sm:$0xff]  ;;  %v460_v19 = vmax.f32 %v2921_v10, %v2923_v12  ;;  %v2927_v20 = vld [vmem:[%s2264_s22 + $0x69e] sm:$0xff]  ;;  %v2924_v22 = vld [vmem:[%s2264_s22 + $0x698] sm:$0xf] }
  0x83   : > { %v470_v38 = vmax.f32 %v2925_v13, %v2927_v20  ;;  %v461_v39 = vmax.f32 %v2922_v21, %v2924_v22  ;;  %v2926_v40 = vld [vmem:[%s2264_s22 + $0x556] sm:$0xf]  ;;  %v2928_v41 = vld [vmem:[%s2264_s22 + $0x6a6] sm:$0xf] }
  0x84   : > { %v471_v43 = vmax.f32 %v2926_v40, %v2928_v41  ;;  %449 = sbr.rel (!%p447_p4) target bundleno = 126 (0x7e), region = 440 }
  0x85   : > { %v472_v44 = vmax.f32 %v460_v19, %v470_v38 }
  0x86   : > { %v473_v50 = vmax.f32 %v461_v39, %v471_v43 }
  0x87   : > { %2929 = vst [vmem:[%s2276_s23 + $0x120] sm:$0xff] %v472_v44 }
  0x88   : > { %2930 = vst [vmem:[%s2276_s23 + $0x128] sm:$0xf] %v473_v50 }
  0x89 LB: > { %s2278_s25 = smul.u32 28, %s4304_s24  ;;  %s4304_s24 = sphi %s4302_s24, %s484_s24  }
  0x8a   : > { %s2290_s1 = smul.u32 12, %s4304_s24  ;;  %s484_s24 = sadd.s32 1, %s4304_s24  }
  0x8b   : > { %s2279_s2 = scalar_lea.vmem [#allocation2], %s2278_s25  ;;  %p481_p5 = scmp.ge.s32.totalorder %s484_s24, 12  }
  0x8c   : > { %v2931_v53 = vld [vmem:[%s2279_s2 + $0x7e0] sm:$0xff]  ;;  %v2933_v51 = vld [vmem:[%s2279_s2 + $0x930] sm:$0xff]  ;;  %v2932_v58 = vld [vmem:[%s2279_s2 + $0x7e8] sm:$0xf]  ;;  %s2291_s26 = scalar_lea.vmem [#allocation3], %s2290_s1  ;;  %s4306_s27 = smov (%p481_p5), 0  }
  0x8d   : > { %v2935_v54 = vld [vmem:[%s2279_s2 + $0x7ee] sm:$0xff]  ;;  %v494_v52 = vmax.f32 %v2931_v53, %v2933_v51  ;;  %v2937_v57 = vld [vmem:[%s2279_s2 + $0x93e] sm:$0xff]  ;;  %v2934_v61 = vld [vmem:[%s2279_s2 + $0x938] sm:$0xf] }
  0x8e   : > { %v504_v62 = vmax.f32 %v2935_v54, %v2937_v57  ;;  %v495_v63 = vmax.f32 %v2932_v58, %v2934_v61  ;;  %v2936_v55 = vld [vmem:[%s2279_s2 + $0x7f6] sm:$0xf]  ;;  %v2938_v16 = vld [vmem:[%s2279_s2 + $0x946] sm:$0xf] }
  0x8f   : > { %v505_v56 = vmax.f32 %v2936_v55, %v2938_v16  ;;  %483 = sbr.rel (!%p481_p5) target bundleno = 137 (0x89), region = 451 }
  0x90   : > { %v506_v17 = vmax.f32 %v494_v52, %v504_v62 }
  0x91   : > { %v507_v18 = vmax.f32 %v495_v63, %v505_v56 }
  0x92   : > { %2939 = vst [vmem:[%s2291_s26 + $0x1b0] sm:$0xff] %v506_v17 }
  0x93   : > { %2940 = vst [vmem:[%s2291_s26 + $0x1b8] sm:$0xf] %v507_v18 }
  0x94 LB: > { %s2293_s28 = smul.u32 28, %s4308_s27  ;;  %s4308_s27 = sphi %s4306_s27, %s518_s27  }
  0x95   : > { %s2305_s7 = smul.u32 12, %s4308_s27  ;;  %s518_s27 = sadd.s32 1, %s4308_s27  }
  0x96   : > { %s2294_s4 = scalar_lea.vmem [#allocation2], %s2293_s28  ;;  %p515_p6 = scmp.ge.s32.totalorder %s518_s27, 12  }
  0x97   : > { %v2941_v24 = vld [vmem:[%s2294_s4 + $0xa80] sm:$0xff]  ;;  %v2943_v25 = vld [vmem:[%s2294_s4 + $0xbd0] sm:$0xff]  ;;  %v2942_v26 = vld [vmem:[%s2294_s4 + $0xa88] sm:$0xf]  ;;  %s2306_s5 = scalar_lea.vmem [#allocation3], %s2305_s7  ;;  %s4310_s29 = smov (%p515_p6), 0  }
  0x98   : > { %v2945_v14 = vld [vmem:[%s2294_s4 + $0xa8e] sm:$0xff]  ;;  %v528_v15 = vmax.f32 %v2941_v24, %v2943_v25  ;;  %v2947_v59 = vld [vmem:[%s2294_s4 + $0xbde] sm:$0xff]  ;;  %v2944_v29 = vld [vmem:[%s2294_s4 + $0xbd8] sm:$0xf] }
  0x99   : > { %v538_v60 = vmax.f32 %v2945_v14, %v2947_v59  ;;  %v529_v27 = vmax.f32 %v2942_v26, %v2944_v29  ;;  %v2946_v11 = vld [vmem:[%s2294_s4 + $0xa96] sm:$0xf]  ;;  %v2948_v28 = vld [vmem:[%s2294_s4 + $0xbe6] sm:$0xf] }
  0x9a   : > { %v539_v30 = vmax.f32 %v2946_v11, %v2948_v28  ;;  %517 = sbr.rel (!%p515_p6) target bundleno = 148 (0x94), region = 462 }
  0x9b   : > { %v540_v9 = vmax.f32 %v528_v15, %v538_v60 }
  0x9c   : > { %v541_v8 = vmax.f32 %v529_v27, %v539_v30 }
  0x9d   : > { %2949 = vst [vmem:[%s2306_s5 + $0x240] sm:$0xff] %v540_v9 }
  0x9e   : > { %2950 = vst [vmem:[%s2306_s5 + $0x248] sm:$0xf] %v541_v8 }
  0x9f LB: > { %s2308_s30 = smul.u32 28, %s4312_s29  ;;  %s4312_s29 = sphi %s4310_s29, %s552_s29  }
  0xa0   : > { %s2320_s15 = smul.u32 12, %s4312_s29  ;;  %s552_s29 = sadd.s32 1, %s4312_s29  }
  0xa1   : > { %s2309_s3 = scalar_lea.vmem [#allocation2], %s2308_s30  ;;  %p549_p7 = scmp.ge.s32.totalorder %s552_s29, 12  }
  0xa2   : > { %v2951_v31 = vld [vmem:[%s2309_s3 + $0xd20] sm:$0xff]  ;;  %v2953_v32 = vld [vmem:[%s2309_s3 + $0xe70] sm:$0xff]  ;;  %v2952_v35 = vld [vmem:[%s2309_s3 + $0xd28] sm:$0xf]  ;;  %s2321_s16 = scalar_lea.vmem [#allocation3], %s2320_s15  ;;  %s4876_s6 = smov (%p549_p7), 0  }
  0xa3   : > { %v2955_v34 = vld [vmem:[%s2309_s3 + $0xd2e] sm:$0xff]  ;;  %v562_v23 = vmax.f32 %v2951_v31, %v2953_v32  ;;  %v2957_v33 = vld [vmem:[%s2309_s3 + $0xe7e] sm:$0xff]  ;;  %v2954_v36 = vld [vmem:[%s2309_s3 + $0xe78] sm:$0xf] }
  0xa4   : > { %v572_v37 = vmax.f32 %v2955_v34, %v2957_v33  ;;  %v563_v42 = vmax.f32 %v2952_v35, %v2954_v36  ;;  %v2956_v45 = vld [vmem:[%s2309_s3 + $0xd36] sm:$0xf]  ;;  %v2958_v46 = vld [vmem:[%s2309_s3 + $0xe86] sm:$0xf] }
  0xa5   : > { %v573_v47 = vmax.f32 %v2956_v45, %v2958_v46  ;;  %551 = sbr.rel (!%p549_p7) target bundleno = 159 (0x9f), region = 473 }
  0xa6   : > { %v574_v48 = vmax.f32 %v562_v23, %v572_v37 }
  0xa7   : > { %v575_v49 = vmax.f32 %v563_v42, %v573_v47 }
  0xa8   : > { %2959 = vst [vmem:[%s2321_s16 + $0x2d0] sm:$0xff] %v574_v48 }
  0xa9   : > { %2960 = vst [vmem:[%s2321_s16 + $0x2d8] sm:$0xf] %v575_v49 }
  0xaa LB: > { %s2961_s17 = sshll.u32 %s4316_s6, 4  ;;  %v4882_v0 = vmov 0.0   ;;  %v4884_v1 = vmov 0.0   ;;  %v4886_v2 = vmov 0.0   ;;  %v4888_v3 = vmov 0.0   ;;  %s4930_s18 = smov 0   ;;  %s4316_s6 = sphi %s4876_s6, %s586_s6  }
  0xab   : > { %v4890_v4 = vmov 0.0   ;;  %v4892_v5 = vmov 0.0   ;;  %v4894_v6 = vmov 0.0   ;;  %v4896_v7 = vmov 0.0  }
  0xac   : > { %v4898_v10 = vmov 0.0   ;;  %v4900_v12 = vmov 0.0   ;;  %v4902_v13 = vmov 0.0   ;;  %v4904_v19 = vmov 0.0  }
  0xad   : > { %v4906_v20 = vmov 0.0   ;;  %v4908_v21 = vmov 0.0   ;;  %v4910_v22 = vmov 0.0   ;;  %v4912_v38 = vmov 0.0  }
  0xae   : > { %v4914_v39 = vmov 0.0   ;;  %v4916_v40 = vmov 0.0   ;;  %v4918_v41 = vmov 0.0   ;;  %v4920_v43 = vmov 0.0  }
  0xaf   : > { %v4922_v44 = vmov 0.0   ;;  %v4924_v50 = vmov 0.0   ;;  %v4926_v53 = vmov 0.0   ;;  %v4928_v51 = vmov 0.0  }
  0xb0 LB: >> { %s618_s19 = sld [smem:[#allocation18 + %s4416_s18]]  ;;  %s4997_s0 = smul.u32 12, %s4416_s18  ;;  %s4416_s18 = sphi %s4930_s18, %s593_s18   ;;  %v4412_v51 = vphi %v4928_v51, %v6421_v51   ;;  %v4408_v53 = vphi %v4926_v53, %v6420_v53   ;;  %v4404_v50 = vphi %v4924_v50, %v6419_v50   ;;  %v4400_v44 = vphi %v4922_v44, %v6418_v44   ;;  %v4396_v43 = vphi %v4920_v43, %v6417_v43   ;;  %v4392_v41 = vphi %v4918_v41, %v6416_v41   ;;  %v4388_v40 = vphi %v4916_v40, %v6415_v40   ;;  %v4384_v39 = vphi %v4914_v39, %v6414_v39   ;;  %v4380_v38 = vphi %v4912_v38, %v6413_v38   ;;  %v4376_v22 = vphi %v4910_v22, %v6412_v22   ;;  %v4372_v21 = vphi %v4908_v21, %v6411_v21   ;;  %v4368_v20 = vphi %v4906_v20, %v6410_v20   ;;  %v4364_v19 = vphi %v4904_v19, %v6409_v19   ;;  %v4360_v13 = vphi %v4902_v13, %v6408_v13   ;;  %v4356_v12 = vphi %v4900_v12, %v6407_v12   ;;  %v4352_v10 = vphi %v4898_v10, %v6406_v10   ;;  %v4348_v7 = vphi %v4896_v7, %v6405_v7   ;;  %v4344_v6 = vphi %v4894_v6, %v6404_v6   ;;  %v4340_v5 = vphi %v4892_v5, %v6403_v5   ;;  %v4336_v4 = vphi %v4890_v4, %v6402_v4   ;;  %v4332_v3 = vphi %v4888_v3, %v6401_v3   ;;  %v4328_v2 = vphi %v4886_v2, %v6400_v2   ;;  %v4324_v1 = vphi %v4884_v1, %v6399_v1   ;;  %v4320_v0 = vphi %v4882_v0, %v6398_v0  }
  0xb1   : >> { %s593_s18 = sadd.s32 1, %s4416_s18  }
  0xb2   : >> { %s624_s20 = sld [smem:[#allocation15 + %s4997_s0]]  ;;  %s630_s21 = sadd.s32 1, %s4997_s0 }
  0xb3   : >> { %s631_s22 = sld [smem:[#allocation15 + %s630_s21]]  ;;  %s637_s23 = sadd.s32 2, %s4997_s0 }
  0xb4   : >> { %s638_s24 = sld [smem:[#allocation15 + %s637_s23]]  ;;  %s644_s25 = sadd.s32 3, %s4997_s0 }
  0xb5   : >> { %s5003_s1 = sld [smem:[#allocation15 + %s644_s25]]  ;;  %s651_s2 = sadd.s32 4, %s4997_s0 }
  0xb6   : >> { %s620_s26 = sadd.s32 %s2961_s17, %s618_s19  ;;  %s5008_s27 = sld [smem:[#allocation15 + %s651_s2]] }
  0xb7   : >> { %s658_s28 = sadd.s32 5, %s4997_s0  ;;  %s5011_s7 = scalar_lea.vmem [#allocation3], %s620_s26 }
  0xb8   : >> { %v5014_v54 = vld [vmem:[%s5011_s7] sm:$0xff]  ;;  %v5017_v52 = vld [vmem:[%s5011_s7 + $0x8] sm:$0xff]  ;;  %s5019_s4 = sld [smem:[#allocation15 + %s658_s28]]  ;;  %s665_s5 = sadd.s32 6, %s4997_s0  ;;  %v625_v57 = vstv %s624_s20 }
  0xb9   : >> { %s5022_s29 = sld [smem:[#allocation15 + %s665_s5]]  ;;  %s672_s30 = sadd.s32 7, %s4997_s0  ;;  %v632_v58 = vstv %s631_s22  ;;  %v626_v62 = vmul.f32 %v625_v57, %v5014_v54  ;;  %v627_v63 = vmul.f32 %v625_v57, %v5017_v52 }
  0xba   : >> { %v639_v61 = vstv %s638_s24  ;;  %s5025_s15 = sld [smem:[#allocation15 + %s672_s30]]  ;;  %s679_s3 = sadd.s32 8, %s4997_s0  ;;  %v633_v55 = vmul.f32 %v632_v58, %v5014_v54  ;;  %v634_v16 = vmul.f32 %v632_v58, %v5017_v52 }
  0xbb   : >> { %s5032_s16 = sld [smem:[#allocation15 + %s679_s3]]  ;;  %s686_s19 = sadd.s32 9, %s4997_s0  ;;  %v640_v56 = vmul.f32 %v639_v61, %v5014_v54  ;;  %v641_v17 = vmul.f32 %v639_v61, %v5017_v52  ;;  %v646_v18 = vstv %s5003_s1  ;;  %v5042_v25 = vadd.f32 %v4412_v51, %v626_v62 }
  0xbc   : >> { %v653_v24 = vstv %s5008_s27  ;;  %s5039_s20 = sld [smem:[#allocation15 + %s686_s19]]  ;;  %s693_s21 = sadd.s32 10, %s4997_s0  ;;  %v5044_v14 = vadd.f32 %v4408_v53, %v627_v63  ;;  %v5046_v15 = vadd.f32 %v4404_v50, %v633_v55  ;;  %v5048_v59 = vadd.f32 %v4400_v44, %v634_v16  ;;  %v5138_v50 = vld [vmem:[%s5011_s7 + $0x90] sm:$0xff]  ;;  %v5141_v53 = vld [vmem:[%s5011_s7 + $0x98] sm:$0xff] }
  0xbd   : >> { %s5050_s22 = sld [smem:[#allocation15 + %s693_s21]]  ;;  %s700_s23 = sadd.s32 11, %s4997_s0  ;;  %v5053_v26 = vadd.f32 %v4396_v43, %v640_v56  ;;  %v5055_v29 = vadd.f32 %v4392_v41, %v641_v17  ;;  %v647_v60 = vmul.f32 %v646_v18, %v5014_v54  ;;  %v648_v27 = vmul.f32 %v646_v18, %v5017_v52 }
  0xbe   : >> { %s5059_s24 = sld [smem:[#allocation15 + %s700_s23]]  ;;  %s712_s25 = sadd.s32 300, %s4997_s0  ;;  %v654_v11 = vmul.f32 %v653_v24, %v5014_v54  ;;  %v655_v28 = vmul.f32 %v653_v24, %v5017_v52  ;;  %v660_v30 = vstv %s5019_s4 }
  0xbf   : >> { %v667_v9 = vstv %s5022_s29  ;;  %s5066_s1 = sld [smem:[#allocation15 + %s712_s25]]  ;;  %s719_s2 = sadd.s32 301, %s4997_s0  ;;  %v5070_v8 = vadd.f32 %v4388_v40, %v647_v60  ;;  %v5073_v31 = vadd.f32 %v4384_v39, %v648_v27  ;;  %v661_v32 = vmul.f32 %v660_v30, %v5014_v54 }
  0xc0   : >> { %v662_v34 = vmul.f32 %v660_v30, %v5017_v52  ;;  %s5077_s26 = sld [smem:[#allocation15 + %s719_s2]]  ;;  %s726_s27 = sadd.s32 302, %s4997_s0  ;;  %v5081_v23 = vadd.f32 %v4380_v38, %v654_v11  ;;  %v5084_v33 = vadd.f32 %v4376_v22, %v655_v28  ;;  %v668_v35 = vmul.f32 %v667_v9, %v5014_v54 }
  0xc1   : >> { %v669_v36 = vmul.f32 %v667_v9, %v5017_v52  ;;  %s5088_s28 = sld [smem:[#allocation15 + %s726_s27]]  ;;  %s733_s4 = sadd.s32 303, %s4997_s0  ;;  %v5092_v37 = vadd.f32 %v4372_v21, %v661_v32  ;;  %v674_v45 = vstv %s5025_s15  ;;  %v681_v46 = vstv %s5032_s16 }
  0xc2   : >> { %v5095_v42 = vadd.f32 %v4368_v20, %v662_v34  ;;  %s740_s5 = sadd.s32 304, %s4997_s0  ;;  %v5101_v47 = vadd.f32 %v4364_v19, %v668_v35  ;;  %v675_v49 = vmul.f32 %v674_v45, %v5014_v54  ;;  %v676_v22 = vmul.f32 %v674_v45, %v5017_v52  ;;  %s5108_s29 = sld [smem:[#allocation15 + %s733_s4]] }
  0xc3   : >> { %v5104_v48 = vadd.f32 %v4360_v13, %v669_v36  ;;  %s747_s30 = sadd.s32 305, %s4997_s0  ;;  %v682_v20 = vmul.f32 %v681_v46, %v5014_v54  ;;  %v683_v21 = vmul.f32 %v681_v46, %v5017_v52  ;;  %v688_v38 = vstv %s5039_s20  ;;  %s5115_s15 = sld [smem:[#allocation15 + %s740_s5]] }
  0xc4   : >> { %v695_v19 = vstv %s5050_s22  ;;  %s754_s3 = sadd.s32 306, %s4997_s0  ;;  %v5119_v13 = vadd.f32 %v4356_v12, %v675_v49  ;;  %v5122_v39 = vadd.f32 %v4352_v10, %v676_v22  ;;  %v689_v40 = vmul.f32 %v688_v38, %v5014_v54  ;;  %s5126_s16 = sld [smem:[#allocation15 + %s747_s30]] }
  0xc5   : >> { %v690_v41 = vmul.f32 %v688_v38, %v5017_v52  ;;  %s761_s19 = sadd.s32 307, %s4997_s0  ;;  %v5130_v43 = vadd.f32 %v4348_v7, %v682_v20  ;;  %v5133_v44 = vadd.f32 %v4344_v6, %v683_v21  ;;  %v696_v12 = vmul.f32 %v695_v19, %v5014_v54  ;;  %s5143_s20 = sld [smem:[#allocation15 + %s754_s3]] }
  0xc6   : >> { %v697_v10 = vmul.f32 %v695_v19, %v5017_v52  ;;  %s768_s21 = sadd.s32 308, %s4997_s0  ;;  %v5147_v7 = vadd.f32 %v4340_v5, %v689_v40  ;;  %v702_v51 = vstv %s5059_s24  ;;  %v714_v57 = vstv %s5066_s1  ;;  %s775_s22 = sadd.s32 309, %s4997_s0 }
  0xc7   : >> { %v5150_v6 = vadd.f32 %v4336_v4, %v690_v41  ;;  %v5156_v58 = vadd.f32 %v4332_v3, %v696_v12  ;;  %v703_v62 = vmul.f32 %v702_v51, %v5014_v54  ;;  %v704_v63 = vmul.f32 %v702_v51, %v5017_v52  ;;  %s5163_s23 = sld [smem:[#allocation15 + %s761_s19]]  ;;  %s782_s25 = sadd.s32 310, %s4997_s0  ;;  %v5288_v51 = vld [vmem:[%s5011_s7 + $0x120] sm:$0xff] }
  0xc8   : >> { %v5159_v61 = vadd.f32 %v4328_v2, %v697_v10  ;;  %v715_v4 = vmul.f32 %v5138_v50, %v714_v57  ;;  %v716_v5 = vmul.f32 %v5141_v53, %v714_v57  ;;  %v721_v55 = vstv %s5077_s26  ;;  %s5170_s24 = sld [smem:[#allocation15 + %s768_s21]]  ;;  %s789_s2 = sadd.s32 311, %s4997_s0  ;;  %v5291_v57 = vld [vmem:[%s5011_s7 + $0x128] sm:$0xff] }
  0xc9   : >> { %v728_v16 = vstv %s5088_s28  ;;  %v5173_v2 = vadd.f32 %v4324_v1, %v703_v62  ;;  %v5176_v3 = vadd.f32 %v4320_v0, %v704_v63  ;;  %v722_v54 = vmul.f32 %v5138_v50, %v721_v55  ;;  %s5180_s1 = sld [smem:[#allocation15 + %s775_s22]]  ;;  %s801_s27 = sadd.s32 600, %s4997_s0 }
  0xca   : >> { %v723_v52 = vmul.f32 %v5141_v53, %v721_v55  ;;  %v5184_v56 = vadd.f32 %v715_v4, %v5042_v25  ;;  %v5187_v17 = vadd.f32 %v716_v5, %v5044_v14  ;;  %v729_v1 = vmul.f32 %v5138_v50, %v728_v16  ;;  %s5191_s26 = sld [smem:[#allocation15 + %s782_s25]]  ;;  %s808_s28 = sadd.s32 601, %s4997_s0 }
  0xcb   : >> { %v730_v18 = vmul.f32 %v5141_v53, %v728_v16  ;;  %v5195_v0 = vadd.f32 %v722_v54, %v5046_v15  ;;  %v735_v25 = vstv %s5108_s29  ;;  %v742_v60 = vstv %s5115_s15  ;;  %s5211_s4 = sld [smem:[#allocation15 + %s789_s2]]  ;;  %s815_s5 = sadd.s32 602, %s4997_s0 }
  0xcc   : >> { %v5198_v24 = vadd.f32 %v723_v52, %v5048_v59  ;;  %v5204_v14 = vadd.f32 %v729_v1, %v5053_v26  ;;  %v736_v11 = vmul.f32 %v5138_v50, %v735_v25  ;;  %v737_v28 = vmul.f32 %v5141_v53, %v735_v25  ;;  %s5218_s29 = sld [smem:[#allocation15 + %s801_s27]]  ;;  %s822_s15 = sadd.s32 603, %s4997_s0 }
  0xcd   : >> { %v5207_v27 = vadd.f32 %v730_v18, %v5055_v29  ;;  %v743_v15 = vmul.f32 %v5138_v50, %v742_v60  ;;  %v744_v59 = vmul.f32 %v5141_v53, %v742_v60  ;;  %v749_v30 = vstv %s5126_s16  ;;  %s5228_s30 = sld [smem:[#allocation15 + %s808_s28]]  ;;  %s829_s16 = sadd.s32 604, %s4997_s0 }
  0xce   : >> { %v756_v9 = vstv %s5143_s20  ;;  %v5221_v26 = vadd.f32 %v736_v11, %v5070_v8  ;;  %v5224_v29 = vadd.f32 %v737_v28, %v5073_v31  ;;  %v750_v32 = vmul.f32 %v5138_v50, %v749_v30  ;;  %s5239_s3 = sld [smem:[#allocation15 + %s815_s5]]  ;;  %s836_s19 = sadd.s32 605, %s4997_s0 }
  0xcf   : >> { %v751_v34 = vmul.f32 %v5141_v53, %v749_v30  ;;  %v5232_v35 = vadd.f32 %v743_v15, %v5081_v23  ;;  %v5235_v36 = vadd.f32 %v744_v59, %v5084_v33  ;;  %v757_v8 = vmul.f32 %v5138_v50, %v756_v9  ;;  %s5259_s20 = sld [smem:[#allocation15 + %s822_s15]]  ;;  %s843_s21 = sadd.s32 606, %s4997_s0 }
  0xd0   : >> { %v758_v45 = vmul.f32 %v5141_v53, %v756_v9  ;;  %v5243_v31 = vadd.f32 %v750_v32, %v5092_v37  ;;  %v763_v23 = vstv %s5163_s23  ;;  %v770_v49 = vstv %s5170_s24  ;;  %s5266_s22 = sld [smem:[#allocation15 + %s829_s16]]  ;;  %s850_s25 = sadd.s32 607, %s4997_s0 }
  0xd1   : >> { %v5246_v46 = vadd.f32 %v751_v34, %v5095_v42  ;;  %v5252_v33 = vadd.f32 %v757_v8, %v5101_v47  ;;  %v764_v20 = vmul.f32 %v5138_v50, %v763_v23  ;;  %v765_v21 = vmul.f32 %v5141_v53, %v763_v23  ;;  %s5276_s23 = sld [smem:[#allocation15 + %s836_s19]]  ;;  %s864_s2 = sadd.s32 609, %s4997_s0 }
  0xd2   : >> { %v5255_v22 = vadd.f32 %v758_v45, %v5104_v48  ;;  %v771_v37 = vmul.f32 %v5138_v50, %v770_v49  ;;  %v772_v42 = vmul.f32 %v5141_v53, %v770_v49  ;;  %v777_v38 = vstv %s5180_s1  ;;  %s5293_s24 = sld [smem:[#allocation15 + %s843_s21]]  ;;  %s857_s1 = sadd.s32 608, %s4997_s0 }
  0xd3   : >> { %v784_v47 = vstv %s5191_s26  ;;  %v5269_v48 = vadd.f32 %v764_v20, %v5119_v13  ;;  %v5272_v19 = vadd.f32 %v765_v21, %v5122_v39  ;;  %v778_v40 = vmul.f32 %v5138_v50, %v777_v38  ;;  %s5313_s26 = sld [smem:[#allocation15 + %s850_s25]]  ;;  %s871_s27 = sadd.s32 610, %s4997_s0 }
  0xd4   : >> { %v779_v41 = vmul.f32 %v5141_v53, %v777_v38  ;;  %v5280_v12 = vadd.f32 %v771_v37, %v5130_v43  ;;  %v5283_v10 = vadd.f32 %v772_v42, %v5133_v44  ;;  %v785_v13 = vmul.f32 %v5138_v50, %v784_v47  ;;  %s5320_s28 = sld [smem:[#allocation15 + %s857_s1]]  ;;  %s878_s5 = sadd.s32 611, %s4997_s0 }
  0xd5   : >> { %v786_v39 = vmul.f32 %v5141_v53, %v784_v47  ;;  %v5297_v43 = vadd.f32 %v778_v40, %v5147_v7  ;;  %v791_v62 = vstv %s5211_s4  ;;  %v803_v63 = vstv %s5218_s29  ;;  %s5330_s4 = sld [smem:[#allocation15 + %s864_s2]]  ;;  %s897_s15 = sadd.s32 901, %s4997_s0 }
  0xd6   : >> { %v5300_v44 = vadd.f32 %v779_v41, %v5150_v6  ;;  %v5306_v4 = vadd.f32 %v785_v13, %v5156_v58  ;;  %v792_v55 = vmul.f32 %v5138_v50, %v791_v62  ;;  %v793_v16 = vmul.f32 %v5141_v53, %v791_v62  ;;  %s5341_s29 = sld [smem:[#allocation15 + %s871_s27]]  ;;  %s904_s16 = sadd.s32 902, %s4997_s0  ;;  %v5438_v62 = vld [vmem:[%s5011_s7 + $0x1b0] sm:$0xff] }
  0xd7   : >> { %v5309_v5 = vadd.f32 %v786_v39, %v5159_v61  ;;  %v804_v7 = vmul.f32 %v5288_v51, %v803_v63  ;;  %v805_v6 = vmul.f32 %v5291_v57, %v803_v63  ;;  %v810_v54 = vstv %s5228_s30  ;;  %s890_s30 = sadd.s32 900, %s4997_s0  ;;  %s911_s21 = sadd.s32 903, %s4997_s0  ;;  %v5441_v63 = vld [vmem:[%s5011_s7 + $0x1b8] sm:$0xff] }
  0xd8   : >> { %v817_v52 = vstv %s5239_s3  ;;  %v5323_v58 = vadd.f32 %v792_v55, %v5173_v2  ;;  %v5326_v50 = vadd.f32 %v793_v16, %v5176_v3  ;;  %v811_v53 = vmul.f32 %v5288_v51, %v810_v54  ;;  %s5361_s3 = sld [smem:[#allocation15 + %s878_s5]]  ;;  %s925_s25 = sadd.s32 905, %s4997_s0 }
  0xd9   : >> { %v812_v61 = vmul.f32 %v5291_v57, %v810_v54  ;;  %v5334_v1 = vadd.f32 %v804_v7, %v5184_v56  ;;  %v5337_v18 = vadd.f32 %v805_v6, %v5187_v17  ;;  %v818_v2 = vmul.f32 %v5288_v51, %v817_v52  ;;  %s5368_s19 = sld [smem:[#allocation15 + %s890_s30]]  ;;  %s932_s1 = sadd.s32 906, %s4997_s0 }
  0xda   : >> { %v819_v25 = vmul.f32 %v5291_v57, %v817_v52  ;;  %v5345_v3 = vadd.f32 %v811_v53, %v5195_v0  ;;  %v824_v56 = vstv %s5259_s20  ;;  %v831_v11 = vstv %s5266_s22  ;;  %s5378_s20 = sld [smem:[#allocation15 + %s897_s15]]  ;;  %s939_s27 = sadd.s32 907, %s4997_s0 }
  0xdb   : >> { %v5348_v60 = vadd.f32 %v812_v61, %v5198_v24  ;;  %v5354_v17 = vadd.f32 %v818_v2, %v5204_v14  ;;  %v825_v15 = vmul.f32 %v5288_v51, %v824_v56  ;;  %v826_v59 = vmul.f32 %v5291_v57, %v824_v56  ;;  %s5389_s22 = sld [smem:[#allocation15 + %s904_s16]]  ;;  %s953_s5 = sadd.s32 909, %s4997_s0 }
  0xdc   : >> { %v5357_v28 = vadd.f32 %v819_v25, %v5207_v27  ;;  %v832_v0 = vmul.f32 %v5288_v51, %v831_v11  ;;  %v833_v24 = vmul.f32 %v5291_v57, %v831_v11  ;;  %v838_v30 = vstv %s5276_s23  ;;  %s918_s23 = sadd.s32 904, %s4997_s0  ;;  %s960_s30 = sadd.s32 910, %s4997_s0 }
  0xdd   : >> { %v845_v9 = vstv %s5293_s24  ;;  %v5371_v14 = vadd.f32 %v825_v15, %v5221_v26  ;;  %v5374_v27 = vadd.f32 %v826_v59, %v5224_v29  ;;  %v839_v32 = vmul.f32 %v5288_v51, %v838_v30  ;;  %s5409_s24 = sld [smem:[#allocation15 + %s911_s21]]  ;;  %s967_s16 = sadd.s32 911, %s4997_s0 }
  0xde   : >> { %v840_v34 = vmul.f32 %v5291_v57, %v838_v30  ;;  %v5382_v8 = vadd.f32 %v832_v0, %v5232_v35  ;;  %v5385_v45 = vadd.f32 %v833_v24, %v5235_v36  ;;  %v846_v26 = vmul.f32 %v5288_v51, %v845_v9  ;;  %s5416_s2 = sld [smem:[#allocation15 + %s918_s23]]  ;;  %s986_s21 = sadd.s32 1201, %s4997_s0 }
  0xdf   : >> { %v847_v23 = vmul.f32 %v5291_v57, %v845_v9  ;;  %v5393_v29 = vadd.f32 %v839_v32, %v5243_v31  ;;  %v852_v35 = vstv %s5313_s26  ;;  %v859_v20 = vstv %s5320_s28  ;;  %s5426_s26 = sld [smem:[#allocation15 + %s925_s25]]  ;;  %s993_s23 = sadd.s32 1202, %s4997_s0 }
  0xe0   : >> { %v5396_v49 = vadd.f32 %v840_v34, %v5246_v46  ;;  %v5402_v36 = vadd.f32 %v846_v26, %v5252_v33  ;;  %v853_v37 = vmul.f32 %v5288_v51, %v852_v35  ;;  %v854_v42 = vmul.f32 %v5291_v57, %v852_v35  ;;  %s5443_s28 = sld [smem:[#allocation15 + %s932_s1]]  ;;  %s1000_s1 = sadd.s32 1203, %s4997_s0 }
  0xe1   : >> { %v5405_v21 = vadd.f32 %v847_v23, %v5255_v22  ;;  %v860_v31 = vmul.f32 %v5288_v51, %v859_v20  ;;  %v861_v46 = vmul.f32 %v5291_v57, %v859_v20  ;;  %v866_v38 = vstv %s5330_s4  ;;  %s946_s4 = sadd.s32 908, %s4997_s0  ;;  %p5883_p8 = scmp.ge.s32.totalorder %s593_s18, 25  }
  0xe2   : >> { %v873_v33 = vstv %s5341_s29  ;;  %v5419_v22 = vadd.f32 %v853_v37, %v5269_v48  ;;  %v5422_v47 = vadd.f32 %v854_v42, %v5272_v19  ;;  %v867_v40 = vmul.f32 %v5288_v51, %v866_v38  ;;  %s5463_s29 = sld [smem:[#allocation15 + %s939_s27]]  ;;  %s1014_s27 = sadd.s32 1205, %s4997_s0 }
  0xe3   : >> { %v868_v41 = vmul.f32 %v5291_v57, %v866_v38  ;;  %v5430_v13 = vadd.f32 %v860_v31, %v5280_v12  ;;  %v5433_v39 = vadd.f32 %v861_v46, %v5283_v10  ;;  %v874_v48 = vmul.f32 %v5288_v51, %v873_v33  ;;  %s5470_s15 = sld [smem:[#allocation15 + %s946_s4]]  ;;  %s1021_s4 = sadd.s32 1206, %s4997_s0 }
  0xe4   : >> { %v875_v19 = vmul.f32 %v5291_v57, %v873_v33  ;;  %v5447_v12 = vadd.f32 %v867_v40, %v5297_v43  ;;  %v880_v55 = vstv %s5361_s3  ;;  %v892_v16 = vstv %s5368_s19  ;;  %s5480_s3 = sld [smem:[#allocation15 + %s953_s5]]  ;;  %s586_s6 = sadd.s32 (%p5883_p8), 1, %s4316_s6  }
  0xe5   : >> { %v5450_v10 = vadd.f32 %v868_v41, %v5300_v44  ;;  %v5456_v7 = vadd.f32 %v874_v48, %v5306_v4  ;;  %v881_v54 = vmul.f32 %v5288_v51, %v880_v55  ;;  %v882_v52 = vmul.f32 %v5291_v57, %v880_v55  ;;  %s5491_s19 = sld [smem:[#allocation15 + %s960_s30]]  ;;  %s1028_s30 = sadd.s32 1207, %s4997_s0  ;;  %v5588_v55 = vld [vmem:[%s5011_s7 + $0x240] sm:$0xff] }
  0xe6   : >> { %v5459_v6 = vadd.f32 %v875_v19, %v5309_v5  ;;  %v893_v43 = vmul.f32 %v5438_v62, %v892_v16  ;;  %v894_v44 = vmul.f32 %v5441_v63, %v892_v16  ;;  %v899_v53 = vstv %s5378_s20  ;;  %s979_s20 = sadd.s32 1200, %s4997_s0  ;;  %v5591_v16 = vld [vmem:[%s5011_s7 + $0x248] sm:$0xff]  ;;  %s5973_s18 = sld [smem:[#allocation16 + $0x8]] (%p5883_p8) }
  0xe7   : >> { %v906_v61 = vstv %s5389_s22  ;;  %v5473_v4 = vadd.f32 %v881_v54, %v5323_v58  ;;  %v5476_v51 = vadd.f32 %v882_v52, %v5326_v50  ;;  %v900_v57 = vmul.f32 %v5438_v62, %v899_v53  ;;  %s5511_s22 = sld [smem:[#allocation15 + %s967_s16]]  ;;  %s1042_s16 = sadd.s32 1209, %s4997_s0 }
  0xe8   : >> { %v901_v5 = vmul.f32 %v5441_v63, %v899_v53  ;;  %v5484_v2 = vadd.f32 %v893_v43, %v5334_v1  ;;  %v5487_v25 = vadd.f32 %v894_v44, %v5337_v18  ;;  %v907_v58 = vmul.f32 %v5438_v62, %v906_v61  ;;  %s5518_s25 = sld [smem:[#allocation15 + %s979_s20]]  ;;  %s1049_s20 = sadd.s32 1210, %s4997_s0 }
  0xe9   : >> { %v908_v56 = vmul.f32 %v5441_v63, %v906_v61  ;;  %v5495_v50 = vadd.f32 %v900_v57, %v5345_v3  ;;  %v913_v1 = vstv %s5409_s24  ;;  %v920_v15 = vstv %s5416_s2  ;;  %s5528_s24 = sld [smem:[#allocation15 + %s986_s21]]  ;;  %p583_p9 = scmp.ge.s32.totalorder (%p5883_p8), %s586_s6, 6  }
  0xea   : >> { %v5498_v11 = vadd.f32 %v901_v5, %v5348_v60  ;;  %v5504_v18 = vadd.f32 %v907_v58, %v5354_v17  ;;  %v914_v0 = vmul.f32 %v5438_v62, %v913_v1  ;;  %v915_v24 = vmul.f32 %v5441_v63, %v913_v1  ;;  %s5539_s2 = sld [smem:[#allocation15 + %s993_s23]]  ;;  %s1056_s23 = sadd.s32 1211, %s4997_s0 }
  0xeb   : >> { %v5507_v59 = vadd.f32 %v908_v56, %v5357_v28  ;;  %v921_v3 = vmul.f32 %v5438_v62, %v920_v15  ;;  %v922_v60 = vmul.f32 %v5441_v63, %v920_v15  ;;  %v927_v30 = vstv %s5426_s26  ;;  %s1007_s26 = sadd.s32 1204, %s4997_s0 }
  0xec   : >> { %v934_v9 = vstv %s5443_s28  ;;  %v5521_v17 = vadd.f32 %v914_v0, %v5371_v14  ;;  %v5524_v28 = vadd.f32 %v915_v24, %v5374_v27  ;;  %v928_v32 = vmul.f32 %v5438_v62, %v927_v30  ;;  %s5559_s28 = sld [smem:[#allocation15 + %s1000_s1]]  ;;  %s1075_s1 = sadd.s32 1501, %s4997_s0 }
  0xed   : >> { %v929_v34 = vmul.f32 %v5441_v63, %v927_v30  ;;  %v5532_v26 = vadd.f32 %v921_v3, %v5382_v8  ;;  %v5535_v23 = vadd.f32 %v922_v60, %v5385_v45  ;;  %v935_v14 = vmul.f32 %v5438_v62, %v934_v9  ;;  %s5566_s5 = sld [smem:[#allocation15 + %s1007_s26]]  ;;  %s1082_s26 = sadd.s32 1502, %s4997_s0 }
  0xee   : >> { %v936_v35 = vmul.f32 %v5441_v63, %v934_v9  ;;  %v5543_v27 = vadd.f32 %v928_v32, %v5393_v29  ;;  %v941_v8 = vstv %s5463_s29  ;;  %v948_v37 = vstv %s5470_s15  ;;  %s5576_s29 = sld [smem:[#allocation15 + %s1014_s27]] }
  0xef   : >> { %v5546_v20 = vadd.f32 %v929_v34, %v5396_v49  ;;  %v5552_v45 = vadd.f32 %v935_v14, %v5402_v36  ;;  %v942_v31 = vmul.f32 %v5438_v62, %v941_v8  ;;  %v943_v46 = vmul.f32 %v5441_v63, %v941_v8  ;;  %s5593_s15 = sld [smem:[#allocation15 + %s1021_s4]]  ;;  %s1089_s4 = sadd.s32 1503, %s4997_s0 }
  0xf0   : >> { %v5555_v42 = vadd.f32 %v936_v35, %v5405_v21  ;;  %v949_v29 = vmul.f32 %v5438_v62, %v948_v37  ;;  %v950_v49 = vmul.f32 %v5441_v63, %v948_v37  ;;  %v955_v38 = vstv %s5480_s3  ;;  %s1035_s3 = sadd.s32 1208, %s4997_s0 }
  0xf1   : >> { %v962_v36 = vstv %s5491_s19  ;;  %v5569_v21 = vadd.f32 %v942_v31, %v5419_v22  ;;  %v5572_v33 = vadd.f32 %v943_v46, %v5422_v47  ;;  %v956_v40 = vmul.f32 %v5438_v62, %v955_v38  ;;  %s5613_s19 = sld [smem:[#allocation15 + %s1028_s30]]  ;;  %s1103_s30 = sadd.s32 1505, %s4997_s0 }
  0xf2   : >> { %v957_v41 = vmul.f32 %v5441_v63, %v955_v38  ;;  %v5580_v48 = vadd.f32 %v949_v29, %v5430_v13  ;;  %v5583_v19 = vadd.f32 %v950_v49, %v5433_v39  ;;  %v963_v22 = vmul.f32 %v5438_v62, %v962_v36  ;;  %s5620_s21 = sld [smem:[#allocation15 + %s1035_s3]]  ;;  %s1110_s3 = sadd.s32 1506, %s4997_s0 }
  0xf3   : >> { %v964_v47 = vmul.f32 %v5441_v63, %v962_v36  ;;  %v5597_v13 = vadd.f32 %v956_v40, %v5447_v12  ;;  %v969_v54 = vstv %s5511_s22  ;;  %v981_v52 = vstv %s5518_s25  ;;  %s5630_s22 = sld [smem:[#allocation15 + %s1042_s16]] }
  0xf4   : >> { %v5600_v39 = vadd.f32 %v957_v41, %v5450_v10  ;;  %v5606_v43 = vadd.f32 %v963_v22, %v5456_v7  ;;  %v970_v53 = vmul.f32 %v5438_v62, %v969_v54  ;;  %v971_v61 = vmul.f32 %v5441_v63, %v969_v54  ;;  %s5641_s25 = sld [smem:[#allocation15 + %s1049_s20]]  ;;  %s1117_s20 = sadd.s32 1507, %s4997_s0  ;;  %v5738_v54 = vld [vmem:[%s5011_s7 + $0x2d0] sm:$0xff] }
  0xf5   : >> { %v5609_v44 = vadd.f32 %v964_v47, %v5459_v6  ;;  %v982_v12 = vmul.f32 %v5588_v55, %v981_v52  ;;  %v983_v10 = vmul.f32 %v5591_v16, %v981_v52  ;;  %v988_v57 = vstv %s5528_s24  ;;  %s1068_s24 = sadd.s32 1500, %s4997_s0  ;;  %v5741_v52 = vld [vmem:[%s5011_s7 + $0x2d8] sm:$0xff]  ;;  %s5763_s7 = sld [smem:[#allocation15 + %s1117_s20]] }
  0xf6   : >> { %v995_v5 = vstv %s5539_s2  ;;  %v5623_v7 = vadd.f32 %v970_v53, %v5473_v4  ;;  %v5626_v62 = vadd.f32 %v971_v61, %v5476_v51  ;;  %v989_v63 = vmul.f32 %v5588_v55, %v988_v57  ;;  %s5661_s2 = sld [smem:[#allocation15 + %s1056_s23]]  ;;  %s1131_s23 = sadd.s32 1509, %s4997_s0 }
  0xf7   : >> { %v990_v6 = vmul.f32 %v5591_v16, %v988_v57  ;;  %v5634_v58 = vadd.f32 %v982_v12, %v5484_v2  ;;  %v5637_v56 = vadd.f32 %v983_v10, %v5487_v25  ;;  %v996_v4 = vmul.f32 %v5588_v55, %v995_v5  ;;  %s5668_s27 = sld [smem:[#allocation15 + %s1068_s24]]  ;;  %s5981_s20 = scalar_lea.vmem (%p5883_p8), [#allocation4], %s2961_s17 }
  0xf8   : >> { %v997_v1 = vmul.f32 %v5591_v16, %v995_v5  ;;  %v5645_v51 = vadd.f32 %v989_v63, %v5495_v50  ;;  %v1002_v2 = vstv %s5559_s28  ;;  %v1009_v0 = vstv %s5566_s5  ;;  %s5678_s28 = sld [smem:[#allocation15 + %s1075_s1]] }
  0xf9   : >> { %v5648_v15 = vadd.f32 %v990_v6, %v5498_v11  ;;  %v5654_v25 = vadd.f32 %v996_v4, %v5504_v18  ;;  %v1003_v3 = vmul.f32 %v5588_v55, %v1002_v2  ;;  %v1004_v60 = vmul.f32 %v5591_v16, %v1002_v2  ;;  %s5689_s5 = sld [smem:[#allocation15 + %s1082_s26]]  ;;  %s1145_s26 = sadd.s32 1511, %s4997_s0 }
  0xfa   : >> { %v5657_v24 = vadd.f32 %v997_v1, %v5507_v59  ;;  %v1010_v50 = vmul.f32 %v5588_v55, %v1009_v0  ;;  %v1011_v11 = vmul.f32 %v5591_v16, %v1009_v0  ;;  %v1016_v30 = vstv %s5576_s29  ;;  %s1096_s29 = sadd.s32 1504, %s4997_s0  ;;  %s5776_s1 = sld [smem:[#allocation15 + %s1131_s23]] }
  0xfb   : >> { %v1023_v9 = vstv %s5593_s15  ;;  %v5671_v18 = vadd.f32 %v1003_v3, %v5521_v17  ;;  %v5674_v59 = vadd.f32 %v1004_v60, %v5524_v28  ;;  %v1017_v32 = vmul.f32 %v5588_v55, %v1016_v30  ;;  %s5709_s15 = sld [smem:[#allocation15 + %s1089_s4]] }
  0xfc   : >> { %v1018_v34 = vmul.f32 %v5591_v16, %v1016_v30  ;;  %v5682_v14 = vadd.f32 %v1010_v50, %v5532_v26  ;;  %v5685_v35 = vadd.f32 %v1011_v11, %v5535_v23  ;;  %v1024_v17 = vmul.f32 %v5588_v55, %v1023_v9  ;;  %s5716_s16 = sld [smem:[#allocation15 + %s1096_s29]] }
  0xfd   : >> { %v1025_v8 = vmul.f32 %v5591_v16, %v1023_v9  ;;  %v5693_v28 = vadd.f32 %v1017_v32, %v5543_v27  ;;  %v1030_v26 = vstv %s5613_s19  ;;  %v1037_v31 = vstv %s5620_s21  ;;  %s5726_s19 = sld [smem:[#allocation15 + %s1103_s30]] }
  0xfe   : >> { %v5696_v37 = vadd.f32 %v1018_v34, %v5546_v20  ;;  %v5702_v23 = vadd.f32 %v1024_v17, %v5552_v45  ;;  %v1031_v29 = vmul.f32 %v5588_v55, %v1030_v26  ;;  %v1032_v49 = vmul.f32 %v5591_v16, %v1030_v26  ;;  %s5743_s21 = sld [smem:[#allocation15 + %s1110_s3]] }
  0xff   : >> { %v5705_v46 = vadd.f32 %v1025_v8, %v5555_v42  ;;  %v1038_v27 = vmul.f32 %v5588_v55, %v1037_v31  ;;  %v1039_v20 = vmul.f32 %v5591_v16, %v1037_v31  ;;  %v1044_v38 = vstv %s5630_s22  ;;  %s1124_s22 = sadd.s32 1508, %s4997_s0  ;;  %s2977_s4 = sld [smem:[#allocation16 + $0x1]] (%p5883_p8) }
 0x100   : >> { %v1051_v45 = vstv %s5641_s25  ;;  %v5719_v42 = vadd.f32 %v1031_v29, %v5569_v21  ;;  %v5722_v36 = vadd.f32 %v1032_v49, %v5572_v33  ;;  %v1045_v40 = vmul.f32 %v5588_v55, %v1044_v38  ;;  %s1138_s25 = sadd.s32 1510, %s4997_s0  ;;  %s5770_s24 = sld [smem:[#allocation15 + %s1124_s22]] }
 0x101   : >> { %v1046_v41 = vmul.f32 %v5591_v16, %v1044_v38  ;;  %v5730_v22 = vadd.f32 %v1038_v27, %v5580_v48  ;;  %v5733_v47 = vadd.f32 %v1039_v20, %v5583_v19  ;;  %v1052_v21 = vmul.f32 %v5588_v55, %v1051_v45  ;;  %s5809_s0 = sld [smem:[#allocation15 + %s1145_s26]] }
 0x102   : >> { %v1053_v33 = vmul.f32 %v5591_v16, %v1051_v45  ;;  %v5747_v48 = vadd.f32 %v1045_v40, %v5597_v13  ;;  %v1058_v53 = vstv %s5661_s2  ;;  %v1070_v61 = vstv %s5668_s27  ;;  %s5786_s2 = sld [smem:[#allocation15 + %s1138_s25]] }
 0x103   : >> { %v5750_v19 = vadd.f32 %v1046_v41, %v5600_v39  ;;  %v5756_v12 = vadd.f32 %v1052_v21, %v5606_v43  ;;  %v1059_v57 = vmul.f32 %v5588_v55, %v1058_v53  ;;  %v1060_v5 = vmul.f32 %v5591_v16, %v1058_v53  ;;  %s2985_s29 = sld [smem:[#allocation16 + $0x3]] (%p5883_p8) }
 0x104   : >> { %v5759_v10 = vadd.f32 %v1053_v33, %v5609_v44  ;;  %v1071_v13 = vmul.f32 %v5738_v54, %v1070_v61  ;;  %v1072_v39 = vmul.f32 %v5741_v52, %v1070_v61  ;;  %v1077_v63 = vstv %s5678_s28  ;;  %s1152_s28 = sld [smem:[#allocation16]] (%p5883_p8) }
 0x105   : >> { %v1084_v6 = vstv %s5689_s5  ;;  %v1061_v43 = vadd.f32 %v1059_v57, %v5623_v7  ;;  %v1062_v55 = vadd.f32 %v1060_v5, %v5626_v62  ;;  %v1078_v16 = vmul.f32 %v5738_v54, %v1077_v63  ;;  %s2981_s5 = sld [smem:[#allocation16 + $0x2]] (%p5883_p8) }
 0x106   : >> { %v1079_v44 = vmul.f32 %v5741_v52, %v1077_v63  ;;  %v5779_v4 = vadd.f32 %v1071_v13, %v5634_v58   ;;  %v5782_v53 = vadd.f32 %v1072_v39, %v5637_v56   ;;  %v1085_v1 = vmul.f32 %v5738_v54, %v1084_v6  ;;  %s2989_s30 = sld [smem:[#allocation16 + $0x4]] (%p5883_p8) }
 0x107   : >> { %v1086_v7 = vmul.f32 %v5741_v52, %v1084_v6  ;;  %v5790_v50 = vadd.f32 %v1078_v16, %v5645_v51   ;;  %v1091_v58 = vstv %s5709_s15  ;;  %v1098_v2 = vstv %s5716_s16  ;;  %s5963_s15 = sld [smem:[#allocation16 + $0x5]] (%p5883_p8) }
 0x108   : >> { %v6376_v60 = vmov %v5779_v4  ;;  %v6377_v11 = vmov %v5782_v53  ;;  %v5793_v44 = vadd.f32 %v1079_v44, %v5648_v15   ;;  %v5798_v0 = vadd.f32 %v1085_v1, %v5654_v25   ;;  %s5965_s3 = sld [smem:[#allocation16 + $0x6]] (%p5883_p8) }
 0x109   : >> { %v6378_v62 = vmov %v5790_v50  ;;  %v5801_v41 = vadd.f32 %v1086_v7, %v5657_v24   ;;  %v1092_v3 = vmul.f32 %v5738_v54, %v1091_v58  ;;  %v1093_v32 = vmul.f32 %v5741_v52, %v1091_v58  ;;  %s5969_s16 = sld [smem:[#allocation16 + $0x7]] (%p5883_p8) }
 0x10a   : >> { %v6379_v30 = vmov %v5793_v44  ;;  %v6380_v56 = vmov %v5798_v0  ;;  %v1099_v34 = vmul.f32 %v5738_v54, %v1098_v2  ;;  %v1100_v51 = vmul.f32 %v5741_v52, %v1098_v2  ;;  %s5991_s17 = sld [smem:[#allocation16 + $0xa]] (%p5883_p8) }
 0x10b   : >> { %v6381_v9 = vmov %v5801_v41  ;;  %v1105_v15 = vstv %s5726_s19  ;;  %v1112_v50 = vstv %s5743_s21  ;;  %v5812_v40 = vadd.f32 %v1092_v3, %v5671_v18   ;;  %s5977_s19 = sld [smem:[#allocation16 + $0x9]] (%p5883_p8) }
 0x10c   : >> { %v5815_v39 = vadd.f32 %v1093_v32, %v5674_v59   ;;  %v1106_v17 = vmul.f32 %v5738_v54, %v1105_v15  ;;  %v1107_v8 = vmul.f32 %v5741_v52, %v1105_v15  ;;  %v5820_v38 = vadd.f32 %v1099_v34, %v5682_v14   ;;  %s5997_s21 = sld [smem:[#allocation16 + $0xb]] (%p5883_p8) }
 0x10d   : >> { %v6382_v25 = vmov %v5812_v40  ;;  %v5823_v31 = vadd.f32 %v1100_v51, %v5685_v35   ;;  %v1113_v29 = vmul.f32 %v5738_v54, %v1112_v50  ;;  %v1114_v18 = vmul.f32 %v5741_v52, %v1112_v50 }
 0x10e   : >> { %v6383_v24 = vmov %v5815_v39  ;;  %v6384_v26 = vmov %v5820_v38  ;;  %v5828_v21 = vadd.f32 %v1106_v17, %v5693_v28   ;;  %v5831_v20 = vadd.f32 %v1107_v8, %v5696_v37  }
 0x10f   : >> { %v1119_v27 = vstv %s5763_s7  ;;  %v1126_v45 = vstv %s5770_s24  ;;  %v5836_v40 = vadd.f32 %v1113_v29, %v5702_v23   ;;  %v5839_v13 = vadd.f32 %v1114_v18, %v5705_v46  }
 0x110   : >> { %v6385_v59 = vmov %v5828_v21  ;;  %v6386_v49 = vmov %v5831_v20  ;;  %v1120_v35 = vmul.f32 %v5738_v54, %v1119_v27  ;;  %v1121_v38 = vmul.f32 %v5741_v52, %v1119_v27 }
 0x111   : >> { %v6387_v33 = vmov %v5836_v40  ;;  %v6388_v14 = vmov %v5839_v13  ;;  %v1127_v41 = vmul.f32 %v5738_v54, %v1126_v45  ;;  %v1128_v28 = vmul.f32 %v5741_v52, %v1126_v45 }
 0x112   : >> { %v1133_v21 = vstv %s5776_s1  ;;  %v1140_v37 = vstv %s5786_s2  ;;  %v5848_v20 = vadd.f32 %v1120_v35, %v5719_v42   ;;  %v5851_v23 = vadd.f32 %v1121_v38, %v5722_v36  }
 0x113   : >> { %v1134_v46 = vmul.f32 %v5738_v54, %v1133_v21  ;;  %v1135_v53 = vmul.f32 %v5741_v52, %v1133_v21  ;;  %v5856_v7 = vadd.f32 %v1127_v41, %v5730_v22   ;;  %v5859_v6 = vadd.f32 %v1128_v28, %v5733_v47  }
 0x114   : >> { %v6389_v61 = vmov %v5848_v20  ;;  %v1141_v5 = vmul.f32 %v5738_v54, %v1140_v37  ;;  %v1142_v13 = vmul.f32 %v5741_v52, %v1140_v37  ;;  %v1147_v39 = vstv %s5809_s0 }
 0x115   : >> { %v6390_v57 = vmov %v5856_v7  ;;  %v6391_v63 = vmov %v5859_v6  ;;  %v5864_v42 = vadd.f32 %v1134_v46, %v5747_v48   ;;  %v5867_v4 = vadd.f32 %v1135_v53, %v5750_v19  }
 0x116   : >> { %v5871_v3 = vadd.f32 %v1141_v5, %v5756_v12   ;;  %v5874_v2 = vadd.f32 %v1142_v13, %v5759_v10   ;;  %v1148_v22 = vmul.f32 %v5738_v54, %v1147_v39  ;;  %v1149_v47 = vmul.f32 %v5741_v52, %v1147_v39 }
 0x117   : >> { %v6392_v36 = vmov %v5867_v4  ;;  %v6403_v5 = vmov %v5864_v42  ;;  %v6404_v6 = vmov %v6391_v63  ;;  %v6405_v7 = vmov %v6390_v57 }
 0x118   : >> { %v6393_v16 = vmov %v5871_v3  ;;  %v6394_v58 = vmov %v5874_v2  ;;  %v5878_v1 = vadd.f32 %v1148_v22, %v1061_v43   ;;  %v5880_v0 = vadd.f32 %v1149_v47, %v1062_v55  }
 0x119   : >> { %v6400_v2 = vmov %v6394_v58  ;;  %v6401_v3 = vmov %v6393_v16  ;;  %v6402_v4 = vmov %v6392_v36  ;;  %v6406_v10 = vmov %v5851_v23 }
 0x11a   : >> { %v6395_v32 = vmov %v5878_v1  ;;  %v6396_v34 = vmov %v5880_v0  ;;  %v6407_v12 = vmov %v6389_v61  ;;  %v6408_v13 = vmov %v6388_v14  ;;  %592 = sbr.rel (!%p5883_p8) target bundleno = 176 (0xb0), region = 484 }
 0x11b   : >> { %v6398_v0 = vmov %v6396_v34  ;;  %v6399_v1 = vmov %v6395_v32  ;;  %v6409_v19 = vmov %v6387_v33  ;;  %v6410_v20 = vmov %v6386_v49 }
 0x11c   : >> { %v6411_v21 = vmov %v6385_v59  ;;  %v6412_v22 = vmov %v5823_v31  ;;  %v6413_v38 = vmov %v6384_v26  ;;  %v6414_v39 = vmov %v6383_v24 }
 0x11d   : >> { %v6415_v40 = vmov %v6382_v25  ;;  %v6416_v41 = vmov %v6381_v9  ;;  %v6417_v43 = vmov %v6380_v56  ;;  %v6418_v44 = vmov %v6379_v30 }
 0x11e   : >> { %v6419_v50 = vmov %v6378_v62  ;;  %v6420_v53 = vmov %v6377_v11  ;;  %v6421_v51 = vmov %v6376_v60  ;;  %v1153_v54 = vstv (%p5883_p8), %s1152_s28 }
 0x11f   : > { %v1154_v52 = vadd.f32 %v1153_v54, %v6376_v60  ;;  %v1155_v48 = vadd.f32 %v1153_v54, %v6377_v11  ;;  %v1162_v55 = vstv %s2977_s4  ;;  %v1172_v12 = vstv %s2981_s5  ;;  %s4418_s22 = smov (%p583_p9), 0  }
 0x120   : > { %v1163_v51 = vadd.f32 %v1162_v55, %v6378_v62  ;;  %v1164_v19 = vadd.f32 %v1162_v55, %v6379_v30  ;;  %v1173_v43 = vadd.f32 %v1172_v12, %v6380_v56  ;;  %v1174_v44 = vadd.f32 %v1172_v12, %v6381_v9 }
 0x121   : > { %v1156_v10 = vmax.f32 %v1154_v52, 0.0  ;;  %v1157_v6 = vmax.f32 %v1155_v48, 0.0  ;;  %v1182_v11 = vstv %s2985_s29  ;;  %v1192_v1 = vstv %s2989_s30 }
 0x122   : > { %v1165_v4 = vmax.f32 %v1163_v51, 0.0  ;;  %v1166_v60 = vmax.f32 %v1164_v19, 0.0  ;;  %v1175_v7 = vmax.f32 %v1173_v43, 0.0  ;;  %v1176_v62 = vmax.f32 %v1174_v44, 0.0 }
 0x123   : > { %1159 = vst [vmem:[%s5981_s20] sm:$0xff] %v1156_v10  ;;  %v1183_v30 = vadd.f32 %v1182_v11, %v6382_v25  ;;  %v1184_v2 = vadd.f32 %v1182_v11, %v6383_v24  ;;  %v1193_v0 = vadd.f32 %v1192_v1, %v6384_v26  ;;  %v1194_v56 = vadd.f32 %v1192_v1, %v5823_v31 }
 0x124   : > { %1160 = vst [vmem:[%s5981_s20 + $0x8] sm:$0xff] %v1157_v6  ;;  %v1202_v9 = vstv %s5963_s15  ;;  %v1212_v3 = vstv %s5965_s3  ;;  %v1222_v26 = vstv %s5969_s16 }
 0x125   : > { %2979 = vst [vmem:[%s5981_s20 + $0x60] sm:$0xff] %v1165_v4  ;;  %v1185_v15 = vmax.f32 %v1183_v30, 0.0  ;;  %v1203_v50 = vadd.f32 %v1202_v9, %v6385_v59  ;;  %v1186_v25 = vmax.f32 %v1184_v2, 0.0  ;;  %v1204_v24 = vadd.f32 %v1202_v9, %v6386_v49 }
 0x126   : > { %2980 = vst [vmem:[%s5981_s20 + $0x68] sm:$0xff] %v1166_v60  ;;  %v1195_v17 = vmax.f32 %v1193_v0, 0.0  ;;  %v1213_v8 = vadd.f32 %v1212_v3, %v6387_v33  ;;  %v1196_v31 = vmax.f32 %v1194_v56, 0.0  ;;  %v1214_v29 = vadd.f32 %v1212_v3, %v6388_v14 }
 0x127   : > { %2983 = vst [vmem:[%s5981_s20 + $0xc0] sm:$0xff] %v1175_v7  ;;  %v1232_v18 = vstv %s5973_s18  ;;  %v1205_v59 = vmax.f32 %v1203_v50, 0.0  ;;  %v1223_v49 = vadd.f32 %v1222_v26, %v6389_v61  ;;  %v1206_v27 = vmax.f32 %v1204_v24, 0.0 }
 0x128   : > { %2984 = vst [vmem:[%s5981_s20 + $0xc8] sm:$0xff] %v1176_v62  ;;  %v1224_v45 = vadd.f32 %v1222_v26, %v5851_v23  ;;  %v1242_v40 = vstv %s5977_s19  ;;  %v1215_v33 = vmax.f32 %v1213_v8, 0.0  ;;  %v1233_v35 = vadd.f32 %v1232_v18, %v6390_v57 }
 0x129   : > { %2987 = vst [vmem:[%s5981_s20 + $0x120] sm:$0xff] %v1185_v15  ;;  %v1216_v14 = vmax.f32 %v1214_v29, 0.0  ;;  %v1234_v38 = vadd.f32 %v1232_v18, %v6391_v63  ;;  %v1252_v41 = vstv %s5991_s17  ;;  %v1225_v28 = vmax.f32 %v1223_v49, 0.0 }
 0x12a   : > { %2988 = vst [vmem:[%s5981_s20 + $0x128] sm:$0xff] %v1186_v25  ;;  %v1243_v21 = vadd.f32 %v1242_v40, %v5864_v42  ;;  %v1226_v37 = vmax.f32 %v1224_v45, 0.0  ;;  %v1244_v20 = vadd.f32 %v1242_v40, %v6392_v36  ;;  %v1262_v61 = vstv %s5997_s21 }
 0x12b   : > { %2991 = vst [vmem:[%s5981_s20 + $0x180] sm:$0xff] %v1195_v17  ;;  %v1235_v23 = vmax.f32 %v1233_v35, 0.0  ;;  %v1253_v46 = vadd.f32 %v1252_v41, %v6393_v16  ;;  %v1236_v53 = vmax.f32 %v1234_v38, 0.0  ;;  %v1254_v57 = vadd.f32 %v1252_v41, %v6394_v58 }
 0x12c   : > { %2992 = vst [vmem:[%s5981_s20 + $0x188] sm:$0xff] %v1196_v31  ;;  %v1245_v63 = vmax.f32 %v1243_v21, 0.0  ;;  %v1263_v5 = vadd.f32 %v1262_v61, %v6395_v32  ;;  %v1246_v13 = vmax.f32 %v1244_v20, 0.0  ;;  %v1264_v42 = vadd.f32 %v1262_v61, %v6396_v34 }
 0x12d   : > { %2995 = vst [vmem:[%s5981_s20 + $0x1e0] sm:$0xff] %v1205_v59  ;;  %v1255_v36 = vmax.f32 %v1253_v46, 0.0  ;;  %v1256_v39 = vmax.f32 %v1254_v57, 0.0 }
 0x12e   : > { %2996 = vst [vmem:[%s5981_s20 + $0x1e8] sm:$0xff] %v1206_v27  ;;  %v1265_v16 = vmax.f32 %v1263_v5, 0.0  ;;  %v1266_v22 = vmax.f32 %v1264_v42, 0.0 }
 0x12f   : > { %2999 = vst [vmem:[%s5981_s20 + $0x240] sm:$0xff] %v1215_v33 }
 0x130   : > { %3000 = vst [vmem:[%s5981_s20 + $0x248] sm:$0xff] %v1216_v14 }
 0x131   : > { %3003 = vst [vmem:[%s5981_s20 + $0x2a0] sm:$0xff] %v1225_v28 }
 0x132   : > { %3004 = vst [vmem:[%s5981_s20 + $0x2a8] sm:$0xff] %v1226_v37 }
 0x133   : > { %3007 = vst [vmem:[%s5981_s20 + $0x300] sm:$0xff] %v1235_v23 }
 0x134   : > { %3008 = vst [vmem:[%s5981_s20 + $0x308] sm:$0xff] %v1236_v53 }
 0x135   : > { %3011 = vst [vmem:[%s5981_s20 + $0x360] sm:$0xff] %v1245_v63 }
 0x136   : > { %3012 = vst [vmem:[%s5981_s20 + $0x368] sm:$0xff] %v1246_v13  ;;  %585 = sbr.rel (!%p583_p9) target bundleno = 170 (0xaa), region = 495 }
 0x137   : > { %3015 = vst [vmem:[%s5981_s20 + $0x3c0] sm:$0xff] %v1255_v36 }
 0x138   : > { %3016 = vst [vmem:[%s5981_s20 + $0x3c8] sm:$0xff] %v1256_v39 }
 0x139   : > { %3019 = vst [vmem:[%s5981_s20 + $0x420] sm:$0xff] %v1265_v16 }
 0x13a   : > { %3020 = vst [vmem:[%s5981_s20 + $0x428] sm:$0xff] %v1266_v22 }
 0x13b LB: > { %s1277_s23 = smul.u32 24, %s4420_s22  ;;  %s3024_s25 = sshll.u32 %s4420_s22, 2  ;;  %s4420_s22 = sphi %s4418_s22, %s1276_s22  }
 0x13c   : > { %s1291_s24 = scalar_lea.vmem [#allocation5], %s3024_s25  ;;  %s1276_s22 = sadd.s32 1, %s4420_s22  }
 0x13d   : > { %s1278_s7 = scalar_lea.vmem [#allocation4], %s1277_s23  ;;  %p1273_p10 = scmp.ge.s32.totalorder %s1276_s22, 4  }
 0x13e   :  { %s4422_s6 = smov (%p1273_p10), 0  }
 0x141   : > { %v1279_v58 = vld [vmem:[%s1278_s7] sm:$0xff]  ;;  %v3023_v47 = vld [vmem:[%s1278_s7 + $0xc] sm:$0xff] }
 0x142   : > { %v1285_v32 = vmax.f32 %v1279_v58, %v3023_v47 }
 0x144   : > { %v1287_v34 = vrot.slane %v1285_v32, 1 }
 0x146   : > { %v1289_v54 = vmax.f32 %v1285_v32, %v1287_v34 }
 0x147   :  { %1275 = sbr.rel (!%p1273_p10) target bundleno = 315 (0x13b), region = 506 }
 0x148   : > { %1292 = vst [vmem:[%s1291_s24] sm:$0x1] %v1289_v54 }
 0x149   : > { %3026 = vst [vmem:[%s1291_s24 - $0x1] sm:$0x4] %v1289_v54 }
 0x14a   : > { %3028 = vst [vmem:[%s1291_s24 - $0x2] sm:$0x10] %v1289_v54 }
 0x14b   : > { %3030 = vst [vmem:[%s1291_s24 - $0x3] sm:$0x40] %v1289_v54 }
 0x14c LB: > { %s2398_s1 = smul.u32 24, %s4424_s6  ;;  %s3035_s26 = sshll.u32 %s4424_s6, 2  ;;  %s4424_s6 = sphi %s4422_s6, %s1307_s6  }
 0x14d   : > { %s2406_s0 = scalar_lea.vmem [#allocation5], %s3035_s26  ;;  %s1307_s6 = sadd.s32 1, %s4424_s6  }
 0x14e   : > { %s2399_s2 = scalar_lea.vmem [#allocation4], %s2398_s1  ;;  %p1304_p11 = scmp.ge.s32.totalorder %s1307_s6, 4  }
 0x14f   : > { %v3031_v52 = vld [vmem:[%s2399_s2 + $0x60] sm:$0xff]  ;;  %v3034_v48 = vld [vmem:[%s2399_s2 + $0x6c] sm:$0xff]  ;;  %s4426_s27 = smov (%p1304_p11), 0  }
 0x150   : > { %v1318_v55 = vmax.f32 %v3031_v52, %v3034_v48 }
 0x152   : > { %v1320_v51 = vrot.slane %v1318_v55, 1 }
 0x154   : > { %v1322_v19 = vmax.f32 %v1318_v55, %v1320_v51 }
 0x155   :  { %1306 = sbr.rel (!%p1304_p11) target bundleno = 332 (0x14c), region = 517 }
 0x156   : > { %3036 = vst [vmem:[%s2406_s0 + $0x10] sm:$0x1] %v1322_v19 }
 0x157   : > { %3038 = vst [vmem:[%s2406_s0 + $0xf] sm:$0x4] %v1322_v19 }
 0x158   : > { %3040 = vst [vmem:[%s2406_s0 + $0xe] sm:$0x10] %v1322_v19 }
 0x159   : > { %3042 = vst [vmem:[%s2406_s0 + $0xd] sm:$0x40] %v1322_v19 }
 0x15a LB: > { %s2417_s28 = smul.u32 24, %s4428_s27  ;;  %s3047_s5 = sshll.u32 %s4428_s27, 2  ;;  %s4428_s27 = sphi %s4426_s27, %s1341_s27  }
 0x15b   : > { %s2425_s29 = scalar_lea.vmem [#allocation5], %s3047_s5  ;;  %s1341_s27 = sadd.s32 1, %s4428_s27  }
 0x15c   : > { %s2418_s4 = scalar_lea.vmem [#allocation4], %s2417_s28  ;;  %p1338_p12 = scmp.ge.s32.totalorder %s1341_s27, 4  }
 0x15d   : > { %v3043_v12 = vld [vmem:[%s2418_s4 + $0xc0] sm:$0xff]  ;;  %v3046_v10 = vld [vmem:[%s2418_s4 + $0xcc] sm:$0xff]  ;;  %s4430_s30 = smov (%p1338_p12), 0  }
 0x15e   : > { %v1352_v6 = vmax.f32 %v3043_v12, %v3046_v10 }
 0x160   : > { %v1354_v43 = vrot.slane %v1352_v6, 1 }
 0x162   : > { %v1356_v44 = vmax.f32 %v1352_v6, %v1354_v43 }
 0x163   :  { %1340 = sbr.rel (!%p1338_p12) target bundleno = 346 (0x15a), region = 528 }
 0x164   : > { %3048 = vst [vmem:[%s2425_s29 + $0x20] sm:$0x1] %v1356_v44 }
 0x165   : > { %3050 = vst [vmem:[%s2425_s29 + $0x1f] sm:$0x4] %v1356_v44 }
 0x166   : > { %3052 = vst [vmem:[%s2425_s29 + $0x1e] sm:$0x10] %v1356_v44 }
 0x167   : > { %3054 = vst [vmem:[%s2425_s29 + $0x1d] sm:$0x40] %v1356_v44 }
 0x168 LB: > { %s2436_s15 = smul.u32 24, %s4432_s30  ;;  %s3059_s16 = sshll.u32 %s4432_s30, 2  ;;  %s4432_s30 = sphi %s4430_s30, %s1375_s30  }
 0x169   : > { %s2444_s18 = scalar_lea.vmem [#allocation5], %s3059_s16  ;;  %s1375_s30 = sadd.s32 1, %s4432_s30  }
 0x16a   : > { %s2437_s3 = scalar_lea.vmem [#allocation4], %s2436_s15  ;;  %p1372_p13 = scmp.ge.s32.totalorder %s1375_s30, 4  }
 0x16b   : > { %v3055_v4 = vld [vmem:[%s2437_s3 + $0x120] sm:$0xff]  ;;  %v3058_v60 = vld [vmem:[%s2437_s3 + $0x12c] sm:$0xff]  ;;  %s4434_s19 = smov (%p1372_p13), 0  }
 0x16c   : > { %v1386_v11 = vmax.f32 %v3055_v4, %v3058_v60 }
 0x16e   : > { %v1388_v1 = vrot.slane %v1386_v11, 1 }
 0x170   : > { %v1390_v7 = vmax.f32 %v1386_v11, %v1388_v1 }
 0x171   :  { %1374 = sbr.rel (!%p1372_p13) target bundleno = 360 (0x168), region = 539 }
 0x172   : > { %3060 = vst [vmem:[%s2444_s18 + $0x30] sm:$0x1] %v1390_v7 }
 0x173   : > { %3062 = vst [vmem:[%s2444_s18 + $0x2f] sm:$0x4] %v1390_v7 }
 0x174   : > { %3064 = vst [vmem:[%s2444_s18 + $0x2e] sm:$0x10] %v1390_v7 }
 0x175   : > { %3066 = vst [vmem:[%s2444_s18 + $0x2d] sm:$0x40] %v1390_v7 }
 0x176 LB: > { %s2455_s20 = smul.u32 24, %s4436_s19  ;;  %s3071_s21 = sshll.u32 %s4436_s19, 2  ;;  %s4436_s19 = sphi %s4434_s19, %s1409_s19  }
 0x177   : > { %s2463_s22 = scalar_lea.vmem [#allocation5], %s3071_s21  ;;  %s1409_s19 = sadd.s32 1, %s4436_s19  }
 0x178   : > { %s2456_s17 = scalar_lea.vmem [#allocation4], %s2455_s20  ;;  %p1406_p0 = scmp.ge.s32.totalorder %s1409_s19, 4  }
 0x179   : > { %v3067_v62 = vld [vmem:[%s2456_s17 + $0x180] sm:$0xff]  ;;  %v3070_v30 = vld [vmem:[%s2456_s17 + $0x18c] sm:$0xff]  ;;  %s4438_s23 = smov (%p1406_p0), 0  }
 0x17a   : > { %v1420_v2 = vmax.f32 %v3067_v62, %v3070_v30 }
 0x17c   : > { %v1422_v0 = vrot.slane %v1420_v2, 1 }
 0x17e   : > { %v1424_v56 = vmax.f32 %v1420_v2, %v1422_v0 }
 0x17f   :  { %1408 = sbr.rel (!%p1406_p0) target bundleno = 374 (0x176), region = 550 }
 0x180   : > { %3072 = vst [vmem:[%s2463_s22 + $0x40] sm:$0x1] %v1424_v56 }
 0x181   : > { %3074 = vst [vmem:[%s2463_s22 + $0x3f] sm:$0x4] %v1424_v56 }
 0x182   : > { %3076 = vst [vmem:[%s2463_s22 + $0x3e] sm:$0x10] %v1424_v56 }
 0x183   : > { %3078 = vst [vmem:[%s2463_s22 + $0x3d] sm:$0x40] %v1424_v56 }
 0x184 LB: > { %s2474_s7 = smul.u32 24, %s4440_s23  ;;  %s3083_s24 = sshll.u32 %s4440_s23, 2  ;;  %s4440_s23 = sphi %s4438_s23, %s1443_s23  }
 0x185   : > { %s2482_s6 = scalar_lea.vmem [#allocation5], %s3083_s24  ;;  %s1443_s23 = sadd.s32 1, %s4440_s23  }
 0x186   : > { %s2475_s25 = scalar_lea.vmem [#allocation4], %s2474_s7  ;;  %p1440_p1 = scmp.ge.s32.totalorder %s1443_s23, 4  }
 0x187   : > { %v3079_v9 = vld [vmem:[%s2475_s25 + $0x1e0] sm:$0xff]  ;;  %v3082_v3 = vld [vmem:[%s2475_s25 + $0x1ec] sm:$0xff]  ;;  %s4442_s1 = smov (%p1440_p1), 0  }
 0x188   : > { %v1454_v15 = vmax.f32 %v3079_v9, %v3082_v3 }
 0x18a   : > { %v1456_v50 = vrot.slane %v1454_v15, 1 }
 0x18c   : > { %v1458_v25 = vmax.f32 %v1454_v15, %v1456_v50 }
 0x18d   :  { %1442 = sbr.rel (!%p1440_p1) target bundleno = 388 (0x184), region = 561 }
 0x18e   : > { %3084 = vst [vmem:[%s2482_s6 + $0x50] sm:$0x1] %v1458_v25 }
 0x18f   : > { %3086 = vst [vmem:[%s2482_s6 + $0x4f] sm:$0x4] %v1458_v25 }
 0x190   : > { %3088 = vst [vmem:[%s2482_s6 + $0x4e] sm:$0x10] %v1458_v25 }
 0x191   : > { %3090 = vst [vmem:[%s2482_s6 + $0x4d] sm:$0x40] %v1458_v25 }
 0x192 LB: > { %s2493_s2 = smul.u32 24, %s4444_s1  ;;  %s3095_s0 = sshll.u32 %s4444_s1, 2  ;;  %s4444_s1 = sphi %s4442_s1, %s1477_s1  }
 0x193   : > { %s2501_s27 = scalar_lea.vmem [#allocation5], %s3095_s0  ;;  %s1477_s1 = sadd.s32 1, %s4444_s1  }
 0x194   : > { %s2494_s26 = scalar_lea.vmem [#allocation4], %s2493_s2  ;;  %p1474_p2 = scmp.ge.s32.totalorder %s1477_s1, 4  }
 0x195   : > { %v3091_v24 = vld [vmem:[%s2494_s26 + $0x240] sm:$0xff]  ;;  %v3094_v17 = vld [vmem:[%s2494_s26 + $0x24c] sm:$0xff]  ;;  %s4446_s28 = smov (%p1474_p2), 0  }
 0x196   : > { %v1488_v8 = vmax.f32 %v3091_v24, %v3094_v17 }
 0x198   : > { %v1490_v26 = vrot.slane %v1488_v8, 1 }
 0x19a   : > { %v1492_v31 = vmax.f32 %v1488_v8, %v1490_v26 }
 0x19b   :  { %1476 = sbr.rel (!%p1474_p2) target bundleno = 402 (0x192), region = 572 }
 0x19c   : > { %3096 = vst [vmem:[%s2501_s27 + $0x60] sm:$0x1] %v1492_v31 }
 0x19d   : > { %3098 = vst [vmem:[%s2501_s27 + $0x5f] sm:$0x4] %v1492_v31 }
 0x19e   : > { %3100 = vst [vmem:[%s2501_s27 + $0x5e] sm:$0x10] %v1492_v31 }
 0x19f   : > { %3102 = vst [vmem:[%s2501_s27 + $0x5d] sm:$0x40] %v1492_v31 }
 0x1a0 LB: > { %s2512_s4 = smul.u32 24, %s4448_s28  ;;  %s3107_s29 = sshll.u32 %s4448_s28, 2  ;;  %s4448_s28 = sphi %s4446_s28, %s1511_s28  }
 0x1a1   : > { %s2520_s30 = scalar_lea.vmem [#allocation5], %s3107_s29  ;;  %s1511_s28 = sadd.s32 1, %s4448_s28  }
 0x1a2   : > { %s2513_s5 = scalar_lea.vmem [#allocation4], %s2512_s4  ;;  %p1508_p3 = scmp.ge.s32.totalorder %s1511_s28, 4  }
 0x1a3   : > { %v3103_v29 = vld [vmem:[%s2513_s5 + $0x2a0] sm:$0xff]  ;;  %v3106_v18 = vld [vmem:[%s2513_s5 + $0x2ac] sm:$0xff]  ;;  %s4450_s15 = smov (%p1508_p3), 0  }
 0x1a4   : > { %v1522_v59 = vmax.f32 %v3103_v29, %v3106_v18 }
 0x1a6   : > { %v1524_v49 = vrot.slane %v1522_v59, 1 }
 0x1a8   : > { %v1526_v27 = vmax.f32 %v1522_v59, %v1524_v49 }
 0x1a9   :  { %1510 = sbr.rel (!%p1508_p3) target bundleno = 416 (0x1a0), region = 583 }
 0x1aa   : > { %3108 = vst [vmem:[%s2520_s30 + $0x70] sm:$0x1] %v1526_v27 }
 0x1ab   : > { %3110 = vst [vmem:[%s2520_s30 + $0x6f] sm:$0x4] %v1526_v27 }
 0x1ac   : > { %3112 = vst [vmem:[%s2520_s30 + $0x6e] sm:$0x10] %v1526_v27 }
 0x1ad   : > { %3114 = vst [vmem:[%s2520_s30 + $0x6d] sm:$0x40] %v1526_v27 }
 0x1ae LB: > { %s2531_s3 = smul.u32 24, %s4452_s15  ;;  %s3119_s18 = sshll.u32 %s4452_s15, 2  ;;  %s4452_s15 = sphi %s4450_s15, %s1545_s15  }
 0x1af   : > { %s2539_s19 = scalar_lea.vmem [#allocation5], %s3119_s18  ;;  %s1545_s15 = sadd.s32 1, %s4452_s15  }
 0x1b0   : > { %s2532_s16 = scalar_lea.vmem [#allocation4], %s2531_s3  ;;  %p1542_p4 = scmp.ge.s32.totalorder %s1545_s15, 4  }
 0x1b1   : > { %v3115_v45 = vld [vmem:[%s2532_s16 + $0x300] sm:$0xff]  ;;  %v3118_v40 = vld [vmem:[%s2532_s16 + $0x30c] sm:$0xff]  ;;  %s4454_s20 = smov (%p1542_p4), 0  }
 0x1b2   : > { %v1556_v33 = vmax.f32 %v3115_v45, %v3118_v40 }
 0x1b4   : > { %v1558_v35 = vrot.slane %v1556_v33, 1 }
 0x1b6   : > { %v1560_v14 = vmax.f32 %v1556_v33, %v1558_v35 }
 0x1b7   :  { %1544 = sbr.rel (!%p1542_p4) target bundleno = 430 (0x1ae), region = 594 }
 0x1b8   : > { %3120 = vst [vmem:[%s2539_s19 + $0x80] sm:$0x1] %v1560_v14 }
 0x1b9   : > { %3122 = vst [vmem:[%s2539_s19 + $0x7f] sm:$0x4] %v1560_v14 }
 0x1ba   : > { %3124 = vst [vmem:[%s2539_s19 + $0x7e] sm:$0x10] %v1560_v14 }
 0x1bb   : > { %3126 = vst [vmem:[%s2539_s19 + $0x7d] sm:$0x40] %v1560_v14 }
 0x1bc LB: > { %s2550_s17 = smul.u32 24, %s4456_s20  ;;  %s3131_s22 = sshll.u32 %s4456_s20, 2  ;;  %s4456_s20 = sphi %s4454_s20, %s1579_s20  }
 0x1bd   : > { %s2558_s23 = scalar_lea.vmem [#allocation5], %s3131_s22  ;;  %s1579_s20 = sadd.s32 1, %s4456_s20  }
 0x1be   : > { %s2551_s21 = scalar_lea.vmem [#allocation4], %s2550_s17  ;;  %p1576_p5 = scmp.ge.s32.totalorder %s1579_s20, 4  }
 0x1bf   : > { %v3127_v38 = vld [vmem:[%s2551_s21 + $0x360] sm:$0xff]  ;;  %v3130_v41 = vld [vmem:[%s2551_s21 + $0x36c] sm:$0xff]  ;;  %s4458_s7 = smov (%p1576_p5), 0  }
 0x1c0   : > { %v1590_v28 = vmax.f32 %v3127_v38, %v3130_v41 }
 0x1c2   : > { %v1592_v21 = vrot.slane %v1590_v28, 1 }
 0x1c4   : > { %v1594_v37 = vmax.f32 %v1590_v28, %v1592_v21 }
 0x1c5   :  { %1578 = sbr.rel (!%p1576_p5) target bundleno = 444 (0x1bc), region = 605 }
 0x1c6   : > { %3132 = vst [vmem:[%s2558_s23 + $0x90] sm:$0x1] %v1594_v37 }
 0x1c7   : > { %3134 = vst [vmem:[%s2558_s23 + $0x8f] sm:$0x4] %v1594_v37 }
 0x1c8   : > { %3136 = vst [vmem:[%s2558_s23 + $0x8e] sm:$0x10] %v1594_v37 }
 0x1c9   : > { %3138 = vst [vmem:[%s2558_s23 + $0x8d] sm:$0x40] %v1594_v37 }
 0x1ca LB: > { %s2569_s25 = smul.u32 24, %s4460_s7  ;;  %s3143_s6 = sshll.u32 %s4460_s7, 2  ;;  %s4460_s7 = sphi %s4458_s7, %s1613_s7  }
 0x1cb   : > { %s2577_s1 = scalar_lea.vmem [#allocation5], %s3143_s6  ;;  %s1613_s7 = sadd.s32 1, %s4460_s7  }
 0x1cc   : > { %s2570_s24 = scalar_lea.vmem [#allocation4], %s2569_s25  ;;  %p1610_p6 = scmp.ge.s32.totalorder %s1613_s7, 4  }
 0x1cd   : > { %v3139_v20 = vld [vmem:[%s2570_s24 + $0x3c0] sm:$0xff]  ;;  %v3142_v61 = vld [vmem:[%s2570_s24 + $0x3cc] sm:$0xff]  ;;  %s4462_s2 = smov (%p1610_p6), 0  }
 0x1ce   : > { %v1624_v23 = vmax.f32 %v3139_v20, %v3142_v61 }
 0x1d0   : > { %v1626_v46 = vrot.slane %v1624_v23, 1 }
 0x1d2   : > { %v1628_v53 = vmax.f32 %v1624_v23, %v1626_v46 }
 0x1d3   :  { %1612 = sbr.rel (!%p1610_p6) target bundleno = 458 (0x1ca), region = 616 }
 0x1d4   : > { %3144 = vst [vmem:[%s2577_s1 + $0xa0] sm:$0x1] %v1628_v53 }
 0x1d5   : > { %3146 = vst [vmem:[%s2577_s1 + $0x9f] sm:$0x4] %v1628_v53 }
 0x1d6   : > { %3148 = vst [vmem:[%s2577_s1 + $0x9e] sm:$0x10] %v1628_v53 }
 0x1d7   : > { %3150 = vst [vmem:[%s2577_s1 + $0x9d] sm:$0x40] %v1628_v53 }
 0x1d8 LB: > { %s2588_s26 = smul.u32 24, %s4464_s2  ;;  %s3155_s27 = sshll.u32 %s4464_s2, 2  ;;  %s4464_s2 = sphi %s4462_s2, %s1647_s2  }
 0x1d9   : > { %s2596_s28 = scalar_lea.vmem [#allocation5], %s3155_s27  ;;  %s1647_s2 = sadd.s32 1, %s4464_s2  }
 0x1da   : > { %s2589_s0 = scalar_lea.vmem [#allocation4], %s2588_s26  ;;  %p1644_p7 = scmp.ge.s32.totalorder %s1647_s2, 4  }
 0x1db   : > { %v3151_v57 = vld [vmem:[%s2589_s0 + $0x420] sm:$0xff]  ;;  %v3154_v63 = vld [vmem:[%s2589_s0 + $0x42c] sm:$0xff]  ;;  %v4477_v47 = vmov (%p1644_p7), 0   ;;  %v1741_v60 = vld [vmem:[%s6325_s9 + $0x58] sm:$0xff] (%p1644_p7)  ;;  %vm1820_vm0 = vcmask (%p1644_p7), 523264   ;;  %vm2061_vm1 = vcmask (%p1644_p7), 982016  }
 0x1dc   : > { %v1658_v5 = vmax.f32 %v3151_v57, %v3154_v63  ;;  %3786 = vset.pattern.permute.xlu1 (%p1644_p7), %v4477_v47  ;;  %3785 = vset.pattern.permute.xlu0 (%p1644_p7), %v4477_v47  ;;  %v1742_v48 = vld [vmem:[%s6325_s9 + $0x60] sm:$0xff] (%p1644_p7)  ;;  %v1744_v19 = vld [vmem:[%s6325_s9 + $0x70] sm:$0xff] (%p1644_p7)  ;;  %v1701_v11 = vld [vmem:[%s6324_s8 + $0x8] sm:$0xff] (%p1644_p7)  ;;  %vm2156_vm2 = vcmask (%p1644_p7), 1043456   ;;  %vm2149_vm3 = vcmask (%p1644_p7), 490496  }
 0x1dd   :  { %3787 = vset.pattern.permute.xlu2 (%p1644_p7), %v4477_v47  ;;  %1807 = vperm.xlu1 (%p1644_p7), %3786, %v1742_v48   ;;  %v1740_v43 = vld [vmem:[%s6325_s9 + $0x50] sm:$0xff] (%p1644_p7)  ;;  %v1743_v7 = vld [vmem:[%s6325_s9 + $0x68] sm:$0xff] (%p1644_p7)  ;;  %v1737_v56 = vld [vmem:[%s6325_s9 + $0x38] sm:$0xff] (%p1644_p7) }
 0x1de   : > { %v1660_v13 = vrot.slane %v1658_v5, 1  ;;  %1817 = vperm.xlu0 (%p1644_p7), %3785, %v1744_v19   ;;  %1797 = vperm.xlu2 (%p1644_p7), %3787, %v1740_v43   ;;  %v1739_v30 = vld [vmem:[%s6325_s9 + $0x48] sm:$0xff] (%p1644_p7)  ;;  %v1703_v9 = vld [vmem:[%s6324_s8 + $0x18] sm:$0xff] (%p1644_p7)  ;;  %v1738_v15 = vld [vmem:[%s6325_s9 + $0x40] sm:$0xff] (%p1644_p7) }
 0x1df   :  { %v1736_v25 = vld [vmem:[%s6325_s9 + $0x30] sm:$0xff] (%p1644_p7)  ;;  %v1700_v8 = vld [vmem:[%s6324_s8] sm:$0xff] (%p1644_p7)  ;;  %v1705_v31 = vld [vmem:[%s6324_s8 + $0x28] sm:$0xff] (%p1644_p7) }
 0x1e0   : > { %v1662_v42 = vmax.f32 %v1658_v5, %v1660_v13  ;;  %v1720_v26 = vld [vmem:[%s6324_s8 + $0xa0] sm:$0xff] (%p1644_p7)  ;;  %v1735_v18 = vld [vmem:[%s6325_s9 + $0x28] sm:$0xff] (%p1644_p7)  ;;  %v1733_v59 = vld [vmem:[%s6325_s9 + $0x18] sm:$0xff] (%p1644_p7) }
 0x1e1   :  { %1646 = sbr.rel (!%p1644_p7) target bundleno = 472 (0x1d8), region = 627  ;;  %v1734_v29 = vld [vmem:[%s6325_s9 + $0x20] sm:$0xff] (%p1644_p7)  ;;  %v1702_v49 = vld [vmem:[%s6324_s8 + $0x10] sm:$0xff] (%p1644_p7)  ;;  %v1707_v45 = vld [vmem:[%s6324_s8 + $0x38] sm:$0xff] (%p1644_p7) }
 0x1e2   : > { %3156 = vst [vmem:[%s2596_s28 + $0xb0] sm:$0x1] %v1662_v42  ;;  %v1722_v27 = vld [vmem:[%s6324_s8 + $0xb0] sm:$0xff] (%p1644_p7)  ;;  %v1731_v40 = vld [vmem:[%s6325_s9 + $0x8] sm:$0xff] (%p1644_p7)  ;;  %v1730_v35 = vld [vmem:[%s6325_s9] sm:$0xff] (%p1644_p7) }
 0x1e3   : > { %3158 = vst [vmem:[%s2596_s28 + $0xaf] sm:$0x4] %v1662_v42  ;;  %v1732_v33 = vld [vmem:[%s6325_s9 + $0x10] sm:$0xff] (%p1644_p7)  ;;  %v1704_v14 = vld [vmem:[%s6324_s8 + $0x20] sm:$0xff] (%p1644_p7)  ;;  %v1709_v41 = vld [vmem:[%s6324_s8 + $0x48] sm:$0xff] (%p1644_p7) }
 0x1e4   : > { %3160 = vst [vmem:[%s2596_s28 + $0xae] sm:$0x10] %v1662_v42  ;;  %v1724_v38 = vld [vmem:[%s6324_s8 + $0xc0] sm:$0xff] (%p1644_p7)  ;;  %v2020_v28 = vld [vmem:[%s6327_s11 + $0x38] sm:$0xf] (%p1644_p7)  ;;  %v2019_v21 = vld [vmem:[%s6327_s11 + $0x30] sm:$0xff] (%p1644_p7) }
 0x1e5   : > { %3162 = vst [vmem:[%s2596_s28 + $0xad] sm:$0x40] %v1662_v42  ;;  %1802 = vperm.xlu1 (%p1644_p7), %3786, %v1741_v60   ;;  %v1706_v37 = vld [vmem:[%s6324_s8 + $0x30] sm:$0xff] (%p1644_p7)  ;;  %v1711_v61 = vld [vmem:[%s6324_s8 + $0x58] sm:$0xff] (%p1644_p7)  ;;  %v2017_v23 = vld [vmem:[%s6327_s11 + $0x20] sm:$0xff] (%p1644_p7) }
 0x1e6   :  { %1812 = vperm.xlu0 %3785, %v1743_v7   ;;  %1792 = vperm.xlu2 %3787, %v1739_v30   ;;  %v1726_v20 = vld [vmem:[%s6324_s8 + $0xd0] sm:$0xff]  ;;  %v2016_v46 = vld [vmem:[%s6327_s11 + $0x18] sm:$0xff]  ;;  %v1708_v53 = vld [vmem:[%s6324_s8 + $0x40] sm:$0xff] }
 0x1e7   :  { %v1728_v57 = vld [vmem:[%s6324_s8 + $0xe0] sm:$0xff]  ;;  %v1713_v63 = vld [vmem:[%s6324_s8 + $0x68] sm:$0xff]  ;;  %v1710_v42 = vld [vmem:[%s6324_s8 + $0x50] sm:$0xff] }
 0x1e8   :  { %v2014_v5 = vld [vmem:[%s6327_s11 + $0x8] sm:$0xff]  ;;  %v2013_v13 = vld [vmem:[%s6327_s11] sm:$0xff] }
 0x1e9   :  { %v1717_v47 = vld [vmem:[%s6324_s8 + $0x88] sm:$0xff] }
 0x1ea   :  { %v1729_v48 = vld [vmem:[%s6324_s8 + $0xe8] sm:$0xff] }
 0x1eb   :  { %v1721_v19 = vld [vmem:[%s6324_s8 + $0xa8] sm:$0xff] }
 0x1ec   :  { %v1691_v36 = vld [vmem:[#allocation5 + $0x78] sm:$0xff]  ;;  %v1690_v16 = vld [vmem:[#allocation5 + $0x70] sm:$0xff]  ;;  %v1689_v58 = vld [vmem:[#allocation5 + $0x68] sm:$0xff] }
 0x1ed   :  { %v6039_v39 = vld [vmem:[#allocation5 + $0xb8] sm:$0xff]  ;;  %1866 = vmatpush.msra.mxu0 %v1691_v36  ;;  %3189 = vmatpush.msra.mxu3 %v1691_v36  ;;  %v6041_v22 = vld [vmem:[#allocation5 + $0xb0] sm:$0xff]  ;;  %v6044_v32 = vld [vmem:[#allocation5 + $0xa8] sm:$0xff] }
 0x1ee   :  { %1936 = vmatpush.msra.mxu1 %v6039_v39  ;;  %v1688_v34 = vld [vmem:[#allocation5 + $0x60] sm:$0xff]  ;;  %v1687_v52 = vld [vmem:[#allocation5 + $0x58] sm:$0xff]  ;;  %v1686_v51 = vld [vmem:[#allocation5 + $0x50] sm:$0xff]  ;;  %1782 = vperm.xlu1 %3786, %v1737_v56  }
 0x1ef   :  { %1867 = vmatpush.msra.mxu0 %v1690_v16  ;;  %3190 = vmatpush.msra.mxu3 %v1690_v16  ;;  %v6047_v54 = vld [vmem:[#allocation5 + $0xa0] sm:$0xff]  ;;  %v6053_v55 = vld [vmem:[#allocation5 + $0x98] sm:$0xff]  ;;  %v6059_v12 = vld [vmem:[#allocation5 + $0x90] sm:$0xff] }
 0x1f0   :  { %1937 = vmatpush.msra.mxu1 %v6041_v22  ;;  %v1685_v10 = vld [vmem:[#allocation5 + $0x48] sm:$0xff]  ;;  %v1684_v44 = vld [vmem:[#allocation5 + $0x40] sm:$0xff]  ;;  %v1683_v1 = vld [vmem:[#allocation5 + $0x38] sm:$0xff]  ;;  %1787 = vperm.xlu0 %3785, %v1738_v15  }
 0x1f1   :  { %1868 = vmatpush.msra.mxu0 %v1689_v58  ;;  %3191 = vmatpush.msra.mxu3 %v1689_v58  ;;  %v6062_v6 = vld [vmem:[#allocation5 + $0x88] sm:$0xff]  ;;  %v6068_v4 = vld [vmem:[#allocation5 + $0x80] sm:$0xff]  ;;  %v1682_v62 = vld [vmem:[#allocation5 + $0x30] sm:$0xff] }
 0x1f2   :  { %1938 = vmatpush.msra.mxu1 %v6044_v32  ;;  %v1681_v2 = vld [vmem:[#allocation5 + $0x28] sm:$0xff]  ;;  %v1680_v0 = vld [vmem:[#allocation5 + $0x20] sm:$0xff]  ;;  %v1679_v3 = vld [vmem:[#allocation5 + $0x18] sm:$0xff]  ;;  %1777 = vperm.xlu2 %3787, %v1736_v25  }
 0x1f3   :  { %1869 = vmatpush.msra.mxu0 %v1688_v34  ;;  %3192 = vmatpush.msra.mxu3 %v1688_v34  ;;  %v1678_v50 = vld [vmem:[#allocation5 + $0x10] sm:$0xff]  ;;  %v1677_v24 = vld [vmem:[#allocation5 + $0x8] sm:$0xff]  ;;  %v1676_v17 = vld [vmem:[#allocation5] sm:$0xff] }
 0x1f4   :  { %1939 = vmatpush.msra.mxu1 %v6047_v54  ;;  %v1715_v36 = vld [vmem:[%s6324_s8 + $0x78] sm:$0xff]  ;;  %v2138_v16 = vld [vmem:[%s6329_s13 + $0x8] sm:$0x3]  ;;  %v1712_v58 = vld [vmem:[%s6324_s8 + $0x60] sm:$0xff] }
 0x1f5   :  { %1870 = vmatpush.msra.mxu0 %v1687_v52  ;;  %3193 = vmatpush.msra.mxu3 %v1687_v52  ;;  %v2015_v34 = vld [vmem:[%s6327_s11 + $0x10] sm:$0xff]  ;;  %v1719_v52 = vld [vmem:[%s6324_s8 + $0x98] sm:$0xff] }
 0x1f6   :  { %1940 = vmatpush.msra.mxu1 %v6053_v55  ;;  %1767 = vperm.xlu1 %3786, %v1734_v29  }
 0x1f7   :  { %1871 = vmatpush.msra.mxu0 %v1686_v51  ;;  %3194 = vmatpush.msra.mxu3 %v1686_v51  ;;  %v1716_v51 = vld [vmem:[%s6324_s8 + $0x80] sm:$0xff] }
 0x1f8   :  { %1941 = vmatpush.msra.mxu1 %v6059_v12  ;;  %1772 = vperm.xlu0 %3785, %v1735_v18  }
 0x1f9   :  { %1872 = vmatpush.msra.mxu0 %v1685_v10  ;;  %3195 = vmatpush.msra.mxu3 %v1685_v10  ;;  %v1723_v10 = vld [vmem:[%s6324_s8 + $0xb8] sm:$0xff] }
 0x1fa   :  { %1942 = vmatpush.msra.mxu1 %v6062_v6  ;;  %1762 = vperm.xlu2 %3787, %v1733_v59  }
 0x1fb   :  { %1873 = vmatpush.msra.mxu0 %v1684_v44  ;;  %3196 = vmatpush.msra.mxu3 %v1684_v44 }
 0x1fc   :  { %1943 = vmatpush.msra.mxu1 %v6068_v4 }
 0x1fd   :  { %3163 = vmatmul.msk.f32.vlgmr.msra.gmra.mxu1 %vm1820_vm0, %v1701_v11  ;;  %1874 = vmatpush.msra.mxu0 %v1683_v1 }
 0x1fe   :  { %3197 = vmatpush.msra.mxu3 %v1683_v1  ;;  %1752 = vperm.xlu1 %3786, %v1731_v40  }
 0x1ff   :  { %1875 = vmatpush.msra.mxu0 %v1682_v62 }
 0x200   :  { %3198 = vmatpush.msra.mxu3 %v1682_v62  ;;  %1757 = vperm.xlu0 %3785, %v1732_v33  }
 0x201   :  { %1876 = vmatpush.msra.mxu0 %v1681_v2 }
 0x202   :  { %3199 = vmatpush.msra.mxu3 %v1681_v2  ;;  %1747 = vperm.xlu2 %3787, %v1730_v35  }
 0x203   :  { %1877 = vmatpush.msra.mxu0 %v1680_v0 }
 0x204   :  { %3200 = vmatpush.msra.mxu3 %v1680_v0 }
 0x205   :  { %3164 = vmatmul.msk.f32.gmra.mxu1 %vm1820_vm0, %v1703_v9  ;;  %1878 = vmatpush.msra.mxu0 %v1679_v3 }
 0x206   :  { %3201 = vmatpush.msra.mxu3 %v1679_v3  ;;  %2053 = vperm.xlu1 %3786, %v2019_v21  }
 0x207   :  { %1879 = vmatpush.msra.mxu0 %v1678_v50 }
 0x208   :  { %3202 = vmatpush.msra.mxu3 %v1678_v50  ;;  %2058 = vperm.xlu0 %3785, %v2020_v28  }
 0x209   :  { %1880 = vmatpush.msra.mxu0 %v1677_v24 }
 0x20a   :  { %3203 = vmatpush.msra.mxu3 %v1677_v24 }
 0x20b   :  { %1881 = vmatpush.msra.mxu0 %v1676_v17 }
 0x20c   :  { %3204 = vmatpush.msra.mxu3 %v1676_v17  ;;  %1882 = vmatmul.f32.vlgmr.msra.gmra.mxu0 %v1700_v8 }
 0x20d   :  { %1912 = vmatmul.f32.vlgmr.msra.gmra.mxu3 %v1720_v26  ;;  %3165 = vmatmul.msk.f32.gmra.mxu1 %vm1820_vm0, %v1705_v31 }
 0x20e   :  { %3205 = vmatpush.msrb.mxu3 %v6039_v39  ;;  %2038 = vperm.xlu1 %3786, %v2016_v46   ;;  %v1725_v39 = vld [vmem:[%s6324_s8 + $0xc8] sm:$0xff] }
 0x210   :  { %3206 = vmatpush.msrb.mxu3 %v6041_v22  ;;  %2043 = vperm.xlu0 %3785, %v2017_v23   ;;  %v2018_v22 = vld [vmem:[%s6327_s11 + $0x28] sm:$0xff] }
 0x211   :  { %2048 = vperm.xlu2 %3787, %v2018_v22  }
 0x212   :  { %3207 = vmatpush.msrb.mxu3 %v6044_v32  ;;  %v1727_v32 = vld [vmem:[%s6324_s8 + $0xd8] sm:$0xff] }
 0x214   :  { %1885 = vmatmul.f32.gmra.mxu0 %v1702_v49  ;;  %3208 = vmatpush.msrb.mxu3 %v6047_v54  ;;  %v1714_v54 = vld [vmem:[%s6324_s8 + $0x70] sm:$0xff] }
 0x215   :  { %1915 = vmatmul.f32.gmra.mxu3 %v1722_v27  ;;  %3166 = vmatmul.msk.f32.gmra.mxu1 %vm1820_vm0, %v1707_v45 }
 0x216   :  { %3209 = vmatpush.msrb.mxu3 %v6053_v55  ;;  %2023 = vperm.xlu1 %3786, %v2013_v13   ;;  %v2137_v55 = vld [vmem:[%s6329_s13] sm:$0xff] }
 0x218   :  { %3210 = vmatpush.msrb.mxu3 %v6059_v12  ;;  %2028 = vperm.xlu0 %3785, %v2014_v5   ;;  %v1718_v12 = vld [vmem:[%s6324_s8 + $0x90] sm:$0xff] }
 0x219   :  { %2033 = vperm.xlu2 %3787, %v2015_v34  }
 0x21a   :  { %3211 = vmatpush.msrb.mxu3 %v6062_v6 }
 0x21c   :  { %1888 = vmatmul.f32.gmra.mxu0 %v1704_v14  ;;  %3212 = vmatpush.msrb.mxu3 %v6068_v4 }
 0x21d   :  { %1918 = vmatmul.f32.gmra.mxu3 %v1724_v38  ;;  %3167 = vmatmul.msk.f32.gmra.mxu1 %vm1820_vm0, %v1709_v41 }
 0x220   :  { %2146 = vperm.xlu0 %3785, %v2138_v16  }
 0x221   :  { %2141 = vperm.xlu2 %3787, %v2137_v55  }
 0x224   :  { %1891 = vmatmul.f32.gmra.mxu0 %v1706_v37 }
 0x225   :  { %1921 = vmatmul.f32.gmra.mxu3 %v1726_v20  ;;  %3168 = vmatmul.msk.f32.gmra.mxu1 %vm1820_vm0, %v1711_v61 }
 0x22c   :  { %1894 = vmatmul.f32.gmra.mxu0 %v1708_v53 }
 0x22d   :  { %1924 = vmatmul.f32.gmra.mxu3 %v1728_v57  ;;  %3169 = vmatmul.msk.f32.gmra.mxu1 %vm1820_vm0, %v1713_v63 }
 0x234   :  { %1897 = vmatmul.f32.gmra.mxu0 %v1710_v42 }
 0x235   :  { %3170 = vmatmul.msk.f32.gmra.mxu1 %vm1820_vm0, %v1715_v36  ;;  %3175 = vmatmul.msk.f32.vlgmr.msrb.gmra.mxu3 %vm1820_vm0, %v1725_v39 }
 0x238   :  { %v1798_v6 = vpop.permute.xlu2 %1797 }
 0x23c   :  { %1900 = vmatmul.f32.gmra.mxu0 %v1712_v58 }
 0x23d   :  { %3171 = vmatmul.msk.f32.gmra.mxu1 %vm1820_vm0, %v1717_v47  ;;  %3176 = vmatmul.msk.f32.gmra.mxu3 %vm1820_vm0, %v1727_v32 }
 0x240   :  { %v1793_v44 = vpop.permute.xlu2 %1792 }
 0x244   :  { %1903 = vmatmul.f32.gmra.mxu0 %v1714_v54 }
 0x245   :  { %3172 = vmatmul.msk.f32.gmra.mxu1 %vm1820_vm0, %v1719_v52  ;;  %3177 = vmatmul.msk.f32.gmra.mxu3 %vm1820_vm0, %v1729_v48 }
 0x24c   :  { %1906 = vmatmul.f32.gmra.mxu0 %v1716_v51  ;;  %v6251_v11 = vpop.permute.xlu2 %1777 }
 0x24d   :  { %3173 = vmatmul.msk.f32.gmra.mxu1 %vm1820_vm0, %v1721_v19 }
 0x24f   :  { %v1808_v43 = vpop.permute.xlu1 %1807 }
 0x250   :  { %v1818_v4 = vpop.permute.xlu0 %1817 }
 0x254   :  { %1909 = vmatmul.f32.gmra.mxu0 %v1718_v12  ;;  %v6253_v30 = vpop.permute.xlu2 %1762 }
 0x255   :  { %3174 = vmatmul.msk.f32.gmra.mxu1 %vm1820_vm0, %v1723_v10 }
 0x257   :  { %v1803_v60 = vpop.permute.xlu1 %1802 }
 0x258   :  { %v1813_v1 = vpop.permute.xlu0 %1812 }
 0x25c   :  { %v1748_v9 = vpop.permute.xlu2 %1747 }
 0x260   :  { %v1783_v62 = vpop.permute.xlu1 %1782 }
 0x262   :  { %v1788_v0 = vpop.permute.xlu0 %1787 }
 0x268   :  { %v6255_v56 = vpop.permute.xlu1 %1767 }
 0x26a   :  { %v1773_v24 = vpop.permute.xlu0 %1772 }
 0x270   :  { %v1753_v17 = vpop.permute.xlu1 %1752 }
 0x272   :  { %v1758_v59 = vpop.permute.xlu0 %1757 }
 0x27a   :  { %v1945_v7 = vpop.f32.mrf.mxu1 }
 0x282   :  { %v1948_v2 = vpop.f32.mrf.mxu1 }
 0x289   :  { %v1883_v3 = vpop.f32.mrf.mxu0 }
 0x28a   :  { %v1884_v15 = vadd.f32 %v1883_v3, %v1748_v9  ;;  %v1951_v50 = vpop.f32.mrf.mxu1 }
 0x28c   :  { %v6257_v25 = vadd.f32 %v1945_v7, %v1884_v15 }
 0x290   :  { %v1913_v8 = vpop.f32.mrf.mxu3 }
 0x291   :  { %v1886_v26 = vpop.f32.mrf.mxu0  ;;  %v1914_v48 = vadd.f32 %v1913_v8, %v1798_v6 }
 0x292   :  { %v1887_v31 = vadd.f32 %v1886_v26, %v1753_v17  ;;  %v6259_v29 = vpop.f32.mrf.mxu1 }
 0x294   :  { %v6261_v18 = vadd.f32 %v1948_v2, %v1887_v31 }
 0x298   :  { %v1916_v49 = vpop.f32.mrf.mxu3 }
 0x299   :  { %v1889_v27 = vpop.f32.mrf.mxu0  ;;  %v1917_v55 = vadd.f32 %v1916_v49, %v1803_v60 }
 0x29a   :  { %v1890_v45 = vadd.f32 %v1889_v27, %v1758_v59  ;;  %v1957_v40 = vpop.f32.mrf.mxu1 }
 0x29c   :  { %v6263_v33 = vadd.f32 %v1951_v50, %v1890_v45  ;;  %v1990_v45 = vmax.f32 %v6257_v25, 0.0  ;;  %v2008_v25 = vld [vmem:[%s6326_s10 + $0x18] sm:$0xff] }
 0x2a0   :  { %v1919_v35 = vpop.f32.mrf.mxu3 }
 0x2a1   :  { %v1892_v14 = vpop.f32.mrf.mxu0  ;;  %v1920_v39 = vadd.f32 %v1919_v35, %v1808_v43  ;;  %v2010_v35 = vld [vmem:[%s6326_s10 + $0x28] sm:$0xff] }
 0x2a2   :  { %v1960_v38 = vpop.f32.mrf.mxu1 }
 0x2a8   :  { %v1922_v41 = vpop.f32.mrf.mxu3 }
 0x2a9   :  { %v1895_v28 = vpop.f32.mrf.mxu0  ;;  %v1923_v13 = vadd.f32 %v1922_v41, %v1813_v1 }
 0x2aa   :  { %v1963_v21 = vpop.f32.mrf.mxu1  ;;  %v1896_v60 = vadd.f32 %v1895_v28, %v6255_v56  ;;  %v1992_v56 = vmax.f32 %v6263_v33, 0.0  ;;  %v2009_v33 = vld [vmem:[%s6326_s10 + $0x20] sm:$0xff] }
 0x2b0   :  { %v1925_v37 = vpop.f32.mrf.mxu3 }
 0x2b1   :  { %v1898_v20 = vpop.f32.mrf.mxu0  ;;  %v1926_v42 = vadd.f32 %v1925_v37, %v1818_v4 }
 0x2b2   :  { %v1966_v61 = vpop.f32.mrf.mxu1  ;;  %v1899_v50 = vadd.f32 %v1898_v20, %v1773_v24 }
 0x2b4   :  { %v1961_v26 = vadd.f32 %v1960_v38, %v1899_v50  ;;  %v2012_v38 = vld [vmem:[%s6326_s10 + $0x38] sm:$0xf] }
 0x2b6   :  { %v1995_v59 = vmax.f32 %v1961_v26, 0.0 }
 0x2b8   :  { %v1981_v23 = vpop.f32.mrf.mxu3 }
 0x2b9   :  { %v1901_v46 = vpop.f32.mrf.mxu0  ;;  %v1982_v32 = vadd.f32 %v1981_v23, %v1920_v39  ;;  %v2059_v23 = vpop.permute.xlu0 %2058 }
 0x2ba   :  { %v1969_v53 = vpop.f32.mrf.mxu1  ;;  %v1902_v9 = vadd.f32 %v1901_v46, %v6251_v11  ;;  %v1958_v11 = vadd.f32 %v1957_v40, %v1896_v60  ;;  %v2005_v40 = vld [vmem:[%s6326_s10] sm:$0xff]  ;;  %v2054_v46 = vpop.permute.xlu1 %2053 }
 0x2bb   :  { %v2002_v52 = vmax.f32 %v1982_v32, 0.0 }
 0x2bc   :  { %v1964_v8 = vadd.f32 %v1963_v21, %v1902_v9  ;;  %v1994_v49 = vmax.f32 %v1958_v11, 0.0 }
 0x2be   :  { %v1996_v31 = vmax.f32 %v1964_v8, 0.0 }
 0x2c0   :  { %v1984_v57 = vpop.f32.mrf.mxu3 }
 0x2c1   :  { %v1904_v63 = vpop.f32.mrf.mxu0  ;;  %v1985_v16 = vadd.f32 %v1984_v57, %v1923_v13  ;;  %v2049_v57 = vpop.permute.xlu2 %2048 }
 0x2c2   :  { %v1972_v5 = vpop.f32.mrf.mxu1  ;;  %v1905_v43 = vadd.f32 %v1904_v63, %v1783_v62  ;;  %v2044_v63 = vpop.permute.xlu0 %2043 }
 0x2c3   :  { %v2003_v54 = vmax.f32 %v1985_v16, 0.0 }
 0x2c4   :  { %v1967_v6 = vadd.f32 %v1966_v61, %v1905_v43  ;;  %v2135_v43 = vld [vmem:[%s6328_s12] sm:$0xff] }
 0x2c6   :  { %v1997_v62 = vmax.f32 %v1967_v6, 0.0 }
 0x2c8   :  { %v1987_v36 = vpop.f32.mrf.mxu3 }
 0x2c9   :  { %v1907_v22 = vpop.f32.mrf.mxu0  ;;  %v1988_v58 = vadd.f32 %v1987_v36, %v1926_v42  ;;  %v2039_v36 = vpop.permute.xlu1 %2038 }
 0x2ca   :  { %v1975_v47 = vpop.f32.mrf.mxu1  ;;  %v1908_v10 = vadd.f32 %v1907_v22, %v1788_v0  ;;  %v1893_v0 = vadd.f32 %v1892_v14, %v6253_v30  ;;  %v1991_v30 = vmax.f32 %v6261_v18, 0.0  ;;  %v2007_v18 = vld [vmem:[%s6326_s10 + $0x10] sm:$0xff] }
 0x2cb   :  { %v2004_v34 = vmax.f32 %v1988_v58, 0.0  ;;  %v1976_v4 = vadd.f32 %v1975_v47, %v1914_v48  ;;  %v2011_v14 = vld [vmem:[%s6326_s10 + $0x30] sm:$0xff]  ;;  %v2029_v48 = vpop.permute.xlu0 %2028 }
 0x2cc   :  { %v1970_v15 = vadd.f32 %v1969_v53, %v1908_v10  ;;  %v1955_v24 = vadd.f32 %v6259_v29, %v1893_v0  ;;  %v2006_v29 = vld [vmem:[%s6326_s10 + $0x8] sm:$0xff] }
 0x2cd   :  { %2087 = vmatpush.msra.mxu2 %v2004_v34  ;;  %v2000_v3 = vmax.f32 %v1976_v4, 0.0  ;;  %v2034_v34 = vpop.permute.xlu2 %2033 }
 0x2ce   :  { %v1993_v27 = vmax.f32 %v1955_v24, 0.0 }
 0x2cf   :  { %2088 = vmatpush.msra.mxu2 %v2003_v54 }
 0x2d1   :  { %2089 = vmatpush.msra.mxu2 %v2002_v52  ;;  %v1910_v51 = vpop.f32.mrf.mxu0 }
 0x2d2   :  { %v1911_v19 = vadd.f32 %v1910_v51, %v1793_v44  ;;  %v1978_v12 = vpop.f32.mrf.mxu1  ;;  %v1998_v44 = vmax.f32 %v1970_v15, 0.0 }
 0x2d3   :  { %v1979_v1 = vadd.f32 %v1978_v12, %v1917_v55  ;;  %v2147_v15 = vpop.permute.xlu0 %2146 }
 0x2d4   :  { %v1973_v2 = vadd.f32 %v1972_v5, %v1911_v19  ;;  %v2024_v19 = vpop.permute.xlu1 %2023 }
 0x2d5   :  { %v2001_v7 = vmax.f32 %v1979_v1, 0.0 }
 0x2d6   :  { %v1999_v17 = vmax.f32 %v1973_v2, 0.0  ;;  %v2142_v2 = vpop.permute.xlu2 %2141 }
 0x2d7   :  { %2090 = vmatpush.msra.mxu2 %v2001_v7  ;;  %v2136_v7 = vld [vmem:[%s6328_s12 + $0x8] sm:$0x3] }
 0x2d9   :  { %2091 = vmatpush.msra.mxu2 %v2000_v3 }
 0x2db   :  { %2092 = vmatpush.msra.mxu2 %v1999_v17 }
 0x2dd   :  { %2093 = vmatpush.msra.mxu2 %v1998_v44 }
 0x2df   :  { %2094 = vmatpush.msra.mxu2 %v1997_v62 }
 0x2e1   :  { %2095 = vmatpush.msra.mxu2 %v1996_v31 }
 0x2e3   :  { %2096 = vmatpush.msra.mxu2 %v1995_v59 }
 0x2e5   :  { %2097 = vmatpush.msra.mxu2 %v1994_v49 }
 0x2e7   :  { %2098 = vmatpush.msra.mxu2 %v1993_v27 }
 0x2e9   :  { %2099 = vmatpush.msra.mxu2 %v1992_v56 }
 0x2eb   :  { %2100 = vmatpush.msra.mxu2 %v1991_v30 }
 0x2ed   :  { %2101 = vmatpush.msra.mxu2 %v1990_v45 }
 0x2ee   :  { %3178 = vmatmul.msk.f32.vlgmr.msra.gmra.mxu2 %vm2061_vm1, %v2005_v40 }
 0x2f6   :  { %3179 = vmatmul.msk.f32.gmra.mxu2 %vm2061_vm1, %v2006_v29 }
 0x2fe   :  { %3180 = vmatmul.msk.f32.gmra.mxu2 %vm2061_vm1, %v2007_v18 }
 0x306   :  { %3181 = vmatmul.msk.f32.gmra.mxu2 %vm2061_vm1, %v2008_v25 }
 0x30e   :  { %3182 = vmatmul.msk.f32.gmra.mxu2 %vm2061_vm1, %v2009_v33 }
 0x316   :  { %3183 = vmatmul.msk.f32.gmra.mxu2 %vm2061_vm1, %v2010_v35 }
 0x31e   :  { %3184 = vmatmul.msk.f32.gmra.mxu2 %vm2061_vm1, %v2011_v14 }
 0x326   :  { %3185 = vmatmul.msk.f32.gmra.mxu2 %vm2061_vm1, %v2012_v38 }
 0x371   :  { %v2103_v41 = vpop.f32.mrf.mxu2 }
 0x372   :  { %v2104_v12 = vadd.f32 %v2103_v41, %v2024_v19 }
 0x374   :  { %v2127_v1 = vmax.f32 %v2104_v12, 0.0 }
 0x379   :  { %v2106_v28 = vpop.f32.mrf.mxu2 }
 0x37a   :  { %v2107_v55 = vadd.f32 %v2106_v28, %v2029_v48 }
 0x37c   :  { %v2128_v4 = vmax.f32 %v2107_v55, 0.0 }
 0x381   :  { %v2109_v21 = vpop.f32.mrf.mxu2 }
 0x382   :  { %v2110_v54 = vadd.f32 %v2109_v21, %v2034_v34 }
 0x384   :  { %v2129_v10 = vmax.f32 %v2110_v54, 0.0 }
 0x389   :  { %v2112_v37 = vpop.f32.mrf.mxu2 }
 0x38a   :  { %v2113_v47 = vadd.f32 %v2112_v37, %v2039_v36 }
 0x38c   :  { %v2130_v51 = vmax.f32 %v2113_v47, 0.0 }
 0x391   :  { %v2115_v20 = vpop.f32.mrf.mxu2 }
 0x392   :  { %v2116_v22 = vadd.f32 %v2115_v20, %v2044_v63 }
 0x394   :  { %v2131_v52 = vmax.f32 %v2116_v22, 0.0 }
 0x399   :  { %v2118_v61 = vpop.f32.mrf.mxu2 }
 0x39a   :  { %v2119_v39 = vadd.f32 %v2118_v61, %v2049_v57 }
 0x39c   :  { %v2132_v32 = vmax.f32 %v2119_v39, 0.0 }
 0x3a1   :  { %v2121_v53 = vpop.f32.mrf.mxu2 }
 0x3a2   :  { %v2122_v13 = vadd.f32 %v2121_v53, %v2054_v46 }
 0x3a4   :  { %v2133_v58 = vmax.f32 %v2122_v13, 0.0 }
 0x3a9   :  { %v2124_v5 = vpop.f32.mrf.mxu2 }
 0x3aa   :  { %v2125_v42 = vadd.f32 %v2124_v5, %v2059_v23 }
 0x3ac   :  { %v2134_v16 = vmax.f32 %v2125_v42, 0.0 }
 0x3ae   :  { %3186 = vmatpush.msk.msra.mxu3 %vm2156_vm2, %v2134_v16 }
 0x3b0   :  { %2169 = vmatpush.msra.mxu3 %v2133_v58 }
 0x3b2   :  { %2170 = vmatpush.msra.mxu3 %v2132_v32 }
 0x3b4   :  { %2171 = vmatpush.msra.mxu3 %v2131_v52 }
 0x3b6   :  { %2172 = vmatpush.msra.mxu3 %v2130_v51 }
 0x3b8   :  { %2173 = vmatpush.msra.mxu3 %v2129_v10 }
 0x3ba   :  { %2174 = vmatpush.msra.mxu3 %v2128_v4 }
 0x3bc   :  { %2175 = vmatpush.msra.mxu3 %v2127_v1 }
 0x3bd   :  { %3187 = vmatmul.msk.f32.vlgmr.msra.gmra.mxu3 %vm2149_vm3, %v2135_v43 }
 0x3c5   :  { %3188 = vmatmul.msk.f32.gmra.mxu3 %vm2149_vm3, %v2136_v7 }
 0x440   :  { %v2177_v9 = vpop.f32.mrf.mxu3 }
 0x441   :  { %v2178_v3 = vadd.f32 %v2177_v9, %v2142_v2 }
 0x443   :  { %2183 = vst [vmem:[%s6330_s14] sm:$0xff] %v2178_v3 }
 0x448   :  { %v2180_v50 = vpop.f32.mrf.mxu3 }
 0x449   :  { %v2181_v17 = vadd.f32 %v2180_v50, %v2147_v15 }
 0x44b   :  { %2184 = vst [vmem:[%s6330_s14 + $0x8] sm:$0x3] %v2181_v17 }
 0x44c   :  { %2189 = vsyncpa [#allocation7], 1 }
 0x44d   :  { %2190 = vsyncpa [#allocation8], 1 }
 0x44e   :  { %2191 = vsyncpa [#allocation11], 1 }
 0x44f   :  { %2192 = vsyncpa [#allocation14], 1 }
 0x450   :  { %2193 = vsyncpa [#allocation17], 1 }

</bundles_post_ra>
